<compile_context>
chip_gen: v6e
topology: v6e:2x2x1
jax: 0.10.0
libtpu: 0.0.40
codegen_flags: <defaults>
</compile_context>

<pallas_src>
import math
import functools

import jax
import jax.numpy as jnp
from jax.experimental import pallas as pl
from jax.experimental.pallas import tpu as pltpu

_EPS = 1e-5        # BatchNorm eps (PyTorch default)
_SLOPE = 0.2       # LeakyReLU negative slope (sdgraph convention)
_VMEM_LIMIT = 32 * 1024 * 1024   # safe scoped-VMEM budget on v5e/v6e/v7x


def _cparams():
    return pltpu.CompilerParams(
        dimension_semantics=("parallel", "parallel"),
        vmem_limit_bytes=_VMEM_LIMIT)


def _ceil128(c):
    return ((c + 127) // 128) * 128


def _row_tile(n, target=512):
    """Largest multiple-of-8 divisor of n that is <= target (n if n <= target)."""
    if n <= target:
        return n
    t = (target // 8) * 8
    while n % t:
        t -= 8
    return t


def _lrelu(x):
    return jnp.where(x > 0.0, x, _SLOPE * x)


# ---------------------------------------------------------------- kernels ---

def _knn_kernel(q_ref, keys_ref, kk_ref, o_ref, *, k):
    """Fused pairwise-score + top-k neighbour selection for one row tile.

    q: [TN, C] query tile, keys: [N, C] all points of the batch, kk: [1, N]
    squared key norms.  score[n, m] = 2*q_n.k_m - ||k_m||^2 (the row-constant
    -||q_n||^2 of the torch score is dropped; it does not change the per-row
    ordering).  Top-k is an iterative arg-max (k is small), so the [N, N]
    score matrix never leaves VMEM.
    """
    tn = q_ref.shape[1]
    n = keys_ref.shape[1]
    score = 2.0 * jnp.einsum('nc,mc->nm', q_ref[0], keys_ref[0],
                             preferred_element_type=jnp.float32) - kk_ref[0]
    col_i = jax.lax.broadcasted_iota(jnp.int32, (tn, n), 1)
    col_f = col_i.astype(jnp.float32)
    kcol = jax.lax.broadcasted_iota(jnp.int32, (tn, k), 1)
    out = jnp.zeros((tn, k), jnp.int32)
    neg = jnp.float32(-jnp.inf)
    for j in range(k):                                # k is small: static unroll
        m = jnp.max(score, axis=-1, keepdims=True)    # [TN, 1]
        cand = jnp.where(score == m, col_f, jnp.float32(n))
        idx_f = jnp.min(cand, axis=-1, keepdims=True)  # lowest index among ties
        idx_i = idx_f.astype(jnp.int32)               # [TN, 1]
        out = jnp.where(kcol == j, idx_i, out)
        score = jnp.where(col_i == idx_i, neg, score)
    o_ref[...] = out[None]


def _edge_kernel(idx_ref, pts_ref, ctr_ref, w1n_ref, w1c_ref, b1_ref,
                 s1_ref, t1_ref, w2_ref, b2_ref, s2_ref, t2_ref, o_ref,
                 *, stage, nnear):
    """DGCNN edge-conv tile.

    stage 1: emit (sum, sumsq) partials of z1 = conv1_layer1(graph_feature)
    stage 2: emit (sum, sumsq) partials of z2 = layer2(lrelu(bn1(z1)))
    stage 3: emit max over the k neighbours of lrelu(bn2(z2))    [TN, H2]
    The neighbour gather is done in-kernel as a one-hot MXU matmul, folded
    through the layer-1 neighbour weight, so the k-fold feature tensor is
    never materialized.
    """
    tn = ctr_ref.shape[1]
    n = pts_ref.shape[1]
    h1w = w1n_ref.shape[1]
    h2w = w2_ref.shape[1]

    ids = idx_ref[0]                                   # [TN, k] int32
    pts = pts_ref[0].astype(jnp.bfloat16)              # [N, C]
    ctr = ctr_ref[0].astype(jnp.bfloat16)              # [TN, C]
    w1n = w1n_ref[...]                                 # bf16 [C, H1]  (diff half)
    w2 = w2_ref[...]                                   # bf16 [H1, H2]

    # project every point through the neighbour half of W1 once per tile, so
    # each neighbour costs a single one-hot matmul:
    #   z1_j = nbr_j @ W1_diff + ctr @ (W1_ctr - W1_diff) + b1
    pw = jnp.dot(pts, w1n,
                 preferred_element_type=jnp.float32).astype(jnp.bfloat16)   # [N, H1]
    base = jnp.dot(ctr, w1c_ref[...],
                   preferred_element_type=jnp.float32) + b1_ref[...]        # [TN, H1]

    col = jax.lax.broadcasted_iota(jnp.int32, (tn, n), 1)

    if stage == 3:
        acc = jnp.full((tn, h2w), -jnp.inf, dtype=jnp.float32)
    else:
        w = h1w if stage == 1 else h2w
        acc_s = jnp.zeros((1, w), jnp.float32)
        acc_q = jnp.zeros((1, w), jnp.float32)

    for j in range(nnear):      # k is small (4..20): static unroll
        onehot = (col == ids[:, j:j + 1]).astype(jnp.bfloat16)              # [TN, N]
        z1 = jnp.dot(onehot, pw, preferred_element_type=jnp.float32) + base
        if stage == 1:
            acc_s = acc_s + jnp.sum(z1, axis=0, keepdims=True)
            acc_q = acc_q + jnp.sum(z1 * z1, axis=0, keepdims=True)
            continue
        h1 = _lrelu(z1 * s1_ref[...] + t1_ref[...])
        z2 = jnp.dot(h1.astype(jnp.bfloat16), w2,
                     preferred_element_type=jnp.float32) + b2_ref[...]
        if stage == 2:
            acc_s = acc_s + jnp.sum(z2, axis=0, keepdims=True)
            acc_q = acc_q + jnp.sum(z2 * z2, axis=0, keepdims=True)
        else:
            acc = jnp.maximum(acc, _lrelu(z2 * s2_ref[...] + t2_ref[...]))

    if stage == 3:
        o_ref[...] = acc[None]
    else:
        o_ref[...] = jnp.concatenate([acc_s, acc_q], axis=0)[None, None]


def _point_kernel(x1_ref, x2_ref, wa_ref, wb_ref, b1_ref, s1_ref, t1_ref,
                  w2_ref, b2_ref, s2_ref, t2_ref, o_ref, *, stage):
    """conv3 (1x1 conv1d MLP) on cat(x1, x2); concat is folded into two matmuls."""
    x1 = x1_ref[0].astype(jnp.bfloat16)
    x2 = x2_ref[0].astype(jnp.bfloat16)
    z1 = (jnp.dot(x1, wa_ref[...], preferred_element_type=jnp.float32)
          + jnp.dot(x2, wb_ref[...], preferred_element_type=jnp.float32)
          + b1_ref[...])
    if stage == 1:
        o_ref[...] = jnp.concatenate(
            [jnp.sum(z1, axis=0, keepdims=True),
             jnp.sum(z1 * z1, axis=0, keepdims=True)], axis=0)[None, None]
        return
    h1 = _lrelu(z1 * s1_ref[...] + t1_ref[...])
    z2 = jnp.dot(h1.astype(jnp.bfloat16), w2_ref[...],
                 preferred_element_type=jnp.float32) + b2_ref[...]
    if stage == 2:
        o_ref[...] = jnp.concatenate(
            [jnp.sum(z2, axis=0, keepdims=True),
             jnp.sum(z2 * z2, axis=0, keepdims=True)], axis=0)[None, None]
        return
    o_ref[...] = _lrelu(z2 * s2_ref[...] + t2_ref[...])[None]


# --------------------------------------------------------------- wrappers ---

def _fold_bn(partials, gamma, beta, count):
    """Fold per-tile (sum, sumsq) partials into per-channel BN scale/shift."""
    s = jnp.sum(partials, axis=(0, 1))                   # [2, H]
    mean = s[0] / count
    var = jnp.maximum(s[1] / count - mean * mean, 0.0)
    scale = gamma * jax.lax.rsqrt(var + _EPS)            # [1, H]
    shift = beta - mean * scale                          # [1, H]
    return scale, shift


def _knn(xt, k, tn):
    """xt: [B, N, C] (C padded, zeros beyond real) -> neighbour indices [B, N, k]."""
    B, N, C = xt.shape
    kk = jnp.sum(xt * xt, axis=-1)[:, None, :]           # [B, 1, N] squared key norms
    return pl.pallas_call(
        functools.partial(_knn_kernel, k=k),
        grid=(B, N // tn),
        in_specs=[pl.BlockSpec((1, tn, C), lambda b, i: (b, i, 0)),
                  pl.BlockSpec((1, N, C), lambda b, i: (b, 0, 0)),
                  pl.BlockSpec((1, 1, N), lambda b, i: (b, 0, 0))],
        out_specs=pl.BlockSpec((1, tn, k), lambda b, i: (b, i, 0)),
        out_shape=jax.ShapeDtypeStruct((B, N, k), jnp.int32),
        compiler_params=_cparams(),
    )(xt, xt, kk)


def _edge_conv(pts, idx, lp, nnear, tn):
    """One DGCNN edge conv: get_graph_feature -> 2-layer conv2d MLP -> max over k."""
    B, N, C = pts.shape
    H1 = lp['w1n'].shape[1]
    H2 = lp['w2'].shape[1]
    nt = N // tn
    grid = (B, nt)

    in_specs = [
        pl.BlockSpec((1, tn, nnear), lambda b, i: (b, i, 0)),   # idx
        pl.BlockSpec((1, N, C), lambda b, i: (b, 0, 0)),        # all points of batch b
        pl.BlockSpec((1, tn, C), lambda b, i: (b, i, 0)),       # centre points of tile
        pl.BlockSpec((C, H1), lambda b, i: (0, 0)),             # W1 (neighbour half)
        pl.BlockSpec((C, H1), lambda b, i: (0, 0)),             # W1 (centre - neighbour)
        pl.BlockSpec((1, H1), lambda b, i: (0, 0)),             # b1
        pl.BlockSpec((1, H1), lambda b, i: (0, 0)),             # bn1 scale
        pl.BlockSpec((1, H1), lambda b, i: (0, 0)),             # bn1 shift
        pl.BlockSpec((H1, H2), lambda b, i: (0, 0)),            # W2
        pl.BlockSpec((1, H2), lambda b, i: (0, 0)),             # b2
        pl.BlockSpec((1, H2), lambda b, i: (0, 0)),             # bn2 scale
        pl.BlockSpec((1, H2), lambda b, i: (0, 0)),             # bn2 shift
    ]

    def call(stage, s1, t1, s2, t2, out_shape, out_spec):
        return pl.pallas_call(
            functools.partial(_edge_kernel, stage=stage, nnear=nnear),
            grid=grid, in_specs=in_specs, out_specs=out_spec, out_shape=out_shape,
            compiler_params=_cparams(),
        )(idx, pts, pts, lp['w1n'], lp['w1c'], lp['b1'], s1, t1,
          lp['w2'], lp['b2'], s2, t2)

    zh1 = jnp.zeros((1, H1), jnp.float32)
    zh2 = jnp.zeros((1, H2), jnp.float32)
    cnt = float(B * N * nnear)            # BatchNorm2d averages over B*N*k

    st1 = call(1, zh1, zh1, zh2, zh2,
               jax.ShapeDtypeStruct((B, nt, 2, H1), jnp.float32),
               pl.BlockSpec((1, 1, 2, H1), lambda b, i: (b, i, 0, 0)))
    s1, t1 = _fold_bn(st1, lp['g1'], lp['be1'], cnt)

    st2 = call(2, s1, t1, zh2, zh2,
               jax.ShapeDtypeStruct((B, nt, 2, H2), jnp.float32),
               pl.BlockSpec((1, 1, 2, H2), lambda b, i: (b, i, 0, 0)))
    s2, t2 = _fold_bn(st2, lp['g2'], lp['be2'], cnt)

    return call(3, s1, t1, s2, t2,
                jax.ShapeDtypeStruct((B, N, H2), jnp.float32),
                pl.BlockSpec((1, tn, H2), lambda b, i: (b, i, 0)))


def _point_conv(x1, x2, lp, tn):
    B, N, C = x1.shape
    H1 = lp['wa'].shape[1]
    H2 = lp['w2'].shape[1]
    nt = N // tn
    grid = (B, nt)

    in_specs = [
        pl.BlockSpec((1, tn, C), lambda b, i: (b, i, 0)),       # x1 tile
        pl.BlockSpec((1, tn, C), lambda b, i: (b, i, 0)),       # x2 tile
        pl.BlockSpec((C, H1), lambda b, i: (0, 0)),             # W (x1 rows)
        pl.BlockSpec((C, H1), lambda b, i: (0, 0)),             # W (x2 rows)
        pl.BlockSpec((1, H1), lambda b, i: (0, 0)),
        pl.BlockSpec((1, H1), lambda b, i: (0, 0)),
        pl.BlockSpec((1, H1), lambda b, i: (0, 0)),
        pl.BlockSpec((H1, H2), lambda b, i: (0, 0)),
        pl.BlockSpec((1, H2), lambda b, i: (0, 0)),
        pl.BlockSpec((1, H2), lambda b, i: (0, 0)),
        pl.BlockSpec((1, H2), lambda b, i: (0, 0)),
    ]

    def call(stage, s1, t1, s2, t2, out_shape, out_spec):
        return pl.pallas_call(
            functools.partial(_point_kernel, stage=stage),
            grid=grid, in_specs=in_specs, out_specs=out_spec, out_shape=out_shape,
            compiler_params=_cparams(),
        )(x1, x2, lp['wa'], lp['wb'], lp['b1'], s1, t1,
          lp['w2'], lp['b2'], s2, t2)

    zh1 = jnp.zeros((1, H1), jnp.float32)
    zh2 = jnp.zeros((1, H2), jnp.float32)
    cnt = float(B * N)                    # BatchNorm1d averages over B*N

    st1 = call(1, zh1, zh1, zh2, zh2,
               jax.ShapeDtypeStruct((B, nt, 2, H1), jnp.float32),
               pl.BlockSpec((1, 1, 2, H1), lambda b, i: (b, i, 0, 0)))
    s1, t1 = _fold_bn(st1, lp['g1'], lp['be1'], cnt)

    st2 = call(2, s1, t1, zh2, zh2,
               jax.ShapeDtypeStruct((B, nt, 2, H2), jnp.float32),
               pl.BlockSpec((1, 1, 2, H2), lambda b, i: (b, i, 0, 0)))
    s2, t2 = _fold_bn(st2, lp['g2'], lp['be2'], cnt)

    return call(3, s1, t1, s2, t2,
                jax.ShapeDtypeStruct((B, N, H2), jnp.float32),
                pl.BlockSpec((1, tn, H2), lambda b, i: (b, i, 0)))


# ------------------------------------------------------------ model setup ---

def _pad2(w, rt, ct):
    return jnp.pad(w, ((0, rt - w.shape[0]), (0, ct - w.shape[1])))


def _padvec(v, ct):
    return jnp.pad(jnp.reshape(v, (1, -1)), ((0, 0), (0, ct - v.shape[-1])))


def init_gcn_encoder(key, emb_in, emb_out):
    """Synthetic params (shapes per GCNEncoder.__init__), channel-padded to x128
    and split so the in-kernel weight layout needs no concatenation."""
    emb_inc = (emb_out / (4.0 * emb_in)) ** 0.25
    l1 = [emb_in * 2, int(emb_in * 2 * emb_inc), int(emb_in * 2 * emb_inc ** 2)]
    l2 = [l1[2] * 2, int(l1[2] * 2 * emb_inc), emb_out]
    l3_0 = emb_out + l1[2]
    l3 = [l3_0, int((emb_out / l3_0) ** 0.5 * l3_0), emb_out]

    def dense(k, cin, cout):
        kw, kb = jax.random.split(k)
        bound = 1.0 / math.sqrt(cin)
        w = jax.random.uniform(kw, (cin, cout), jnp.float32, -bound, bound)
        b = jax.random.uniform(kb, (cout,), jnp.float32, -bound, bound)
        return w, b

    def bn(h):
        return jnp.ones((1, h), jnp.float32), jnp.zeros((1, h), jnp.float32)

    def edge_layers(k1, k2, cin_half, h1, h2):
        cinp, h1p, h2p = _ceil128(cin_half), _ceil128(h1), _ceil128(h2)
        w1, b1 = dense(k1, 2 * cin_half, h1)
        w2, b2 = dense(k2, h1, h2)
        wd, wc = w1[:cin_half], w1[cin_half:]
        g1, be1 = bn(h1p)
        g2, be2 = bn(h2p)
        return dict(
            w1n=_pad2(wd, cinp, h1p).astype(jnp.bfloat16),
            w1c=_pad2(wc - wd, cinp, h1p).astype(jnp.bfloat16),
            b1=_padvec(b1, h1p), g1=g1, be1=be1,
            w2=_pad2(w2, h1p, h2p).astype(jnp.bfloat16),
            b2=_padvec(b2, h2p), g2=g2, be2=be2)

    def point_layers(k1, k2, c_a, c_b, h1, h2):
        cap, cbp, h1p, h2p = _ceil128(c_a), _ceil128(c_b), _ceil128(h1), _ceil128(h2)
        w1, b1 = dense(k1, c_a + c_b, h1)
        w2, b2 = dense(k2, h1, h2)
        g1, be1 = bn(h1p)
        g2, be2 = bn(h2p)
        return dict(
            wa=_pad2(w1[:c_a], cap, h1p).astype(jnp.bfloat16),
            wb=_pad2(w1[c_a:], cbp, h1p).astype(jnp.bfloat16),
            b1=_padvec(b1, h1p), g1=g1, be1=be1,
            w2=_pad2(w2, h1p, h2p).astype(jnp.bfloat16),
            b2=_padvec(b2, h2p), g2=g2, be2=be2)

    ks = jax.random.split(key, 6)
    return {
        'conv1': edge_layers(ks[0], ks[1], emb_in, l1[1], l1[2]),
        'conv2': edge_layers(ks[2], ks[3], l1[2], l2[1], l2[2]),
        'conv3': point_layers(ks[4], ks[5], l1[2], emb_out, l3[1], l3[2]),
    }


def gcn_encoder_forward(x, params, *, n_near, emb_out):
    """x: [B, emb_in, N] (NCW, like the torch module) -> [B, emb_out, N]."""
    B, c_in, N = x.shape
    assert N % 8 == 0, "number of points must be a multiple of 8"
    tn = _row_tile(N)

    # single NCW -> channels-last transpose + zero channel padding (lane-dense)
    xt = jnp.transpose(x, (0, 2, 1)).astype(jnp.float32)
    xt = jnp.pad(xt, ((0, 0), (0, 0), (0, _ceil128(c_in) - c_in)))

    idx1 = _knn(xt, n_near, tn)
    x1 = _edge_conv(xt, idx1, params['conv1'], n_near, tn)      # [B, N, 128*] (l1_2 real)

    idx2 = _knn(x1, n_near, tn)                                  # padded channels are 0
    x2 = _edge_conv(x1, idx2, params['conv2'], n_near, tn)      # [B, N, 128*] (emb_out real)

    out = _point_conv(x1, x2, params['conv3'], tn)              # [B, N, 128*]
    return jnp.transpose(out[:, :, :emb_out], (0, 2, 1))        # back to NCW once


# ------------------------------------------------------------------- main ---

if __name__ == "__main__":
    B, N = 2, 16
    emb_in, emb_out, n_near = 2, 32, 4

    key = jax.random.PRNGKey(0)
    kx, kp = jax.random.split(key)
    x = jax.random.normal(kx, (B, emb_in, N), jnp.float32)
    params = init_gcn_encoder(kp, emb_in, emb_out)

    fwd = jax.jit(functools.partial(gcn_encoder_forward,
                                    n_near=n_near, emb_out=emb_out))
    out = jax.block_until_ready(fwd(x, params))

    assert out.shape == (B, emb_out, N), out.shape
    assert bool(jnp.all(jnp.isfinite(out)))
    print("KERNEL_OK")
</pallas_src>

<mosaic_0001>
module attributes {stable_mosaic.version = 11 : i64} {
  func.func @_knn_kernel(%arg0: i32, %arg1: i32, %arg2: memref<1x16x128xf32, #tpu.memory_space<vmem>>, %arg3: memref<1x16x128xf32, #tpu.memory_space<vmem>>, %arg4: memref<1x1x16xf32, #tpu.memory_space<vmem>>, %arg5: memref<1x16x4xi32, #tpu.memory_space<vmem>>) attributes {dimension_semantics = [#tpu.dimension_semantics<parallel>, #tpu.dimension_semantics<parallel>], iteration_bounds = array<i64: 2, 1>, scalar_prefetch = 0 : i64, scratch_operands = 0 : i64, tpu.core_type = #tpu.core_type<tc>, window_params = [{transform_indices = @transform_0, window_bounds = array<i64: 1, 16, 128>}, {transform_indices = @transform_1, window_bounds = array<i64: 1, 16, 128>}, {transform_indices = @transform_2, window_bounds = array<i64: 1, 1, 16>}, {transform_indices = @transform_3, window_bounds = array<i64: 1, 16, 4>}]} {
    %c0 = arith.constant 0 : index
    %c0_0 = arith.constant 0 : index
    %c0_1 = arith.constant 0 : index
    %0 = vector.load %arg2[%c0, %c0_0, %c0_1] : memref<1x16x128xf32, #tpu.memory_space<vmem>>, vector<1x16x128xf32>
    %1 = vector.shape_cast %0 : vector<1x16x128xf32> to vector<16x128xf32>
    %c0_2 = arith.constant 0 : index
    %c0_3 = arith.constant 0 : index
    %c0_4 = arith.constant 0 : index
    %2 = vector.load %arg3[%c0_2, %c0_3, %c0_4] : memref<1x16x128xf32, #tpu.memory_space<vmem>>, vector<1x16x128xf32>
    %3 = vector.shape_cast %2 : vector<1x16x128xf32> to vector<16x128xf32>
    "tpu.trace_start"() <{level = 10 : i32, message = "nc,mc->nm"}> : () -> ()
    %cst = arith.constant dense<0.000000e+00> : vector<16x16xf32>
    %4 = tpu.matmul %1, %3, %cst {dimension_numbers = #tpu.dot_dimension_numbers<[1], [1], [0], [0], [0, 0, 1, 0], [], []>} : vector<16x128xf32>, vector<16x128xf32>, vector<16x16xf32> -> vector<16x16xf32>
    "tpu.trace_stop"() : () -> ()
    %cst_5 = arith.constant 2.000000e+00 : f32
    %5 = vector.broadcast %cst_5 : f32 to vector<16x16xf32>
    %6 = arith.mulf %5, %4 : vector<16x16xf32>
    %c0_6 = arith.constant 0 : index
    %c0_7 = arith.constant 0 : index
    %c0_8 = arith.constant 0 : index
    %7 = vector.load %arg4[%c0_6, %c0_7, %c0_8] : memref<1x1x16xf32, #tpu.memory_space<vmem>>, vector<1x1x16xf32>
    %8 = vector.shape_cast %7 : vector<1x1x16xf32> to vector<1x16xf32>
    %9 = vector.broadcast %8 : vector<1x16xf32> to vector<16x16xf32>
    %10 = arith.subf %6, %9 : vector<16x16xf32>
    %11 = tpu.iota {dimensions = array<i32: 1>} : vector<16x16xi32>
    %12 = arith.sitofp %11 : vector<16x16xi32> to vector<16x16xf32>
    %13 = tpu.iota {dimensions = array<i32: 1>} : vector<16x4xi32>
    %c0_i32 = arith.constant 0 : i32
    %14 = vector.broadcast %c0_i32 : i32 to vector<16x4xi32>
    %cst_9 = arith.constant dense<0xFF800000> : vector<16xf32>
    %15 = vector.multi_reduction <maximumf>, %10, %cst_9 [1] : vector<16x16xf32> to vector<16xf32>
    %16 = vector.shape_cast %15 : vector<16xf32> to vector<16x1xf32>
    %17 = vector.broadcast %16 : vector<16x1xf32> to vector<16x16xf32>
    %18 = arith.cmpf oeq, %10, %17 : vector<16x16xf32>
    %cst_10 = arith.constant 1.600000e+01 : f32
    %19 = vector.broadcast %cst_10 : f32 to vector<16x16xf32>
    %20 = arith.select %18, %12, %19 : vector<16x16xi1>, vector<16x16xf32>
    %cst_11 = arith.constant dense<0x7F800000> : vector<16xf32>
    %21 = vector.multi_reduction <minimumf>, %20, %cst_11 [1] : vector<16x16xf32> to vector<16xf32>
    %22 = vector.shape_cast %21 : vector<16xf32> to vector<16x1xf32>
    %23 = arith.fptosi %22 : vector<16x1xf32> to vector<16x1xi32>
    %c0_i32_12 = arith.constant 0 : i32
    %24 = vector.broadcast %c0_i32_12 : i32 to vector<16x4xi32>
    %25 = arith.cmpi eq, %13, %24 : vector<16x4xi32>
    %26 = vector.shape_cast %23 : vector<16x1xi32> to vector<16x1xi32>
    %27 = vector.broadcast %26 : vector<16x1xi32> to vector<16x4xi32>
    %28 = arith.select %25, %27, %14 : vector<16x4xi1>, vector<16x4xi32>
    %29 = vector.broadcast %23 : vector<16x1xi32> to vector<16x16xi32>
    %30 = arith.cmpi eq, %11, %29 : vector<16x16xi32>
    %cst_13 = arith.constant 0xFF800000 : f32
    %31 = vector.broadcast %cst_13 : f32 to vector<16x16xf32>
    %32 = arith.select %30, %31, %10 : vector<16x16xi1>, vector<16x16xf32>
    %cst_14 = arith.constant dense<0xFF800000> : vector<16xf32>
    %33 = vector.multi_reduction <maximumf>, %32, %cst_14 [1] : vector<16x16xf32> to vector<16xf32>
    %34 = vector.shape_cast %33 : vector<16xf32> to vector<16x1xf32>
    %35 = vector.broadcast %34 : vector<16x1xf32> to vector<16x16xf32>
    %36 = arith.cmpf oeq, %32, %35 : vector<16x16xf32>
    %cst_15 = arith.constant 1.600000e+01 : f32
    %37 = vector.broadcast %cst_15 : f32 to vector<16x16xf32>
    %38 = arith.select %36, %12, %37 : vector<16x16xi1>, vector<16x16xf32>
    %cst_16 = arith.constant dense<0x7F800000> : vector<16xf32>
    %39 = vector.multi_reduction <minimumf>, %38, %cst_16 [1] : vector<16x16xf32> to vector<16xf32>
    %40 = vector.shape_cast %39 : vector<16xf32> to vector<16x1xf32>
    %41 = arith.fptosi %40 : vector<16x1xf32> to vector<16x1xi32>
    %c1_i32 = arith.constant 1 : i32
    %42 = vector.broadcast %c1_i32 : i32 to vector<16x4xi32>
    %43 = arith.cmpi eq, %13, %42 : vector<16x4xi32>
    %44 = vector.shape_cast %41 : vector<16x1xi32> to vector<16x1xi32>
    %45 = vector.broadcast %44 : vector<16x1xi32> to vector<16x4xi32>
    %46 = arith.select %43, %45, %28 : vector<16x4xi1>, vector<16x4xi32>
    %47 = vector.broadcast %41 : vector<16x1xi32> to vector<16x16xi32>
    %48 = arith.cmpi eq, %11, %47 : vector<16x16xi32>
    %cst_17 = arith.constant 0xFF800000 : f32
    %49 = vector.broadcast %cst_17 : f32 to vector<16x16xf32>
    %50 = arith.select %48, %49, %32 : vector<16x16xi1>, vector<16x16xf32>
    %cst_18 = arith.constant dense<0xFF800000> : vector<16xf32>
    %51 = vector.multi_reduction <maximumf>, %50, %cst_18 [1] : vector<16x16xf32> to vector<16xf32>
    %52 = vector.shape_cast %51 : vector<16xf32> to vector<16x1xf32>
    %53 = vector.broadcast %52 : vector<16x1xf32> to vector<16x16xf32>
    %54 = arith.cmpf oeq, %50, %53 : vector<16x16xf32>
    %cst_19 = arith.constant 1.600000e+01 : f32
    %55 = vector.broadcast %cst_19 : f32 to vector<16x16xf32>
    %56 = arith.select %54, %12, %55 : vector<16x16xi1>, vector<16x16xf32>
    %cst_20 = arith.constant dense<0x7F800000> : vector<16xf32>
    %57 = vector.multi_reduction <minimumf>, %56, %cst_20 [1] : vector<16x16xf32> to vector<16xf32>
    %58 = vector.shape_cast %57 : vector<16xf32> to vector<16x1xf32>
    %59 = arith.fptosi %58 : vector<16x1xf32> to vector<16x1xi32>
    %c2_i32 = arith.constant 2 : i32
    %60 = vector.broadcast %c2_i32 : i32 to vector<16x4xi32>
    %61 = arith.cmpi eq, %13, %60 : vector<16x4xi32>
    %62 = vector.shape_cast %59 : vector<16x1xi32> to vector<16x1xi32>
    %63 = vector.broadcast %62 : vector<16x1xi32> to vector<16x4xi32>
    %64 = arith.select %61, %63, %46 : vector<16x4xi1>, vector<16x4xi32>
    %65 = vector.broadcast %59 : vector<16x1xi32> to vector<16x16xi32>
    %66 = arith.cmpi eq, %11, %65 : vector<16x16xi32>
    %cst_21 = arith.constant 0xFF800000 : f32
    %67 = vector.broadcast %cst_21 : f32 to vector<16x16xf32>
    %68 = arith.select %66, %67, %50 : vector<16x16xi1>, vector<16x16xf32>
    %cst_22 = arith.constant dense<0xFF800000> : vector<16xf32>
    %69 = vector.multi_reduction <maximumf>, %68, %cst_22 [1] : vector<16x16xf32> to vector<16xf32>
    %70 = vector.shape_cast %69 : vector<16xf32> to vector<16x1xf32>
    %71 = vector.broadcast %70 : vector<16x1xf32> to vector<16x16xf32>
    %72 = arith.cmpf oeq, %68, %71 : vector<16x16xf32>
    %cst_23 = arith.constant 1.600000e+01 : f32
    %73 = vector.broadcast %cst_23 : f32 to vector<16x16xf32>
    %74 = arith.select %72, %12, %73 : vector<16x16xi1>, vector<16x16xf32>
    %cst_24 = arith.constant dense<0x7F800000> : vector<16xf32>
    %75 = vector.multi_reduction <minimumf>, %74, %cst_24 [1] : vector<16x16xf32> to vector<16xf32>
    %76 = vector.shape_cast %75 : vector<16xf32> to vector<16x1xf32>
    %77 = arith.fptosi %76 : vector<16x1xf32> to vector<16x1xi32>
    %c3_i32 = arith.constant 3 : i32
    %78 = vector.broadcast %c3_i32 : i32 to vector<16x4xi32>
    %79 = arith.cmpi eq, %13, %78 : vector<16x4xi32>
    %80 = vector.shape_cast %77 : vector<16x1xi32> to vector<16x1xi32>
    %81 = vector.broadcast %80 : vector<16x1xi32> to vector<16x4xi32>
    %82 = arith.select %79, %81, %64 : vector<16x4xi1>, vector<16x4xi32>
    %83 = vector.shape_cast %82 : vector<16x4xi32> to vector<1x16x4xi32>
    %c0_25 = arith.constant 0 : index
    %c0_26 = arith.constant 0 : index
    %c0_27 = arith.constant 0 : index
    %84 = vector.load %arg5[%c0_25, %c0_26, %c0_27] : memref<1x16x4xi32, #tpu.memory_space<vmem>>, vector<1x16x4xi32>
    tpu.vector_store %arg5[%c0_25, %c0_26, %c0_27], %83 {strides = array<i32>} : memref<1x16x4xi32, #tpu.memory_space<vmem>>, vector<1x16x4xi32>,
    return
  }
  func.func @transform_0(%arg0: i32, %arg1: i32) -> (i32, i32, i32) {
    %c0_i32 = arith.constant 0 : i32
    %c0_i32_0 = arith.constant 0 : i32
    return %arg0, %arg1, %c0_i32 : i32, i32, i32
  }
  func.func @transform_1(%arg0: i32, %arg1: i32) -> (i32, i32, i32) {
    %c0_i32 = arith.constant 0 : i32
    %c0_i32_0 = arith.constant 0 : i32
    %c0_i32_1 = arith.constant 0 : i32
    return %arg0, %c0_i32, %c0_i32_0 : i32, i32, i32
  }
  func.func @transform_2(%arg0: i32, %arg1: i32) -> (i32, i32, i32) {
    %c0_i32 = arith.constant 0 : i32
    %c0_i32_0 = arith.constant 0 : i32
    %c0_i32_1 = arith.constant 0 : i32
    return %arg0, %c0_i32, %c0_i32_0 : i32, i32, i32
  }
  func.func @transform_3(%arg0: i32, %arg1: i32) -> (i32, i32, i32) {
    %c0_i32 = arith.constant 0 : i32
    %c0_i32_0 = arith.constant 0 : i32
    return %arg0, %arg1, %c0_i32 : i32, i32, i32
  }
}

module attributes {stable_mosaic.version = 11 : i64} {
  func.func @_edge_kernel(%arg0: i32, %arg1: i32, %arg2: memref<1x16x4xi32, #tpu.memory_space<vmem>>, %arg3: memref<1x16x128xf32, #tpu.memory_space<vmem>>, %arg4: memref<1x16x128xf32, #tpu.memory_space<vmem>>, %arg5: memref<128x128xbf16, #tpu.memory_space<vmem>>, %arg6: memref<128x128xbf16, #tpu.memory_space<vmem>>, %arg7: memref<1x128xf32, #tpu.memory_space<vmem>>, %arg8: memref<1x128xf32, #tpu.memory_space<vmem>>, %arg9: memref<1x128xf32, #tpu.memory_space<vmem>>, %arg10: memref<128x128xbf16, #tpu.memory_space<vmem>>, %arg11: memref<1x128xf32, #tpu.memory_space<vmem>>, %arg12: memref<1x128xf32, #tpu.memory_space<vmem>>, %arg13: memref<1x128xf32, #tpu.memory_space<vmem>>, %arg14: memref<1x1x2x128xf32, #tpu.memory_space<vmem>>) attributes {dimension_semantics = [#tpu.dimension_semantics<parallel>, #tpu.dimension_semantics<parallel>], iteration_bounds = array<i64: 2, 1>, scalar_prefetch = 0 : i64, scratch_operands = 0 : i64, tpu.core_type = #tpu.core_type<tc>, window_params = [{transform_indices = @transform_0, window_bounds = array<i64: 1, 16, 4>}, {transform_indices = @transform_1, window_bounds = array<i64: 1, 16, 128>}, {transform_indices = @transform_2, window_bounds = array<i64: 1, 16, 128>}, {pipeline_mode = #tpu.pipeline_mode<synchronous>, transform_indices = @transform_3, window_bounds = array<i64: 128, 128>}, {pipeline_mode = #tpu.pipeline_mode<synchronous>, transform_indices = @transform_4, window_bounds = array<i64: 128, 128>}, {pipeline_mode = #tpu.pipeline_mode<synchronous>, transform_indices = @transform_5, window_bounds = array<i64: 1, 128>}, {pipeline_mode = #tpu.pipeline_mode<synchronous>, transform_indices = @transform_6, window_bounds = array<i64: 1, 128>}, {pipeline_mode = #tpu.pipeline_mode<synchronous>, transform_indices = @transform_7, window_bounds = array<i64: 1, 128>}, {pipeline_mode = #tpu.pipeline_mode<synchronous>, transform_indices = @transform_8, window_bounds = array<i64: 128, 128>}, {pipeline_mode = #tpu.pipeline_mode<synchronous>, transform_indices = @transform_9, window_bounds = array<i64: 1, 128>}, {pipeline_mode = #tpu.pipeline_mode<synchronous>, transform_indices = @transform_10, window_bounds = array<i64: 1, 128>}, {pipeline_mode = #tpu.pipeline_mode<synchronous>, transform_indices = @transform_11, window_bounds = array<i64: 1, 128>}, {transform_indices = @transform_12, window_bounds = array<i64: 1, 1, 2, 128>}]} {
    %c0 = arith.constant 0 : index
    %c0_0 = arith.constant 0 : index
    %c0_1 = arith.constant 0 : index
    %0 = vector.load %arg2[%c0, %c0_0, %c0_1] : memref<1x16x4xi32, #tpu.memory_space<vmem>>, vector<1x16x4xi32>
    %1 = vector.shape_cast %0 : vector<1x16x4xi32> to vector<16x4xi32>
    %c0_2 = arith.constant 0 : index
    %c0_3 = arith.constant 0 : index
    %c0_4 = arith.constant 0 : index
    %2 = vector.load %arg3[%c0_2, %c0_3, %c0_4] : memref<1x16x128xf32, #tpu.memory_space<vmem>>, vector<1x16x128xf32>
    %3 = vector.shape_cast %2 : vector<1x16x128xf32> to vector<16x128xf32>
    %4 = arith.truncf %3 : vector<16x128xf32> to vector<16x128xbf16>
    %c0_5 = arith.constant 0 : index
    %c0_6 = arith.constant 0 : index
    %c0_7 = arith.constant 0 : index
    %5 = vector.load %arg4[%c0_5, %c0_6, %c0_7] : memref<1x16x128xf32, #tpu.memory_space<vmem>>, vector<1x16x128xf32>
    %6 = vector.shape_cast %5 : vector<1x16x128xf32> to vector<16x128xf32>
    %7 = arith.truncf %6 : vector<16x128xf32> to vector<16x128xbf16>
    %c0_8 = arith.constant 0 : index
    %c0_9 = arith.constant 0 : index
    %8 = vector.load %arg5[%c0_8, %c0_9] : memref<128x128xbf16, #tpu.memory_space<vmem>>, vector<128x128xbf16>
    %cst = arith.constant dense<0.000000e+00> : vector<16x128xf32>
    %9 = tpu.matmul %4, %8, %cst {dimension_numbers = #tpu.dot_dimension_numbers<[1], [0], [0], [1], [0, 0, 1, 1], [], []>} : vector<16x128xbf16>, vector<128x128xbf16>, vector<16x128xf32> -> vector<16x128xf32>
    %10 = arith.truncf %9 : vector<16x128xf32> to vector<16x128xbf16>
    %c0_10 = arith.constant 0 : index
    %c0_11 = arith.constant 0 : index
    %11 = vector.load %arg6[%c0_10, %c0_11] : memref<128x128xbf16, #tpu.memory_space<vmem>>, vector<128x128xbf16>
    %cst_12 = arith.constant dense<0.000000e+00> : vector<16x128xf32>
    %12 = tpu.matmul %7, %11, %cst_12 {dimension_numbers = #tpu.dot_dimension_numbers<[1], [0], [0], [1], [0, 0, 1, 1], [], []>} : vector<16x128xbf16>, vector<128x128xbf16>, vector<16x128xf32> -> vector<16x128xf32>
    %c0_13 = arith.constant 0 : index
    %c0_14 = arith.constant 0 : index
    %13 = vector.load %arg7[%c0_13, %c0_14] : memref<1x128xf32, #tpu.memory_space<vmem>>, vector<1x128xf32>
    %14 = vector.broadcast %13 : vector<1x128xf32> to vector<16x128xf32>
    %15 = arith.addf %12, %14 : vector<16x128xf32>
    %16 = tpu.iota {dimensions = array<i32: 1>} : vector<16x16xi32>
    %cst_15 = arith.constant 0.000000e+00 : f32
    %17 = vector.broadcast %cst_15 : f32 to vector<1x128xf32>
    %cst_16 = arith.constant 0.000000e+00 : f32
    %18 = vector.broadcast %cst_16 : f32 to vector<1x128xf32>
    %19 = vector.extract_strided_slice %1 {offsets = [0, 0], sizes = [16, 1], strides = [1, 1]} : vector<16x4xi32> to vector<16x1xi32>
    %20 = vector.broadcast %19 : vector<16x1xi32> to vector<16x16xi32>
    %21 = arith.cmpi eq, %16, %20 : vector<16x16xi32>
    %22 = arith.extui %21 : vector<16x16xi1> to vector<16x16xi32>
    %23 = arith.sitofp %22 : vector<16x16xi32> to vector<16x16xf32>
    %24 = arith.truncf %23 : vector<16x16xf32> to vector<16x16xbf16>
    %cst_17 = arith.constant dense<0.000000e+00> : vector<16x128xf32>
    %25 = tpu.matmul %24, %10, %cst_17 {dimension_numbers = #tpu.dot_dimension_numbers<[1], [0], [0], [1], [0, 0, 1, 1], [], []>} : vector<16x16xbf16>, vector<16x128xbf16>, vector<16x128xf32> -> vector<16x128xf32>
    %26 = arith.addf %25, %15 : vector<16x128xf32>
    %cst_18 = arith.constant dense<0.000000e+00> : vector<128xf32>
    %27 = vector.multi_reduction <add>, %26, %cst_18 [0] : vector<16x128xf32> to vector<128xf32>
    %28 = vector.shape_cast %27 : vector<128xf32> to vector<1x128xf32>
    %29 = arith.addf %17, %28 : vector<1x128xf32>
    %30 = arith.mulf %26, %26 : vector<16x128xf32>
    %cst_19 = arith.constant dense<0.000000e+00> : vector<128xf32>
    %31 = vector.multi_reduction <add>, %30, %cst_19 [0] : vector<16x128xf32> to vector<128xf32>
    %32 = vector.shape_cast %31 : vector<128xf32> to vector<1x128xf32>
    %33 = arith.addf %18, %32 : vector<1x128xf32>
    %34 = vector.extract_strided_slice %1 {offsets = [0, 1], sizes = [16, 1], strides = [1, 1]} : vector<16x4xi32> to vector<16x1xi32>
    %35 = vector.broadcast %34 : vector<16x1xi32> to vector<16x16xi32>
    %36 = arith.cmpi eq, %16, %35 : vector<16x16xi32>
    %37 = arith.extui %36 : vector<16x16xi1> to vector<16x16xi32>
    %38 = arith.sitofp %37 : vector<16x16xi32> to vector<16x16xf32>
    %39 = arith.truncf %38 : vector<16x16xf32> to vector<16x16xbf16>
    %cst_20 = arith.constant dense<0.000000e+00> : vector<16x128xf32>
    %40 = tpu.matmul %39, %10, %cst_20 {dimension_numbers = #tpu.dot_dimension_numbers<[1], [0], [0], [1], [0, 0, 1, 1], [], []>} : vector<16x16xbf16>, vector<16x128xbf16>, vector<16x128xf32> -> vector<16x128xf32>
    %41 = arith.addf %40, %15 : vector<16x128xf32>
    %cst_21 = arith.constant dense<0.000000e+00> : vector<128xf32>
    %42 = vector.multi_reduction <add>, %41, %cst_21 [0] : vector<16x128xf32> to vector<128xf32>
    %43 = vector.shape_cast %42 : vector<128xf32> to vector<1x128xf32>
    %44 = arith.addf %29, %43 : vector<1x128xf32>
    %45 = arith.mulf %41, %41 : vector<16x128xf32>
    %cst_22 = arith.constant dense<0.000000e+00> : vector<128xf32>
    %46 = vector.multi_reduction <add>, %45, %cst_22 [0] : vector<16x128xf32> to vector<128xf32>
    %47 = vector.shape_cast %46 : vector<128xf32> to vector<1x128xf32>
    %48 = arith.addf %33, %47 : vector<1x128xf32>
    %49 = vector.extract_strided_slice %1 {offsets = [0, 2], sizes = [16, 1], strides = [1, 1]} : vector<16x4xi32> to vector<16x1xi32>
    %50 = vector.broadcast %49 : vector<16x1xi32> to vector<16x16xi32>
    %51 = arith.cmpi eq, %16, %50 : vector<16x16xi32>
    %52 = arith.extui %51 : vector<16x16xi1> to vector<16x16xi32>
    %53 = arith.sitofp %52 : vector<16x16xi32> to vector<16x16xf32>
    %54 = arith.truncf %53 : vector<16x16xf32> to vector<16x16xbf16>
    %cst_23 = arith.constant dense<0.000000e+00> : vector<16x128xf32>
    %55 = tpu.matmul %54, %10, %cst_23 {dimension_numbers = #tpu.dot_dimension_numbers<[1], [0], [0], [1], [0, 0, 1, 1], [], []>} : vector<16x16xbf16>, vector<16x128xbf16>, vector<16x128xf32> -> vector<16x128xf32>
    %56 = arith.addf %55, %15 : vector<16x128xf32>
    %cst_24 = arith.constant dense<0.000000e+00> : vector<128xf32>
    %57 = vector.multi_reduction <add>, %56, %cst_24 [0] : vector<16x128xf32> to vector<128xf32>
    %58 = vector.shape_cast %57 : vector<128xf32> to vector<1x128xf32>
    %59 = arith.addf %44, %58 : vector<1x128xf32>
    %60 = arith.mulf %56, %56 : vector<16x128xf32>
    %cst_25 = arith.constant dense<0.000000e+00> : vector<128xf32>
    %61 = vector.multi_reduction <add>, %60, %cst_25 [0] : vector<16x128xf32> to vector<128xf32>
    %62 = vector.shape_cast %61 : vector<128xf32> to vector<1x128xf32>
    %63 = arith.addf %48, %62 : vector<1x128xf32>
    %64 = vector.extract_strided_slice %1 {offsets = [0, 3], sizes = [16, 1], strides = [1, 1]} : vector<16x4xi32> to vector<16x1xi32>
    %65 = vector.broadcast %64 : vector<16x1xi32> to vector<16x16xi32>
    %66 = arith.cmpi eq, %16, %65 : vector<16x16xi32>
    %67 = arith.extui %66 : vector<16x16xi1> to vector<16x16xi32>
    %68 = arith.sitofp %67 : vector<16x16xi32> to vector<16x16xf32>
    %69 = arith.truncf %68 : vector<16x16xf32> to vector<16x16xbf16>
    %cst_26 = arith.constant dense<0.000000e+00> : vector<16x128xf32>
    %70 = tpu.matmul %69, %10, %cst_26 {dimension_numbers = #tpu.dot_dimension_numbers<[1], [0], [0], [1], [0, 0, 1, 1], [], []>} : vector<16x16xbf16>, vector<16x128xbf16>, vector<16x128xf32> -> vector<16x128xf32>
    %71 = arith.addf %70, %15 : vector<16x128xf32>
    %cst_27 = arith.constant dense<0.000000e+00> : vector<128xf32>
    %72 = vector.multi_reduction <add>, %71, %cst_27 [0] : vector<16x128xf32> to vector<128xf32>
    %73 = vector.shape_cast %72 : vector<128xf32> to vector<1x128xf32>
    %74 = arith.addf %59, %73 : vector<1x128xf32>
    %75 = arith.mulf %71, %71 : vector<16x128xf32>
    %cst_28 = arith.constant dense<0.000000e+00> : vector<128xf32>
    %76 = vector.multi_reduction <add>, %75, %cst_28 [0] : vector<16x128xf32> to vector<128xf32>
    %77 = vector.shape_cast %76 : vector<128xf32> to vector<1x128xf32>
    %78 = arith.addf %63, %77 : vector<1x128xf32>
    %79 = tpu.concatenate %74, %78 in 0 : vector<1x128xf32>, vector<1x128xf32> -> vector<2x128xf32>
    %80 = vector.shape_cast %79 : vector<2x128xf32> to vector<1x1x2x128xf32>
    %c0_29 = arith.constant 0 : index
    %c0_30 = arith.constant 0 : index
    %c0_31 = arith.constant 0 : index
    %c0_32 = arith.constant 0 : index
    %81 = vector.load %arg14[%c0_29, %c0_30, %c0_31, %c0_32] : memref<1x1x2x128xf32, #tpu.memory_space<vmem>>, vector<1x1x2x128xf32>
    tpu.vector_store %arg14[%c0_29, %c0_30, %c0_31, %c0_32], %80 {strides = array<i32>} : memref<1x1x2x128xf32, #tpu.memory_space<vmem>>, vector<1x1x2x128xf32>,
    return
  }
  func.func @transform_0(%arg0: i32, %arg1: i32) -> (i32, i32, i32) {
    %c0_i32 = arith.constant 0 : i32
    %c0_i32_0 = arith.constant 0 : i32
    return %arg0, %arg1, %c0_i32 : i32, i32, i32
  }
  func.func @transform_1(%arg0: i32, %arg1: i32) -> (i32, i32, i32) {
    %c0_i32 = arith.constant 0 : i32
    %c0_i32_0 = arith.constant 0 : i32
    %c0_i32_1 = arith.constant 0 : i32
    return %arg0, %c0_i32, %c0_i32_0 : i32, i32, i32
  }
  func.func @transform_2(%arg0: i32, %arg1: i32) -> (i32, i32, i32) {
    %c0_i32 = arith.constant 0 : i32
    %c0_i32_0 = arith.constant 0 : i32
    return %arg0, %arg1, %c0_i32 : i32, i32, i32
  }
  func.func @transform_3(%arg0: i32, %arg1: i32) -> (i32, i32) {
    %c0_i32 = arith.constant 0 : i32
    %c0_i32_0 = arith.constant 0 : i32
    %c0_i32_1 = arith.constant 0 : i32
    return %c0_i32, %c0_i32_0 : i32, i32
  }
  func.func @transform_4(%arg0: i32, %arg1: i32) -> (i32, i32) {
    %c0_i32 = arith.constant 0 : i32
    %c0_i32_0 = arith.constant 0 : i32
    %c0_i32_1 = arith.constant 0 : i32
    return %c0_i32, %c0_i32_0 : i32, i32
  }
  func.func @transform_5(%arg0: i32, %arg1: i32) -> (i32, i32) {
    %c0_i32 = arith.constant 0 : i32
    %c0_i32_0 = arith.constant 0 : i32
    %c0_i32_1 = arith.constant 0 : i32
    return %c0_i32, %c0_i32_0 : i32, i32
  }
  func.func @transform_6(%arg0: i32, %arg1: i32) -> (i32, i32) {
    %c0_i32 = arith.constant 0 : i32
    %c0_i32_0 = arith.constant 0 : i32
    %c0_i32_1 = arith.constant 0 : i32
    return %c0_i32, %c0_i32_0 : i32, i32
  }
  func.func @transform_7(%arg0: i32, %arg1: i32) -> (i32, i32) {
    %c0_i32 = arith.constant 0 : i32
    %c0_i32_0 = arith.constant 0 : i32
    %c0_i32_1 = arith.constant 0 : i32
    return %c0_i32, %c0_i32_0 : i32, i32
  }
  func.func @transform_8(%arg0: i32, %arg1: i32) -> (i32, i32) {
    %c0_i32 = arith.constant 0 : i32
    %c0_i32_0 = arith.constant 0 : i32
    %c0_i32_1 = arith.constant 0 : i32
    return %c0_i32, %c0_i32_0 : i32, i32
  }
  func.func @transform_9(%arg0: i32, %arg1: i32) -> (i32, i32) {
    %c0_i32 = arith.constant 0 : i32
    %c0_i32_0 = arith.constant 0 : i32
    %c0_i32_1 = arith.constant 0 : i32
    return %c0_i32, %c0_i32_0 : i32, i32
  }
  func.func @transform_10(%arg0: i32, %arg1: i32) -> (i32, i32) {
    %c0_i32 = arith.constant 0 : i32
    %c0_i32_0 = arith.constant 0 : i32
    %c0_i32_1 = arith.constant 0 : i32
    return %c0_i32, %c0_i32_0 : i32, i32
  }
  func.func @transform_11(%arg0: i32, %arg1: i32) -> (i32, i32) {
    %c0_i32 = arith.constant 0 : i32
    %c0_i32_0 = arith.constant 0 : i32
    %c0_i32_1 = arith.constant 0 : i32
    return %c0_i32, %c0_i32_0 : i32, i32
  }
  func.func @transform_12(%arg0: i32, %arg1: i32) -> (i32, i32, i32, i32) {
    %c0_i32 = arith.constant 0 : i32
    %c0_i32_0 = arith.constant 0 : i32
    %c0_i32_1 = arith.constant 0 : i32
    return %arg0, %arg1, %c0_i32, %c0_i32_0 : i32, i32, i32, i32
  }
}

module attributes {stable_mosaic.version = 11 : i64} {
  func.func @_edge_kernel(%arg0: i32, %arg1: i32, %arg2: memref<1x16x4xi32, #tpu.memory_space<vmem>>, %arg3: memref<1x16x128xf32, #tpu.memory_space<vmem>>, %arg4: memref<1x16x128xf32, #tpu.memory_space<vmem>>, %arg5: memref<128x128xbf16, #tpu.memory_space<vmem>>, %arg6: memref<128x128xbf16, #tpu.memory_space<vmem>>, %arg7: memref<1x128xf32, #tpu.memory_space<vmem>>, %arg8: memref<1x128xf32, #tpu.memory_space<vmem>>, %arg9: memref<1x128xf32, #tpu.memory_space<vmem>>, %arg10: memref<128x128xbf16, #tpu.memory_space<vmem>>, %arg11: memref<1x128xf32, #tpu.memory_space<vmem>>, %arg12: memref<1x128xf32, #tpu.memory_space<vmem>>, %arg13: memref<1x128xf32, #tpu.memory_space<vmem>>, %arg14: memref<1x1x2x128xf32, #tpu.memory_space<vmem>>) attributes {dimension_semantics = [#tpu.dimension_semantics<parallel>, #tpu.dimension_semantics<parallel>], iteration_bounds = array<i64: 2, 1>, scalar_prefetch = 0 : i64, scratch_operands = 0 : i64, tpu.core_type = #tpu.core_type<tc>, window_params = [{transform_indices = @transform_0, window_bounds = array<i64: 1, 16, 4>}, {transform_indices = @transform_1, window_bounds = array<i64: 1, 16, 128>}, {transform_indices = @transform_2, window_bounds = array<i64: 1, 16, 128>}, {pipeline_mode = #tpu.pipeline_mode<synchronous>, transform_indices = @transform_3, window_bounds = array<i64: 128, 128>}, {pipeline_mode = #tpu.pipeline_mode<synchronous>, transform_indices = @transform_4, window_bounds = array<i64: 128, 128>}, {pipeline_mode = #tpu.pipeline_mode<synchronous>, transform_indices = @transform_5, window_bounds = array<i64: 1, 128>}, {pipeline_mode = #tpu.pipeline_mode<synchronous>, transform_indices = @transform_6, window_bounds = array<i64: 1, 128>}, {pipeline_mode = #tpu.pipeline_mode<synchronous>, transform_indices = @transform_7, window_bounds = array<i64: 1, 128>}, {pipeline_mode = #tpu.pipeline_mode<synchronous>, transform_indices = @transform_8, window_bounds = array<i64: 128, 128>}, {pipeline_mode = #tpu.pipeline_mode<synchronous>, transform_indices = @transform_9, window_bounds = array<i64: 1, 128>}, {pipeline_mode = #tpu.pipeline_mode<synchronous>, transform_indices = @transform_10, window_bounds = array<i64: 1, 128>}, {pipeline_mode = #tpu.pipeline_mode<synchronous>, transform_indices = @transform_11, window_bounds = array<i64: 1, 128>}, {transform_indices = @transform_12, window_bounds = array<i64: 1, 1, 2, 128>}]} {
    %c0 = arith.constant 0 : index
    %c0_0 = arith.constant 0 : index
    %c0_1 = arith.constant 0 : index
    %0 = vector.load %arg2[%c0, %c0_0, %c0_1] : memref<1x16x4xi32, #tpu.memory_space<vmem>>, vector<1x16x4xi32>
    %1 = vector.shape_cast %0 : vector<1x16x4xi32> to vector<16x4xi32>
    %c0_2 = arith.constant 0 : index
    %c0_3 = arith.constant 0 : index
    %c0_4 = arith.constant 0 : index
    %2 = vector.load %arg3[%c0_2, %c0_3, %c0_4] : memref<1x16x128xf32, #tpu.memory_space<vmem>>, vector<1x16x128xf32>
    %3 = vector.shape_cast %2 : vector<1x16x128xf32> to vector<16x128xf32>
    %4 = arith.truncf %3 : vector<16x128xf32> to vector<16x128xbf16>
    %c0_5 = arith.constant 0 : index
    %c0_6 = arith.constant 0 : index
    %c0_7 = arith.constant 0 : index
    %5 = vector.load %arg4[%c0_5, %c0_6, %c0_7] : memref<1x16x128xf32, #tpu.memory_space<vmem>>, vector<1x16x128xf32>
    %6 = vector.shape_cast %5 : vector<1x16x128xf32> to vector<16x128xf32>
    %7 = arith.truncf %6 : vector<16x128xf32> to vector<16x128xbf16>
    %c0_8 = arith.constant 0 : index
    %c0_9 = arith.constant 0 : index
    %8 = vector.load %arg5[%c0_8, %c0_9] : memref<128x128xbf16, #tpu.memory_space<vmem>>, vector<128x128xbf16>
    %c0_10 = arith.constant 0 : index
    %c0_11 = arith.constant 0 : index
    %9 = vector.load %arg10[%c0_10, %c0_11] : memref<128x128xbf16, #tpu.memory_space<vmem>>, vector<128x128xbf16>
    %cst = arith.constant dense<0.000000e+00> : vector<16x128xf32>
    %10 = tpu.matmul %4, %8, %cst {dimension_numbers = #tpu.dot_dimension_numbers<[1], [0], [0], [1], [0, 0, 1, 1], [], []>} : vector<16x128xbf16>, vector<128x128xbf16>, vector<16x128xf32> -> vector<16x128xf32>
    %11 = arith.truncf %10 : vector<16x128xf32> to vector<16x128xbf16>
    %c0_12 = arith.constant 0 : index
    %c0_13 = arith.constant 0 : index
    %12 = vector.load %arg6[%c0_12, %c0_13] : memref<128x128xbf16, #tpu.memory_space<vmem>>, vector<128x128xbf16>
    %cst_14 = arith.constant dense<0.000000e+00> : vector<16x128xf32>
    %13 = tpu.matmul %7, %12, %cst_14 {dimension_numbers = #tpu.dot_dimension_numbers<[1], [0], [0], [1], [0, 0, 1, 1], [], []>} : vector<16x128xbf16>, vector<128x128xbf16>, vector<16x128xf32> -> vector<16x128xf32>
    %c0_15 = arith.constant 0 : index
    %c0_16 = arith.constant 0 : index
    %14 = vector.load %arg7[%c0_15, %c0_16] : memref<1x128xf32, #tpu.memory_space<vmem>>, vector<1x128xf32>
    %15 = vector.broadcast %14 : vector<1x128xf32> to vector<16x128xf32>
    %16 = arith.addf %13, %15 : vector<16x128xf32>
    %17 = tpu.iota {dimensions = array<i32: 1>} : vector<16x16xi32>
    %cst_17 = arith.constant 0.000000e+00 : f32
    %18 = vector.broadcast %cst_17 : f32 to vector<1x128xf32>
    %cst_18 = arith.constant 0.000000e+00 : f32
    %19 = vector.broadcast %cst_18 : f32 to vector<1x128xf32>
    %20 = vector.extract_strided_slice %1 {offsets = [0, 0], sizes = [16, 1], strides = [1, 1]} : vector<16x4xi32> to vector<16x1xi32>
    %21 = vector.broadcast %20 : vector<16x1xi32> to vector<16x16xi32>
    %22 = arith.cmpi eq, %17, %21 : vector<16x16xi32>
    %23 = arith.extui %22 : vector<16x16xi1> to vector<16x16xi32>
    %24 = arith.sitofp %23 : vector<16x16xi32> to vector<16x16xf32>
    %25 = arith.truncf %24 : vector<16x16xf32> to vector<16x16xbf16>
    %cst_19 = arith.constant dense<0.000000e+00> : vector<16x128xf32>
    %26 = tpu.matmul %25, %11, %cst_19 {dimension_numbers = #tpu.dot_dimension_numbers<[1], [0], [0], [1], [0, 0, 1, 1], [], []>} : vector<16x16xbf16>, vector<16x128xbf16>, vector<16x128xf32> -> vector<16x128xf32>
    %27 = arith.addf %26, %16 : vector<16x128xf32>
    %c0_20 = arith.constant 0 : index
    %c0_21 = arith.constant 0 : index
    %28 = vector.load %arg8[%c0_20, %c0_21] : memref<1x128xf32, #tpu.memory_space<vmem>>, vector<1x128xf32>
    %29 = vector.broadcast %28 : vector<1x128xf32> to vector<16x128xf32>
    %30 = arith.mulf %27, %29 : vector<16x128xf32>
    %c0_22 = arith.constant 0 : index
    %c0_23 = arith.constant 0 : index
    %31 = vector.load %arg9[%c0_22, %c0_23] : memref<1x128xf32, #tpu.memory_space<vmem>>, vector<1x128xf32>
    %32 = vector.broadcast %31 : vector<1x128xf32> to vector<16x128xf32>
    %33 = arith.addf %30, %32 : vector<16x128xf32>
    %cst_24 = arith.constant 0.000000e+00 : f32
    %34 = vector.broadcast %cst_24 : f32 to vector<16x128xf32>
    %35 = arith.cmpf ogt, %33, %34 : vector<16x128xf32>
    %cst_25 = arith.constant 2.000000e-01 : f32
    %36 = vector.broadcast %cst_25 : f32 to vector<16x128xf32>
    %37 = arith.mulf %36, %33 : vector<16x128xf32>
    %38 = arith.select %35, %33, %37 : vector<16x128xi1>, vector<16x128xf32>
    %39 = arith.truncf %38 : vector<16x128xf32> to vector<16x128xbf16>
    %cst_26 = arith.constant dense<0.000000e+00> : vector<16x128xf32>
    %40 = tpu.matmul %39, %9, %cst_26 {dimension_numbers = #tpu.dot_dimension_numbers<[1], [0], [0], [1], [0, 0, 1, 1], [], []>} : vector<16x128xbf16>, vector<128x128xbf16>, vector<16x128xf32> -> vector<16x128xf32>
    %c0_27 = arith.constant 0 : index
    %c0_28 = arith.constant 0 : index
    %41 = vector.load %arg11[%c0_27, %c0_28] : memref<1x128xf32, #tpu.memory_space<vmem>>, vector<1x128xf32>
    %42 = vector.broadcast %41 : vector<1x128xf32> to vector<16x128xf32>
    %43 = arith.addf %40, %42 : vector<16x128xf32>
    %cst_29 = arith.constant dense<0.000000e+00> : vector<128xf32>
    %44 = vector.multi_reduction <add>, %43, %cst_29 [0] : vector<16x128xf32> to vector<128xf32>
    %45 = vector.shape_cast %44 : vector<128xf32> to vector<1x128xf32>
    %46 = arith.addf %18, %45 : vector<1x128xf32>
    %47 = arith.mulf %43, %43 : vector<16x128xf32>
    %cst_30 = arith.constant dense<0.000000e+00> : vector<128xf32>
    %48 = vector.multi_reduction <add>, %47, %cst_30 [0] : vector<16x128xf32> to vector<128xf32>
    %49 = vector.shape_cast %48 : vector<128xf32> to vector<1x128xf32>
    %50 = arith.addf %19, %49 : vector<1x128xf32>
    %51 = vector.extract_strided_slice %1 {offsets = [0, 1], sizes = [16, 1], strides = [1, 1]} : vector<16x4xi32> to vector<16x1xi32>
    %52 = vector.broadcast %51 : vector<16x1xi32> to vector<16x16xi32>
    %53 = arith.cmpi eq, %17, %52 : vector<16x16xi32>
    %54 = arith.extui %53 : vector<16x16xi1> to vector<16x16xi32>
    %55 = arith.sitofp %54 : vector<16x16xi32> to vector<16x16xf32>
    %56 = arith.truncf %55 : vector<16x16xf32> to vector<16x16xbf16>
    %cst_31 = arith.constant dense<0.000000e+00> : vector<16x128xf32>
    %57 = tpu.matmul %56, %11, %cst_31 {dimension_numbers = #tpu.dot_dimension_numbers<[1], [0], [0], [1], [0, 0, 1, 1], [], []>} : vector<16x16xbf16>, vector<16x128xbf16>, vector<16x128xf32> -> vector<16x128xf32>
    %58 = arith.addf %57, %16 : vector<16x128xf32>
    %c0_32 = arith.constant 0 : index
    %c0_33 = arith.constant 0 : index
    %59 = vector.load %arg8[%c0_32, %c0_33] : memref<1x128xf32, #tpu.memory_space<vmem>>, vector<1x128xf32>
    %60 = vector.broadcast %59 : vector<1x128xf32> to vector<16x128xf32>
    %61 = arith.mulf %58, %60 : vector<16x128xf32>
    %c0_34 = arith.constant 0 : index
    %c0_35 = arith.constant 0 : index
    %62 = vector.load %arg9[%c0_34, %c0_35] : memref<1x128xf32, #tpu.memory_space<vmem>>, vector<1x128xf32>
    %63 = vector.broadcast %62 : vector<1x128xf32> to vector<16x128xf32>
    %64 = arith.addf %61, %63 : vector<16x128xf32>
    %cst_36 = arith.constant 0.000000e+00 : f32
    %65 = vector.broadcast %cst_36 : f32 to vector<16x128xf32>
    %66 = arith.cmpf ogt, %64, %65 : vector<16x128xf32>
    %cst_37 = arith.constant 2.000000e-01 : f32
    %67 = vector.broadcast %cst_37 : f32 to vector<16x128xf32>
    %68 = arith.mulf %67, %64 : vector<16x128xf32>
    %69 = arith.select %66, %64, %68 : vector<16x128xi1>, vector<16x128xf32>
    %70 = arith.truncf %69 : vector<16x128xf32> to vector<16x128xbf16>
    %cst_38 = arith.constant dense<0.000000e+00> : vector<16x128xf32>
    %71 = tpu.matmul %70, %9, %cst_38 {dimension_numbers = #tpu.dot_dimension_numbers<[1], [0], [0], [1], [0, 0, 1, 1], [], []>} : vector<16x128xbf16>, vector<128x128xbf16>, vector<16x128xf32> -> vector<16x128xf32>
    %c0_39 = arith.constant 0 : index
    %c0_40 = arith.constant 0 : index
    %72 = vector.load %arg11[%c0_39, %c0_40] : memref<1x128xf32, #tpu.memory_space<vmem>>, vector<1x128xf32>
    %73 = vector.broadcast %72 : vector<1x128xf32> to vector<16x128xf32>
    %74 = arith.addf %71, %73 : vector<16x128xf32>
    %cst_41 = arith.constant dense<0.000000e+00> : vector<128xf32>
    %75 = vector.multi_reduction <add>, %74, %cst_41 [0] : vector<16x128xf32> to vector<128xf32>
    %76 = vector.shape_cast %75 : vector<128xf32> to vector<1x128xf32>
    %77 = arith.addf %46, %76 : vector<1x128xf32>
    %78 = arith.mulf %74, %74 : vector<16x128xf32>
    %cst_42 = arith.constant dense<0.000000e+00> : vector<128xf32>
    %79 = vector.multi_reduction <add>, %78, %cst_42 [0] : vector<16x128xf32> to vector<128xf32>
    %80 = vector.shape_cast %79 : vector<128xf32> to vector<1x128xf32>
    %81 = arith.addf %50, %80 : vector<1x128xf32>
    %82 = vector.extract_strided_slice %1 {offsets = [0, 2], sizes = [16, 1], strides = [1, 1]} : vector<16x4xi32> to vector<16x1xi32>
    %83 = vector.broadcast %82 : vector<16x1xi32> to vector<16x16xi32>
    %84 = arith.cmpi eq, %17, %83 : vector<16x16xi32>
    %85 = arith.extui %84 : vector<16x16xi1> to vector<16x16xi32>
    %86 = arith.sitofp %85 : vector<16x16xi32> to vector<16x16xf32>
    %87 = arith.truncf %86 : vector<16x16xf32> to vector<16x16xbf16>
    %cst_43 = arith.constant dense<0.000000e+00> : vector<16x128xf32>
    %88 = tpu.matmul %87, %11, %cst_43 {dimension_numbers = #tpu.dot_dimension_numbers<[1], [0], [0], [1], [0, 0, 1, 1], [], []>} : vector<16x16xbf16>, vector<16x128xbf16>, vector<16x128xf32> -> vector<16x128xf32>
    %89 = arith.addf %88, %16 : vector<16x128xf32>
    %c0_44 = arith.constant 0 : index
    %c0_45 = arith.constant 0 : index
    %90 = vector.load %arg8[%c0_44, %c0_45] : memref<1x128xf32, #tpu.memory_space<vmem>>, vector<1x128xf32>
    %91 = vector.broadcast %90 : vector<1x128xf32> to vector<16x128xf32>
    %92 = arith.mulf %89, %91 : vector<16x128xf32>
    %c0_46 = arith.constant 0 : index
    %c0_47 = arith.constant 0 : index
    %93 = vector.load %arg9[%c0_46, %c0_47] : memref<1x128xf32, #tpu.memory_space<vmem>>, vector<1x128xf32>
    %94 = vector.broadcast %93 : vector<1x128xf32> to vector<16x128xf32>
    %95 = arith.addf %92, %94 : vector<16x128xf32>
    %cst_48 = arith.constant 0.000000e+00 : f32
    %96 = vector.broadcast %cst_48 : f32 to vector<16x128xf32>
    %97 = arith.cmpf ogt, %95, %96 : vector<16x128xf32>
    %cst_49 = arith.constant 2.000000e-01 : f32
    %98 = vector.broadcast %cst_49 : f32 to vector<16x128xf32>
    %99 = arith.mulf %98, %95 : vector<16x128xf32>
    %100 = arith.select %97, %95, %99 : vector<16x128xi1>, vector<16x128xf32>
    %101 = arith.truncf %100 : vector<16x128xf32> to vector<16x128xbf16>
    %cst_50 = arith.constant dense<0.000000e+00> : vector<16x128xf32>
    %102 = tpu.matmul %101, %9, %cst_50 {dimension_numbers = #tpu.dot_dimension_numbers<[1], [0], [0], [1], [0, 0, 1, 1], [], []>} : vector<16x128xbf16>, vector<128x128xbf16>, vector<16x128xf32> -> vector<16x128xf32>
    %c0_51 = arith.constant 0 : index
    %c0_52 = arith.constant 0 : index
    %103 = vector.load %arg11[%c0_51, %c0_52] : memref<1x128xf32, #tpu.memory_space<vmem>>, vector<1x128xf32>
    %104 = vector.broadcast %103 : vector<1x128xf32> to vector<16x128xf32>
    %105 = arith.addf %102, %104 : vector<16x128xf32>
    %cst_53 = arith.constant dense<0.000000e+00> : vector<128xf32>
    %106 = vector.multi_reduction <add>, %105, %cst_53 [0] : vector<16x128xf32> to vector<128xf32>
    %107 = vector.shape_cast %106 : vector<128xf32> to vector<1x128xf32>
    %108 = arith.addf %77, %107 : vector<1x128xf32>
    %109 = arith.mulf %105, %105 : vector<16x128xf32>
    %cst_54 = arith.constant dense<0.000000e+00> : vector<128xf32>
    %110 = vector.multi_reduction <add>, %109, %cst_54 [0] : vector<16x128xf32> to vector<128xf32>
    %111 = vector.shape_cast %110 : vector<128xf32> to vector<1x128xf32>
    %112 = arith.addf %81, %111 : vector<1x128xf32>
    %113 = vector.extract_strided_slice %1 {offsets = [0, 3], sizes = [16, 1], strides = [1, 1]} : vector<16x4xi32> to vector<16x1xi32>
    %114 = vector.broadcast %113 : vector<16x1xi32> to vector<16x16xi32>
    %115 = arith.cmpi eq, %17, %114 : vector<16x16xi32>
    %116 = arith.extui %115 : vector<16x16xi1> to vector<16x16xi32>
    %117 = arith.sitofp %116 : vector<16x16xi32> to vector<16x16xf32>
    %118 = arith.truncf %117 : vector<16x16xf32> to vector<16x16xbf16>
    %cst_55 = arith.constant dense<0.000000e+00> : vector<16x128xf32>
    %119 = tpu.matmul %118, %11, %cst_55 {dimension_numbers = #tpu.dot_dimension_numbers<[1], [0], [0], [1], [0, 0, 1, 1], [], []>} : vector<16x16xbf16>, vector<16x128xbf16>, vector<16x128xf32> -> vector<16x128xf32>
    %120 = arith.addf %119, %16 : vector<16x128xf32>
    %c0_56 = arith.constant 0 : index
    %c0_57 = arith.constant 0 : index
    %121 = vector.load %arg8[%c0_56, %c0_57] : memref<1x128xf32, #tpu.memory_space<vmem>>, vector<1x128xf32>
    %122 = vector.broadcast %121 : vector<1x128xf32> to vector<16x128xf32>
    %123 = arith.mulf %120, %122 : vector<16x128xf32>
    %c0_58 = arith.constant 0 : index
    %c0_59 = arith.constant 0 : index
    %124 = vector.load %arg9[%c0_58, %c0_59] : memref<1x128xf32, #tpu.memory_space<vmem>>, vector<1x128xf32>
    %125 = vector.broadcast %124 : vector<1x128xf32> to vector<16x128xf32>
    %126 = arith.addf %123, %125 : vector<16x128xf32>
    %cst_60 = arith.constant 0.000000e+00 : f32
    %127 = vector.broadcast %cst_60 : f32 to vector<16x128xf32>
    %128 = arith.cmpf ogt, %126, %127 : vector<16x128xf32>
    %cst_61 = arith.constant 2.000000e-01 : f32
    %129 = vector.broadcast %cst_61 : f32 to vector<16x128xf32>
    %130 = arith.mulf %129, %126 : vector<16x128xf32>
    %131 = arith.select %128, %126, %130 : vector<16x128xi1>, vector<16x128xf32>
    %132 = arith.truncf %131 : vector<16x128xf32> to vector<16x128xbf16>
    %cst_62 = arith.constant dense<0.000000e+00> : vector<16x128xf32>
    %133 = tpu.matmul %132, %9, %cst_62 {dimension_numbers = #tpu.dot_dimension_numbers<[1], [0], [0], [1], [0, 0, 1, 1], [], []>} : vector<16x128xbf16>, vector<128x128xbf16>, vector<16x128xf32> -> vector<16x128xf32>
    %c0_63 = arith.constant 0 : index
    %c0_64 = arith.constant 0 : index
    %134 = vector.load %arg11[%c0_63, %c0_64] : memref<1x128xf32, #tpu.memory_space<vmem>>, vector<1x128xf32>
    %135 = vector.broadcast %134 : vector<1x128xf32> to vector<16x128xf32>
    %136 = arith.addf %133, %135 : vector<16x128xf32>
    %cst_65 = arith.constant dense<0.000000e+00> : vector<128xf32>
    %137 = vector.multi_reduction <add>, %136, %cst_65 [0] : vector<16x128xf32> to vector<128xf32>
    %138 = vector.shape_cast %137 : vector<128xf32> to vector<1x128xf32>
    %139 = arith.addf %108, %138 : vector<1x128xf32>
    %140 = arith.mulf %136, %136 : vector<16x128xf32>
    %cst_66 = arith.constant dense<0.000000e+00> : vector<128xf32>
    %141 = vector.multi_reduction <add>, %140, %cst_66 [0] : vector<16x128xf32> to vector<128xf32>
    %142 = vector.shape_cast %141 : vector<128xf32> to vector<1x128xf32>
    %143 = arith.addf %112, %142 : vector<1x128xf32>
    %144 = tpu.concatenate %139, %143 in 0 : vector<1x128xf32>, vector<1x128xf32> -> vector<2x128xf32>
    %145 = vector.shape_cast %144 : vector<2x128xf32> to vector<1x1x2x128xf32>
    %c0_67 = arith.constant 0 : index
    %c0_68 = arith.constant 0 : index
    %c0_69 = arith.constant 0 : index
    %c0_70 = arith.constant 0 : index
    %146 = vector.load %arg14[%c0_67, %c0_68, %c0_69, %c0_70] : memref<1x1x2x128xf32, #tpu.memory_space<vmem>>, vector<1x1x2x128xf32>
    tpu.vector_store %arg14[%c0_67, %c0_68, %c0_69, %c0_70], %145 {strides = array<i32>} : memref<1x1x2x128xf32, #tpu.memory_space<vmem>>, vector<1x1x2x128xf32>,
    return
  }
  func.func @transform_0(%arg0: i32, %arg1: i32) -> (i32, i32, i32) {
    %c0_i32 = arith.constant 0 : i32
    %c0_i32_0 = arith.constant 0 : i32
    return %arg0, %arg1, %c0_i32 : i32, i32, i32
  }
  func.func @transform_1(%arg0: i32, %arg1: i32) -> (i32, i32, i32) {
    %c0_i32 = arith.constant 0 : i32
    %c0_i32_0 = arith.constant 0 : i32
    %c0_i32_1 = arith.constant 0 : i32
    return %arg0, %c0_i32, %c0_i32_0 : i32, i32, i32
  }
  func.func @transform_2(%arg0: i32, %arg1: i32) -> (i32, i32, i32) {
    %c0_i32 = arith.constant 0 : i32
    %c0_i32_0 = arith.constant 0 : i32
    return %arg0, %arg1, %c0_i32 : i32, i32, i32
  }
  func.func @transform_3(%arg0: i32, %arg1: i32) -> (i32, i32) {
    %c0_i32 = arith.constant 0 : i32
    %c0_i32_0 = arith.constant 0 : i32
    %c0_i32_1 = arith.constant 0 : i32
    return %c0_i32, %c0_i32_0 : i32, i32
  }
  func.func @transform_4(%arg0: i32, %arg1: i32) -> (i32, i32) {
    %c0_i32 = arith.constant 0 : i32
    %c0_i32_0 = arith.constant 0 : i32
    %c0_i32_1 = arith.constant 0 : i32
    return %c0_i32, %c0_i32_0 : i32, i32
  }
  func.func @transform_5(%arg0: i32, %arg1: i32) -> (i32, i32) {
    %c0_i32 = arith.constant 0 : i32
    %c0_i32_0 = arith.constant 0 : i32
    %c0_i32_1 = arith.constant 0 : i32
    return %c0_i32, %c0_i32_0 : i32, i32
  }
  func.func @transform_6(%arg0: i32, %arg1: i32) -> (i32, i32) {
    %c0_i32 = arith.constant 0 : i32
    %c0_i32_0 = arith.constant 0 : i32
    %c0_i32_1 = arith.constant 0 : i32
    return %c0_i32, %c0_i32_0 : i32, i32
  }
  func.func @transform_7(%arg0: i32, %arg1: i32) -> (i32, i32) {
    %c0_i32 = arith.constant 0 : i32
    %c0_i32_0 = arith.constant 0 : i32
    %c0_i32_1 = arith.constant 0 : i32
    return %c0_i32, %c0_i32_0 : i32, i32
  }
  func.func @transform_8(%arg0: i32, %arg1: i32) -> (i32, i32) {
    %c0_i32 = arith.constant 0 : i32
    %c0_i32_0 = arith.constant 0 : i32
    %c0_i32_1 = arith.constant 0 : i32
    return %c0_i32, %c0_i32_0 : i32, i32
  }
  func.func @transform_9(%arg0: i32, %arg1: i32) -> (i32, i32) {
    %c0_i32 = arith.constant 0 : i32
    %c0_i32_0 = arith.constant 0 : i32
    %c0_i32_1 = arith.constant 0 : i32
    return %c0_i32, %c0_i32_0 : i32, i32
  }
  func.func @transform_10(%arg0: i32, %arg1: i32) -> (i32, i32) {
    %c0_i32 = arith.constant 0 : i32
    %c0_i32_0 = arith.constant 0 : i32
    %c0_i32_1 = arith.constant 0 : i32
    return %c0_i32, %c0_i32_0 : i32, i32
  }
  func.func @transform_11(%arg0: i32, %arg1: i32) -> (i32, i32) {
    %c0_i32 = arith.constant 0 : i32
    %c0_i32_0 = arith.constant 0 : i32
    %c0_i32_1 = arith.constant 0 : i32
    return %c0_i32, %c0_i32_0 : i32, i32
  }
  func.func @transform_12(%arg0: i32, %arg1: i32) -> (i32, i32, i32, i32) {
    %c0_i32 = arith.constant 0 : i32
    %c0_i32_0 = arith.constant 0 : i32
    %c0_i32_1 = arith.constant 0 : i32
    return %arg0, %arg1, %c0_i32, %c0_i32_0 : i32, i32, i32, i32
  }
}

module attributes {stable_mosaic.version = 11 : i64} {
  func.func @_edge_kernel(%arg0: i32, %arg1: i32, %arg2: memref<1x16x4xi32, #tpu.memory_space<vmem>>, %arg3: memref<1x16x128xf32, #tpu.memory_space<vmem>>, %arg4: memref<1x16x128xf32, #tpu.memory_space<vmem>>, %arg5: memref<128x128xbf16, #tpu.memory_space<vmem>>, %arg6: memref<128x128xbf16, #tpu.memory_space<vmem>>, %arg7: memref<1x128xf32, #tpu.memory_space<vmem>>, %arg8: memref<1x128xf32, #tpu.memory_space<vmem>>, %arg9: memref<1x128xf32, #tpu.memory_space<vmem>>, %arg10: memref<128x128xbf16, #tpu.memory_space<vmem>>, %arg11: memref<1x128xf32, #tpu.memory_space<vmem>>, %arg12: memref<1x128xf32, #tpu.memory_space<vmem>>, %arg13: memref<1x128xf32, #tpu.memory_space<vmem>>, %arg14: memref<1x16x128xf32, #tpu.memory_space<vmem>>) attributes {dimension_semantics = [#tpu.dimension_semantics<parallel>, #tpu.dimension_semantics<parallel>], iteration_bounds = array<i64: 2, 1>, scalar_prefetch = 0 : i64, scratch_operands = 0 : i64, tpu.core_type = #tpu.core_type<tc>, window_params = [{transform_indices = @transform_0, window_bounds = array<i64: 1, 16, 4>}, {transform_indices = @transform_1, window_bounds = array<i64: 1, 16, 128>}, {transform_indices = @transform_2, window_bounds = array<i64: 1, 16, 128>}, {pipeline_mode = #tpu.pipeline_mode<synchronous>, transform_indices = @transform_3, window_bounds = array<i64: 128, 128>}, {pipeline_mode = #tpu.pipeline_mode<synchronous>, transform_indices = @transform_4, window_bounds = array<i64: 128, 128>}, {pipeline_mode = #tpu.pipeline_mode<synchronous>, transform_indices = @transform_5, window_bounds = array<i64: 1, 128>}, {pipeline_mode = #tpu.pipeline_mode<synchronous>, transform_indices = @transform_6, window_bounds = array<i64: 1, 128>}, {pipeline_mode = #tpu.pipeline_mode<synchronous>, transform_indices = @transform_7, window_bounds = array<i64: 1, 128>}, {pipeline_mode = #tpu.pipeline_mode<synchronous>, transform_indices = @transform_8, window_bounds = array<i64: 128, 128>}, {pipeline_mode = #tpu.pipeline_mode<synchronous>, transform_indices = @transform_9, window_bounds = array<i64: 1, 128>}, {pipeline_mode = #tpu.pipeline_mode<synchronous>, transform_indices = @transform_10, window_bounds = array<i64: 1, 128>}, {pipeline_mode = #tpu.pipeline_mode<synchronous>, transform_indices = @transform_11, window_bounds = array<i64: 1, 128>}, {transform_indices = @transform_12, window_bounds = array<i64: 1, 16, 128>}]} {
    %c0 = arith.constant 0 : index
    %c0_0 = arith.constant 0 : index
    %c0_1 = arith.constant 0 : index
    %0 = vector.load %arg2[%c0, %c0_0, %c0_1] : memref<1x16x4xi32, #tpu.memory_space<vmem>>, vector<1x16x4xi32>
    %1 = vector.shape_cast %0 : vector<1x16x4xi32> to vector<16x4xi32>
    %c0_2 = arith.constant 0 : index
    %c0_3 = arith.constant 0 : index
    %c0_4 = arith.constant 0 : index
    %2 = vector.load %arg3[%c0_2, %c0_3, %c0_4] : memref<1x16x128xf32, #tpu.memory_space<vmem>>, vector<1x16x128xf32>
    %3 = vector.shape_cast %2 : vector<1x16x128xf32> to vector<16x128xf32>
    %4 = arith.truncf %3 : vector<16x128xf32> to vector<16x128xbf16>
    %c0_5 = arith.constant 0 : index
    %c0_6 = arith.constant 0 : index
    %c0_7 = arith.constant 0 : index
    %5 = vector.load %arg4[%c0_5, %c0_6, %c0_7] : memref<1x16x128xf32, #tpu.memory_space<vmem>>, vector<1x16x128xf32>
    %6 = vector.shape_cast %5 : vector<1x16x128xf32> to vector<16x128xf32>
    %7 = arith.truncf %6 : vector<16x128xf32> to vector<16x128xbf16>
    %c0_8 = arith.constant 0 : index
    %c0_9 = arith.constant 0 : index
    %8 = vector.load %arg5[%c0_8, %c0_9] : memref<128x128xbf16, #tpu.memory_space<vmem>>, vector<128x128xbf16>
    %c0_10 = arith.constant 0 : index
    %c0_11 = arith.constant 0 : index
    %9 = vector.load %arg10[%c0_10, %c0_11] : memref<128x128xbf16, #tpu.memory_space<vmem>>, vector<128x128xbf16>
    %cst = arith.constant dense<0.000000e+00> : vector<16x128xf32>
    %10 = tpu.matmul %4, %8, %cst {dimension_numbers = #tpu.dot_dimension_numbers<[1], [0], [0], [1], [0, 0, 1, 1], [], []>} : vector<16x128xbf16>, vector<128x128xbf16>, vector<16x128xf32> -> vector<16x128xf32>
    %11 = arith.truncf %10 : vector<16x128xf32> to vector<16x128xbf16>
    %c0_12 = arith.constant 0 : index
    %c0_13 = arith.constant 0 : index
    %12 = vector.load %arg6[%c0_12, %c0_13] : memref<128x128xbf16, #tpu.memory_space<vmem>>, vector<128x128xbf16>
    %cst_14 = arith.constant dense<0.000000e+00> : vector<16x128xf32>
    %13 = tpu.matmul %7, %12, %cst_14 {dimension_numbers = #tpu.dot_dimension_numbers<[1], [0], [0], [1], [0, 0, 1, 1], [], []>} : vector<16x128xbf16>, vector<128x128xbf16>, vector<16x128xf32> -> vector<16x128xf32>
    %c0_15 = arith.constant 0 : index
    %c0_16 = arith.constant 0 : index
    %14 = vector.load %arg7[%c0_15, %c0_16] : memref<1x128xf32, #tpu.memory_space<vmem>>, vector<1x128xf32>
    %15 = vector.broadcast %14 : vector<1x128xf32> to vector<16x128xf32>
    %16 = arith.addf %13, %15 : vector<16x128xf32>
    %17 = tpu.iota {dimensions = array<i32: 1>} : vector<16x16xi32>
    %cst_17 = arith.constant 0xFF800000 : f32
    %18 = vector.broadcast %cst_17 : f32 to vector<16x128xf32>
    %19 = vector.extract_strided_slice %1 {offsets = [0, 0], sizes = [16, 1], strides = [1, 1]} : vector<16x4xi32> to vector<16x1xi32>
    %20 = vector.broadcast %19 : vector<16x1xi32> to vector<16x16xi32>
    %21 = arith.cmpi eq, %17, %20 : vector<16x16xi32>
    %22 = arith.extui %21 : vector<16x16xi1> to vector<16x16xi32>
    %23 = arith.sitofp %22 : vector<16x16xi32> to vector<16x16xf32>
    %24 = arith.truncf %23 : vector<16x16xf32> to vector<16x16xbf16>
    %cst_18 = arith.constant dense<0.000000e+00> : vector<16x128xf32>
    %25 = tpu.matmul %24, %11, %cst_18 {dimension_numbers = #tpu.dot_dimension_numbers<[1], [0], [0], [1], [0, 0, 1, 1], [], []>} : vector<16x16xbf16>, vector<16x128xbf16>, vector<16x128xf32> -> vector<16x128xf32>
    %26 = arith.addf %25, %16 : vector<16x128xf32>
    %c0_19 = arith.constant 0 : index
    %c0_20 = arith.constant 0 : index
    %27 = vector.load %arg8[%c0_19, %c0_20] : memref<1x128xf32, #tpu.memory_space<vmem>>, vector<1x128xf32>
    %28 = vector.broadcast %27 : vector<1x128xf32> to vector<16x128xf32>
    %29 = arith.mulf %26, %28 : vector<16x128xf32>
    %c0_21 = arith.constant 0 : index
    %c0_22 = arith.constant 0 : index
    %30 = vector.load %arg9[%c0_21, %c0_22] : memref<1x128xf32, #tpu.memory_space<vmem>>, vector<1x128xf32>
    %31 = vector.broadcast %30 : vector<1x128xf32> to vector<16x128xf32>
    %32 = arith.addf %29, %31 : vector<16x128xf32>
    %cst_23 = arith.constant 0.000000e+00 : f32
    %33 = vector.broadcast %cst_23 : f32 to vector<16x128xf32>
    %34 = arith.cmpf ogt, %32, %33 : vector<16x128xf32>
    %cst_24 = arith.constant 2.000000e-01 : f32
    %35 = vector.broadcast %cst_24 : f32 to vector<16x128xf32>
    %36 = arith.mulf %35, %32 : vector<16x128xf32>
    %37 = arith.select %34, %32, %36 : vector<16x128xi1>, vector<16x128xf32>
    %38 = arith.truncf %37 : vector<16x128xf32> to vector<16x128xbf16>
    %cst_25 = arith.constant dense<0.000000e+00> : vector<16x128xf32>
    %39 = tpu.matmul %38, %9, %cst_25 {dimension_numbers = #tpu.dot_dimension_numbers<[1], [0], [0], [1], [0, 0, 1, 1], [], []>} : vector<16x128xbf16>, vector<128x128xbf16>, vector<16x128xf32> -> vector<16x128xf32>
    %c0_26 = arith.constant 0 : index
    %c0_27 = arith.constant 0 : index
    %40 = vector.load %arg11[%c0_26, %c0_27] : memref<1x128xf32, #tpu.memory_space<vmem>>, vector<1x128xf32>
    %41 = vector.broadcast %40 : vector<1x128xf32> to vector<16x128xf32>
    %42 = arith.addf %39, %41 : vector<16x128xf32>
    %c0_28 = arith.constant 0 : index
    %c0_29 = arith.constant 0 : index
    %43 = vector.load %arg12[%c0_28, %c0_29] : memref<1x128xf32, #tpu.memory_space<vmem>>, vector<1x128xf32>
    %44 = vector.broadcast %43 : vector<1x128xf32> to vector<16x128xf32>
    %45 = arith.mulf %42, %44 : vector<16x128xf32>
    %c0_30 = arith.constant 0 : index
    %c0_31 = arith.constant 0 : index
    %46 = vector.load %arg13[%c0_30, %c0_31] : memref<1x128xf32, #tpu.memory_space<vmem>>, vector<1x128xf32>
    %47 = vector.broadcast %46 : vector<1x128xf32> to vector<16x128xf32>
    %48 = arith.addf %45, %47 : vector<16x128xf32>
    %cst_32 = arith.constant 0.000000e+00 : f32
    %49 = vector.broadcast %cst_32 : f32 to vector<16x128xf32>
    %50 = arith.cmpf ogt, %48, %49 : vector<16x128xf32>
    %cst_33 = arith.constant 2.000000e-01 : f32
    %51 = vector.broadcast %cst_33 : f32 to vector<16x128xf32>
    %52 = arith.mulf %51, %48 : vector<16x128xf32>
    %53 = arith.select %50, %48, %52 : vector<16x128xi1>, vector<16x128xf32>
    %54 = arith.maximumf %18, %53 : vector<16x128xf32>
    %55 = vector.extract_strided_slice %1 {offsets = [0, 1], sizes = [16, 1], strides = [1, 1]} : vector<16x4xi32> to vector<16x1xi32>
    %56 = vector.broadcast %55 : vector<16x1xi32> to vector<16x16xi32>
    %57 = arith.cmpi eq, %17, %56 : vector<16x16xi32>
    %58 = arith.extui %57 : vector<16x16xi1> to vector<16x16xi32>
    %59 = arith.sitofp %58 : vector<16x16xi32> to vector<16x16xf32>
    %60 = arith.truncf %59 : vector<16x16xf32> to vector<16x16xbf16>
    %cst_34 = arith.constant dense<0.000000e+00> : vector<16x128xf32>
    %61 = tpu.matmul %60, %11, %cst_34 {dimension_numbers = #tpu.dot_dimension_numbers<[1], [0], [0], [1], [0, 0, 1, 1], [], []>} : vector<16x16xbf16>, vector<16x128xbf16>, vector<16x128xf32> -> vector<16x128xf32>
    %62 = arith.addf %61, %16 : vector<16x128xf32>
    %c0_35 = arith.constant 0 : index
    %c0_36 = arith.constant 0 : index
    %63 = vector.load %arg8[%c0_35, %c0_36] : memref<1x128xf32, #tpu.memory_space<vmem>>, vector<1x128xf32>
    %64 = vector.broadcast %63 : vector<1x128xf32> to vector<16x128xf32>
    %65 = arith.mulf %62, %64 : vector<16x128xf32>
    %c0_37 = arith.constant 0 : index
    %c0_38 = arith.constant 0 : index
    %66 = vector.load %arg9[%c0_37, %c0_38] : memref<1x128xf32, #tpu.memory_space<vmem>>, vector<1x128xf32>
    %67 = vector.broadcast %66 : vector<1x128xf32> to vector<16x128xf32>
    %68 = arith.addf %65, %67 : vector<16x128xf32>
    %cst_39 = arith.constant 0.000000e+00 : f32
    %69 = vector.broadcast %cst_39 : f32 to vector<16x128xf32>
    %70 = arith.cmpf ogt, %68, %69 : vector<16x128xf32>
    %cst_40 = arith.constant 2.000000e-01 : f32
    %71 = vector.broadcast %cst_40 : f32 to vector<16x128xf32>
    %72 = arith.mulf %71, %68 : vector<16x128xf32>
    %73 = arith.select %70, %68, %72 : vector<16x128xi1>, vector<16x128xf32>
    %74 = arith.truncf %73 : vector<16x128xf32> to vector<16x128xbf16>
    %cst_41 = arith.constant dense<0.000000e+00> : vector<16x128xf32>
    %75 = tpu.matmul %74, %9, %cst_41 {dimension_numbers = #tpu.dot_dimension_numbers<[1], [0], [0], [1], [0, 0, 1, 1], [], []>} : vector<16x128xbf16>, vector<128x128xbf16>, vector<16x128xf32> -> vector<16x128xf32>
    %c0_42 = arith.constant 0 : index
    %c0_43 = arith.constant 0 : index
    %76 = vector.load %arg11[%c0_42, %c0_43] : memref<1x128xf32, #tpu.memory_space<vmem>>, vector<1x128xf32>
    %77 = vector.broadcast %76 : vector<1x128xf32> to vector<16x128xf32>
    %78 = arith.addf %75, %77 : vector<16x128xf32>
    %c0_44 = arith.constant 0 : index
    %c0_45 = arith.constant 0 : index
    %79 = vector.load %arg12[%c0_44, %c0_45] : memref<1x128xf32, #tpu.memory_space<vmem>>, vector<1x128xf32>
    %80 = vector.broadcast %79 : vector<1x128xf32> to vector<16x128xf32>
    %81 = arith.mulf %78, %80 : vector<16x128xf32>
    %c0_46 = arith.constant 0 : index
    %c0_47 = arith.constant 0 : index
    %82 = vector.load %arg13[%c0_46, %c0_47] : memref<1x128xf32, #tpu.memory_space<vmem>>, vector<1x128xf32>
    %83 = vector.broadcast %82 : vector<1x128xf32> to vector<16x128xf32>
    %84 = arith.addf %81, %83 : vector<16x128xf32>
    %cst_48 = arith.constant 0.000000e+00 : f32
    %85 = vector.broadcast %cst_48 : f32 to vector<16x128xf32>
    %86 = arith.cmpf ogt, %84, %85 : vector<16x128xf32>
    %cst_49 = arith.constant 2.000000e-01 : f32
    %87 = vector.broadcast %cst_49 : f32 to vector<16x128xf32>
    %88 = arith.mulf %87, %84 : vector<16x128xf32>
    %89 = arith.select %86, %84, %88 : vector<16x128xi1>, vector<16x128xf32>
    %90 = arith.maximumf %54, %89 : vector<16x128xf32>
    %91 = vector.extract_strided_slice %1 {offsets = [0, 2], sizes = [16, 1], strides = [1, 1]} : vector<16x4xi32> to vector<16x1xi32>
    %92 = vector.broadcast %91 : vector<16x1xi32> to vector<16x16xi32>
    %93 = arith.cmpi eq, %17, %92 : vector<16x16xi32>
    %94 = arith.extui %93 : vector<16x16xi1> to vector<16x16xi32>
    %95 = arith.sitofp %94 : vector<16x16xi32> to vector<16x16xf32>
    %96 = arith.truncf %95 : vector<16x16xf32> to vector<16x16xbf16>
    %cst_50 = arith.constant dense<0.000000e+00> : vector<16x128xf32>
    %97 = tpu.matmul %96, %11, %cst_50 {dimension_numbers = #tpu.dot_dimension_numbers<[1], [0], [0], [1], [0, 0, 1, 1], [], []>} : vector<16x16xbf16>, vector<16x128xbf16>, vector<16x128xf32> -> vector<16x128xf32>
    %98 = arith.addf %97, %16 : vector<16x128xf32>
    %c0_51 = arith.constant 0 : index
    %c0_52 = arith.constant 0 : index
    %99 = vector.load %arg8[%c0_51, %c0_52] : memref<1x128xf32, #tpu.memory_space<vmem>>, vector<1x128xf32>
    %100 = vector.broadcast %99 : vector<1x128xf32> to vector<16x128xf32>
    %101 = arith.mulf %98, %100 : vector<16x128xf32>
    %c0_53 = arith.constant 0 : index
    %c0_54 = arith.constant 0 : index
    %102 = vector.load %arg9[%c0_53, %c0_54] : memref<1x128xf32, #tpu.memory_space<vmem>>, vector<1x128xf32>
    %103 = vector.broadcast %102 : vector<1x128xf32> to vector<16x128xf32>
    %104 = arith.addf %101, %103 : vector<16x128xf32>
    %cst_55 = arith.constant 0.000000e+00 : f32
    %105 = vector.broadcast %cst_55 : f32 to vector<16x128xf32>
    %106 = arith.cmpf ogt, %104, %105 : vector<16x128xf32>
    %cst_56 = arith.constant 2.000000e-01 : f32
    %107 = vector.broadcast %cst_56 : f32 to vector<16x128xf32>
    %108 = arith.mulf %107, %104 : vector<16x128xf32>
    %109 = arith.select %106, %104, %108 : vector<16x128xi1>, vector<16x128xf32>
    %110 = arith.truncf %109 : vector<16x128xf32> to vector<16x128xbf16>
    %cst_57 = arith.constant dense<0.000000e+00> : vector<16x128xf32>
    %111 = tpu.matmul %110, %9, %cst_57 {dimension_numbers = #tpu.dot_dimension_numbers<[1], [0], [0], [1], [0, 0, 1, 1], [], []>} : vector<16x128xbf16>, vector<128x128xbf16>, vector<16x128xf32> -> vector<16x128xf32>
    %c0_58 = arith.constant 0 : index
    %c0_59 = arith.constant 0 : index
    %112 = vector.load %arg11[%c0_58, %c0_59] : memref<1x128xf32, #tpu.memory_space<vmem>>, vector<1x128xf32>
    %113 = vector.broadcast %112 : vector<1x128xf32> to vector<16x128xf32>
    %114 = arith.addf %111, %113 : vector<16x128xf32>
    %c0_60 = arith.constant 0 : index
    %c0_61 = arith.constant 0 : index
    %115 = vector.load %arg12[%c0_60, %c0_61] : memref<1x128xf32, #tpu.memory_space<vmem>>, vector<1x128xf32>
    %116 = vector.broadcast %115 : vector<1x128xf32> to vector<16x128xf32>
    %117 = arith.mulf %114, %116 : vector<16x128xf32>
    %c0_62 = arith.constant 0 : index
    %c0_63 = arith.constant 0 : index
    %118 = vector.load %arg13[%c0_62, %c0_63] : memref<1x128xf32, #tpu.memory_space<vmem>>, vector<1x128xf32>
    %119 = vector.broadcast %118 : vector<1x128xf32> to vector<16x128xf32>
    %120 = arith.addf %117, %119 : vector<16x128xf32>
    %cst_64 = arith.constant 0.000000e+00 : f32
    %121 = vector.broadcast %cst_64 : f32 to vector<16x128xf32>
    %122 = arith.cmpf ogt, %120, %121 : vector<16x128xf32>
    %cst_65 = arith.constant 2.000000e-01 : f32
    %123 = vector.broadcast %cst_65 : f32 to vector<16x128xf32>
    %124 = arith.mulf %123, %120 : vector<16x128xf32>
    %125 = arith.select %122, %120, %124 : vector<16x128xi1>, vector<16x128xf32>
    %126 = arith.maximumf %90, %125 : vector<16x128xf32>
    %127 = vector.extract_strided_slice %1 {offsets = [0, 3], sizes = [16, 1], strides = [1, 1]} : vector<16x4xi32> to vector<16x1xi32>
    %128 = vector.broadcast %127 : vector<16x1xi32> to vector<16x16xi32>
    %129 = arith.cmpi eq, %17, %128 : vector<16x16xi32>
    %130 = arith.extui %129 : vector<16x16xi1> to vector<16x16xi32>
    %131 = arith.sitofp %130 : vector<16x16xi32> to vector<16x16xf32>
    %132 = arith.truncf %131 : vector<16x16xf32> to vector<16x16xbf16>
    %cst_66 = arith.constant dense<0.000000e+00> : vector<16x128xf32>
    %133 = tpu.matmul %132, %11, %cst_66 {dimension_numbers = #tpu.dot_dimension_numbers<[1], [0], [0], [1], [0, 0, 1, 1], [], []>} : vector<16x16xbf16>, vector<16x128xbf16>, vector<16x128xf32> -> vector<16x128xf32>
    %134 = arith.addf %133, %16 : vector<16x128xf32>
    %c0_67 = arith.constant 0 : index
    %c0_68 = arith.constant 0 : index
    %135 = vector.load %arg8[%c0_67, %c0_68] : memref<1x128xf32, #tpu.memory_space<vmem>>, vector<1x128xf32>
    %136 = vector.broadcast %135 : vector<1x128xf32> to vector<16x128xf32>
    %137 = arith.mulf %134, %136 : vector<16x128xf32>
    %c0_69 = arith.constant 0 : index
    %c0_70 = arith.constant 0 : index
    %138 = vector.load %arg9[%c0_69, %c0_70] : memref<1x128xf32, #tpu.memory_space<vmem>>, vector<1x128xf32>
    %139 = vector.broadcast %138 : vector<1x128xf32> to vector<16x128xf32>
    %140 = arith.addf %137, %139 : vector<16x128xf32>
    %cst_71 = arith.constant 0.000000e+00 : f32
    %141 = vector.broadcast %cst_71 : f32 to vector<16x128xf32>
    %142 = arith.cmpf ogt, %140, %141 : vector<16x128xf32>
    %cst_72 = arith.constant 2.000000e-01 : f32
    %143 = vector.broadcast %cst_72 : f32 to vector<16x128xf32>
    %144 = arith.mulf %143, %140 : vector<16x128xf32>
    %145 = arith.select %142, %140, %144 : vector<16x128xi1>, vector<16x128xf32>
    %146 = arith.truncf %145 : vector<16x128xf32> to vector<16x128xbf16>
    %cst_73 = arith.constant dense<0.000000e+00> : vector<16x128xf32>
    %147 = tpu.matmul %146, %9, %cst_73 {dimension_numbers = #tpu.dot_dimension_numbers<[1], [0], [0], [1], [0, 0, 1, 1], [], []>} : vector<16x128xbf16>, vector<128x128xbf16>, vector<16x128xf32> -> vector<16x128xf32>
    %c0_74 = arith.constant 0 : index
    %c0_75 = arith.constant 0 : index
    %148 = vector.load %arg11[%c0_74, %c0_75] : memref<1x128xf32, #tpu.memory_space<vmem>>, vector<1x128xf32>
    %149 = vector.broadcast %148 : vector<1x128xf32> to vector<16x128xf32>
    %150 = arith.addf %147, %149 : vector<16x128xf32>
    %c0_76 = arith.constant 0 : index
    %c0_77 = arith.constant 0 : index
    %151 = vector.load %arg12[%c0_76, %c0_77] : memref<1x128xf32, #tpu.memory_space<vmem>>, vector<1x128xf32>
    %152 = vector.broadcast %151 : vector<1x128xf32> to vector<16x128xf32>
    %153 = arith.mulf %150, %152 : vector<16x128xf32>
    %c0_78 = arith.constant 0 : index
    %c0_79 = arith.constant 0 : index
    %154 = vector.load %arg13[%c0_78, %c0_79] : memref<1x128xf32, #tpu.memory_space<vmem>>, vector<1x128xf32>
    %155 = vector.broadcast %154 : vector<1x128xf32> to vector<16x128xf32>
    %156 = arith.addf %153, %155 : vector<16x128xf32>
    %cst_80 = arith.constant 0.000000e+00 : f32
    %157 = vector.broadcast %cst_80 : f32 to vector<16x128xf32>
    %158 = arith.cmpf ogt, %156, %157 : vector<16x128xf32>
    %cst_81 = arith.constant 2.000000e-01 : f32
    %159 = vector.broadcast %cst_81 : f32 to vector<16x128xf32>
    %160 = arith.mulf %159, %156 : vector<16x128xf32>
    %161 = arith.select %158, %156, %160 : vector<16x128xi1>, vector<16x128xf32>
    %162 = arith.maximumf %126, %161 : vector<16x128xf32>
    %163 = vector.shape_cast %162 : vector<16x128xf32> to vector<1x16x128xf32>
    %c0_82 = arith.constant 0 : index
    %c0_83 = arith.constant 0 : index
    %c0_84 = arith.constant 0 : index
    %164 = vector.load %arg14[%c0_82, %c0_83, %c0_84] : memref<1x16x128xf32, #tpu.memory_space<vmem>>, vector<1x16x128xf32>
    tpu.vector_store %arg14[%c0_82, %c0_83, %c0_84], %163 {strides = array<i32>} : memref<1x16x128xf32, #tpu.memory_space<vmem>>, vector<1x16x128xf32>,
    return
  }
  func.func @transform_0(%arg0: i32, %arg1: i32) -> (i32, i32, i32) {
    %c0_i32 = arith.constant 0 : i32
    %c0_i32_0 = arith.constant 0 : i32
    return %arg0, %arg1, %c0_i32 : i32, i32, i32
  }
  func.func @transform_1(%arg0: i32, %arg1: i32) -> (i32, i32, i32) {
    %c0_i32 = arith.constant 0 : i32
    %c0_i32_0 = arith.constant 0 : i32
    %c0_i32_1 = arith.constant 0 : i32
    return %arg0, %c0_i32, %c0_i32_0 : i32, i32, i32
  }
  func.func @transform_2(%arg0: i32, %arg1: i32) -> (i32, i32, i32) {
    %c0_i32 = arith.constant 0 : i32
    %c0_i32_0 = arith.constant 0 : i32
    return %arg0, %arg1, %c0_i32 : i32, i32, i32
  }
  func.func @transform_3(%arg0: i32, %arg1: i32) -> (i32, i32) {
    %c0_i32 = arith.constant 0 : i32
    %c0_i32_0 = arith.constant 0 : i32
    %c0_i32_1 = arith.constant 0 : i32
    return %c0_i32, %c0_i32_0 : i32, i32
  }
  func.func @transform_4(%arg0: i32, %arg1: i32) -> (i32, i32) {
    %c0_i32 = arith.constant 0 : i32
    %c0_i32_0 = arith.constant 0 : i32
    %c0_i32_1 = arith.constant 0 : i32
    return %c0_i32, %c0_i32_0 : i32, i32
  }
  func.func @transform_5(%arg0: i32, %arg1: i32) -> (i32, i32) {
    %c0_i32 = arith.constant 0 : i32
    %c0_i32_0 = arith.constant 0 : i32
    %c0_i32_1 = arith.constant 0 : i32
    return %c0_i32, %c0_i32_0 : i32, i32
  }
  func.func @transform_6(%arg0: i32, %arg1: i32) -> (i32, i32) {
    %c0_i32 = arith.constant 0 : i32
    %c0_i32_0 = arith.constant 0 : i32
    %c0_i32_1 = arith.constant 0 : i32
    return %c0_i32, %c0_i32_0 : i32, i32
  }
  func.func @transform_7(%arg0: i32, %arg1: i32) -> (i32, i32) {
    %c0_i32 = arith.constant 0 : i32
    %c0_i32_0 = arith.constant 0 : i32
    %c0_i32_1 = arith.constant 0 : i32
    return %c0_i32, %c0_i32_0 : i32, i32
  }
  func.func @transform_8(%arg0: i32, %arg1: i32) -> (i32, i32) {
    %c0_i32 = arith.constant 0 : i32
    %c0_i32_0 = arith.constant 0 : i32
    %c0_i32_1 = arith.constant 0 : i32
    return %c0_i32, %c0_i32_0 : i32, i32
  }
  func.func @transform_9(%arg0: i32, %arg1: i32) -> (i32, i32) {
    %c0_i32 = arith.constant 0 : i32
    %c0_i32_0 = arith.constant 0 : i32
    %c0_i32_1 = arith.constant 0 : i32
    return %c0_i32, %c0_i32_0 : i32, i32
  }
  func.func @transform_10(%arg0: i32, %arg1: i32) -> (i32, i32) {
    %c0_i32 = arith.constant 0 : i32
    %c0_i32_0 = arith.constant 0 : i32
    %c0_i32_1 = arith.constant 0 : i32
    return %c0_i32, %c0_i32_0 : i32, i32
  }
  func.func @transform_11(%arg0: i32, %arg1: i32) -> (i32, i32) {
    %c0_i32 = arith.constant 0 : i32
    %c0_i32_0 = arith.constant 0 : i32
    %c0_i32_1 = arith.constant 0 : i32
    return %c0_i32, %c0_i32_0 : i32, i32
  }
  func.func @transform_12(%arg0: i32, %arg1: i32) -> (i32, i32, i32) {
    %c0_i32 = arith.constant 0 : i32
    %c0_i32_0 = arith.constant 0 : i32
    return %arg0, %arg1, %c0_i32 : i32, i32, i32
  }
}

module attributes {stable_mosaic.version = 11 : i64} {
  func.func @_point_kernel(%arg0: i32, %arg1: i32, %arg2: memref<1x16x128xf32, #tpu.memory_space<vmem>>, %arg3: memref<1x16x128xf32, #tpu.memory_space<vmem>>, %arg4: memref<128x128xbf16, #tpu.memory_space<vmem>>, %arg5: memref<128x128xbf16, #tpu.memory_space<vmem>>, %arg6: memref<1x128xf32, #tpu.memory_space<vmem>>, %arg7: memref<1x128xf32, #tpu.memory_space<vmem>>, %arg8: memref<1x128xf32, #tpu.memory_space<vmem>>, %arg9: memref<128x128xbf16, #tpu.memory_space<vmem>>, %arg10: memref<1x128xf32, #tpu.memory_space<vmem>>, %arg11: memref<1x128xf32, #tpu.memory_space<vmem>>, %arg12: memref<1x128xf32, #tpu.memory_space<vmem>>, %arg13: memref<1x1x2x128xf32, #tpu.memory_space<vmem>>) attributes {dimension_semantics = [#tpu.dimension_semantics<parallel>, #tpu.dimension_semantics<parallel>], iteration_bounds = array<i64: 2, 1>, scalar_prefetch = 0 : i64, scratch_operands = 0 : i64, tpu.core_type = #tpu.core_type<tc>, window_params = [{transform_indices = @transform_0, window_bounds = array<i64: 1, 16, 128>}, {transform_indices = @transform_1, window_bounds = array<i64: 1, 16, 128>}, {pipeline_mode = #tpu.pipeline_mode<synchronous>, transform_indices = @transform_2, window_bounds = array<i64: 128, 128>}, {pipeline_mode = #tpu.pipeline_mode<synchronous>, transform_indices = @transform_3, window_bounds = array<i64: 128, 128>}, {pipeline_mode = #tpu.pipeline_mode<synchronous>, transform_indices = @transform_4, window_bounds = array<i64: 1, 128>}, {pipeline_mode = #tpu.pipeline_mode<synchronous>, transform_indices = @transform_5, window_bounds = array<i64: 1, 128>}, {pipeline_mode = #tpu.pipeline_mode<synchronous>, transform_indices = @transform_6, window_bounds = array<i64: 1, 128>}, {pipeline_mode = #tpu.pipeline_mode<synchronous>, transform_indices = @transform_7, window_bounds = array<i64: 128, 128>}, {pipeline_mode = #tpu.pipeline_mode<synchronous>, transform_indices = @transform_8, window_bounds = array<i64: 1, 128>}, {pipeline_mode = #tpu.pipeline_mode<synchronous>, transform_indices = @transform_9, window_bounds = array<i64: 1, 128>}, {pipeline_mode = #tpu.pipeline_mode<synchronous>, transform_indices = @transform_10, window_bounds = array<i64: 1, 128>}, {transform_indices = @transform_11, window_bounds = array<i64: 1, 1, 2, 128>}]} {
    %c0 = arith.constant 0 : index
    %c0_0 = arith.constant 0 : index
    %c0_1 = arith.constant 0 : index
    %0 = vector.load %arg2[%c0, %c0_0, %c0_1] : memref<1x16x128xf32, #tpu.memory_space<vmem>>, vector<1x16x128xf32>
    %1 = vector.shape_cast %0 : vector<1x16x128xf32> to vector<16x128xf32>
    %2 = arith.truncf %1 : vector<16x128xf32> to vector<16x128xbf16>
    %c0_2 = arith.constant 0 : index
    %c0_3 = arith.constant 0 : index
    %c0_4 = arith.constant 0 : index
    %3 = vector.load %arg3[%c0_2, %c0_3, %c0_4] : memref<1x16x128xf32, #tpu.memory_space<vmem>>, vector<1x16x128xf32>
    %4 = vector.shape_cast %3 : vector<1x16x128xf32> to vector<16x128xf32>
    %5 = arith.truncf %4 : vector<16x128xf32> to vector<16x128xbf16>
    %c0_5 = arith.constant 0 : index
    %c0_6 = arith.constant 0 : index
    %6 = vector.load %arg4[%c0_5, %c0_6] : memref<128x128xbf16, #tpu.memory_space<vmem>>, vector<128x128xbf16>
    %cst = arith.constant dense<0.000000e+00> : vector<16x128xf32>
    %7 = tpu.matmul %2, %6, %cst {dimension_numbers = #tpu.dot_dimension_numbers<[1], [0], [0], [1], [0, 0, 1, 1], [], []>} : vector<16x128xbf16>, vector<128x128xbf16>, vector<16x128xf32> -> vector<16x128xf32>
    %c0_7 = arith.constant 0 : index
    %c0_8 = arith.constant 0 : index
    %8 = vector.load %arg5[%c0_7, %c0_8] : memref<128x128xbf16, #tpu.memory_space<vmem>>, vector<128x128xbf16>
    %cst_9 = arith.constant dense<0.000000e+00> : vector<16x128xf32>
    %9 = tpu.matmul %5, %8, %cst_9 {dimension_numbers = #tpu.dot_dimension_numbers<[1], [0], [0], [1], [0, 0, 1, 1], [], []>} : vector<16x128xbf16>, vector<128x128xbf16>, vector<16x128xf32> -> vector<16x128xf32>
    %10 = arith.addf %7, %9 : vector<16x128xf32>
    %c0_10 = arith.constant 0 : index
    %c0_11 = arith.constant 0 : index
    %11 = vector.load %arg6[%c0_10, %c0_11] : memref<1x128xf32, #tpu.memory_space<vmem>>, vector<1x128xf32>
    %12 = vector.broadcast %11 : vector<1x128xf32> to vector<16x128xf32>
    %13 = arith.addf %10, %12 : vector<16x128xf32>
    %cst_12 = arith.constant dense<0.000000e+00> : vector<128xf32>
    %14 = vector.multi_reduction <add>, %13, %cst_12 [0] : vector<16x128xf32> to vector<128xf32>
    %15 = vector.shape_cast %14 : vector<128xf32> to vector<1x128xf32>
    %16 = arith.mulf %13, %13 : vector<16x128xf32>
    %cst_13 = arith.constant dense<0.000000e+00> : vector<128xf32>
    %17 = vector.multi_reduction <add>, %16, %cst_13 [0] : vector<16x128xf32> to vector<128xf32>
    %18 = vector.shape_cast %17 : vector<128xf32> to vector<1x128xf32>
    %19 = tpu.concatenate %15, %18 in 0 : vector<1x128xf32>, vector<1x128xf32> -> vector<2x128xf32>
    %20 = vector.shape_cast %19 : vector<2x128xf32> to vector<1x1x2x128xf32>
    %c0_14 = arith.constant 0 : index
    %c0_15 = arith.constant 0 : index
    %c0_16 = arith.constant 0 : index
    %c0_17 = arith.constant 0 : index
    %21 = vector.load %arg13[%c0_14, %c0_15, %c0_16, %c0_17] : memref<1x1x2x128xf32, #tpu.memory_space<vmem>>, vector<1x1x2x128xf32>
    tpu.vector_store %arg13[%c0_14, %c0_15, %c0_16, %c0_17], %20 {strides = array<i32>} : memref<1x1x2x128xf32, #tpu.memory_space<vmem>>, vector<1x1x2x128xf32>,
    return
  }
  func.func @transform_0(%arg0: i32, %arg1: i32) -> (i32, i32, i32) {
    %c0_i32 = arith.constant 0 : i32
    %c0_i32_0 = arith.constant 0 : i32
    return %arg0, %arg1, %c0_i32 : i32, i32, i32
  }
  func.func @transform_1(%arg0: i32, %arg1: i32) -> (i32, i32, i32) {
    %c0_i32 = arith.constant 0 : i32
    %c0_i32_0 = arith.constant 0 : i32
    return %arg0, %arg1, %c0_i32 : i32, i32, i32
  }
  func.func @transform_2(%arg0: i32, %arg1: i32) -> (i32, i32) {
    %c0_i32 = arith.constant 0 : i32
    %c0_i32_0 = arith.constant 0 : i32
    %c0_i32_1 = arith.constant 0 : i32
    return %c0_i32, %c0_i32_0 : i32, i32
  }
  func.func @transform_3(%arg0: i32, %arg1: i32) -> (i32, i32) {
    %c0_i32 = arith.constant 0 : i32
    %c0_i32_0 = arith.constant 0 : i32
    %c0_i32_1 = arith.constant 0 : i32
    return %c0_i32, %c0_i32_0 : i32, i32
  }
  func.func @transform_4(%arg0: i32, %arg1: i32) -> (i32, i32) {
    %c0_i32 = arith.constant 0 : i32
    %c0_i32_0 = arith.constant 0 : i32
    %c0_i32_1 = arith.constant 0 : i32
    return %c0_i32, %c0_i32_0 : i32, i32
  }
  func.func @transform_5(%arg0: i32, %arg1: i32) -> (i32, i32) {
    %c0_i32 = arith.constant 0 : i32
    %c0_i32_0 = arith.constant 0 : i32
    %c0_i32_1 = arith.constant 0 : i32
    return %c0_i32, %c0_i32_0 : i32, i32
  }
  func.func @transform_6(%arg0: i32, %arg1: i32) -> (i32, i32) {
    %c0_i32 = arith.constant 0 : i32
    %c0_i32_0 = arith.constant 0 : i32
    %c0_i32_1 = arith.constant 0 : i32
    return %c0_i32, %c0_i32_0 : i32, i32
  }
  func.func @transform_7(%arg0: i32, %arg1: i32) -> (i32, i32) {
    %c0_i32 = arith.constant 0 : i32
    %c0_i32_0 = arith.constant 0 : i32
    %c0_i32_1 = arith.constant 0 : i32
    return %c0_i32, %c0_i32_0 : i32, i32
  }
  func.func @transform_8(%arg0: i32, %arg1: i32) -> (i32, i32) {
    %c0_i32 = arith.constant 0 : i32
    %c0_i32_0 = arith.constant 0 : i32
    %c0_i32_1 = arith.constant 0 : i32
    return %c0_i32, %c0_i32_0 : i32, i32
  }
  func.func @transform_9(%arg0: i32, %arg1: i32) -> (i32, i32) {
    %c0_i32 = arith.constant 0 : i32
    %c0_i32_0 = arith.constant 0 : i32
    %c0_i32_1 = arith.constant 0 : i32
    return %c0_i32, %c0_i32_0 : i32, i32
  }
  func.func @transform_10(%arg0: i32, %arg1: i32) -> (i32, i32) {
    %c0_i32 = arith.constant 0 : i32
    %c0_i32_0 = arith.constant 0 : i32
    %c0_i32_1 = arith.constant 0 : i32
    return %c0_i32, %c0_i32_0 : i32, i32
  }
  func.func @transform_11(%arg0: i32, %arg1: i32) -> (i32, i32, i32, i32) {
    %c0_i32 = arith.constant 0 : i32
    %c0_i32_0 = arith.constant 0 : i32
    %c0_i32_1 = arith.constant 0 : i32
    return %arg0, %arg1, %c0_i32, %c0_i32_0 : i32, i32, i32, i32
  }
}

module attributes {stable_mosaic.version = 11 : i64} {
  func.func @_point_kernel(%arg0: i32, %arg1: i32, %arg2: memref<1x16x128xf32, #tpu.memory_space<vmem>>, %arg3: memref<1x16x128xf32, #tpu.memory_space<vmem>>, %arg4: memref<128x128xbf16, #tpu.memory_space<vmem>>, %arg5: memref<128x128xbf16, #tpu.memory_space<vmem>>, %arg6: memref<1x128xf32, #tpu.memory_space<vmem>>, %arg7: memref<1x128xf32, #tpu.memory_space<vmem>>, %arg8: memref<1x128xf32, #tpu.memory_space<vmem>>, %arg9: memref<128x128xbf16, #tpu.memory_space<vmem>>, %arg10: memref<1x128xf32, #tpu.memory_space<vmem>>, %arg11: memref<1x128xf32, #tpu.memory_space<vmem>>, %arg12: memref<1x128xf32, #tpu.memory_space<vmem>>, %arg13: memref<1x1x2x128xf32, #tpu.memory_space<vmem>>) attributes {dimension_semantics = [#tpu.dimension_semantics<parallel>, #tpu.dimension_semantics<parallel>], iteration_bounds = array<i64: 2, 1>, scalar_prefetch = 0 : i64, scratch_operands = 0 : i64, tpu.core_type = #tpu.core_type<tc>, window_params = [{transform_indices = @transform_0, window_bounds = array<i64: 1, 16, 128>}, {transform_indices = @transform_1, window_bounds = array<i64: 1, 16, 128>}, {pipeline_mode = #tpu.pipeline_mode<synchronous>, transform_indices = @transform_2, window_bounds = array<i64: 128, 128>}, {pipeline_mode = #tpu.pipeline_mode<synchronous>, transform_indices = @transform_3, window_bounds = array<i64: 128, 128>}, {pipeline_mode = #tpu.pipeline_mode<synchronous>, transform_indices = @transform_4, window_bounds = array<i64: 1, 128>}, {pipeline_mode = #tpu.pipeline_mode<synchronous>, transform_indices = @transform_5, window_bounds = array<i64: 1, 128>}, {pipeline_mode = #tpu.pipeline_mode<synchronous>, transform_indices = @transform_6, window_bounds = array<i64: 1, 128>}, {pipeline_mode = #tpu.pipeline_mode<synchronous>, transform_indices = @transform_7, window_bounds = array<i64: 128, 128>}, {pipeline_mode = #tpu.pipeline_mode<synchronous>, transform_indices = @transform_8, window_bounds = array<i64: 1, 128>}, {pipeline_mode = #tpu.pipeline_mode<synchronous>, transform_indices = @transform_9, window_bounds = array<i64: 1, 128>}, {pipeline_mode = #tpu.pipeline_mode<synchronous>, transform_indices = @transform_10, window_bounds = array<i64: 1, 128>}, {transform_indices = @transform_11, window_bounds = array<i64: 1, 1, 2, 128>}]} {
    %c0 = arith.constant 0 : index
    %c0_0 = arith.constant 0 : index
    %c0_1 = arith.constant 0 : index
    %0 = vector.load %arg2[%c0, %c0_0, %c0_1] : memref<1x16x128xf32, #tpu.memory_space<vmem>>, vector<1x16x128xf32>
    %1 = vector.shape_cast %0 : vector<1x16x128xf32> to vector<16x128xf32>
    %2 = arith.truncf %1 : vector<16x128xf32> to vector<16x128xbf16>
    %c0_2 = arith.constant 0 : index
    %c0_3 = arith.constant 0 : index
    %c0_4 = arith.constant 0 : index
    %3 = vector.load %arg3[%c0_2, %c0_3, %c0_4] : memref<1x16x128xf32, #tpu.memory_space<vmem>>, vector<1x16x128xf32>
    %4 = vector.shape_cast %3 : vector<1x16x128xf32> to vector<16x128xf32>
    %5 = arith.truncf %4 : vector<16x128xf32> to vector<16x128xbf16>
    %c0_5 = arith.constant 0 : index
    %c0_6 = arith.constant 0 : index
    %6 = vector.load %arg4[%c0_5, %c0_6] : memref<128x128xbf16, #tpu.memory_space<vmem>>, vector<128x128xbf16>
    %cst = arith.constant dense<0.000000e+00> : vector<16x128xf32>
    %7 = tpu.matmul %2, %6, %cst {dimension_numbers = #tpu.dot_dimension_numbers<[1], [0], [0], [1], [0, 0, 1, 1], [], []>} : vector<16x128xbf16>, vector<128x128xbf16>, vector<16x128xf32> -> vector<16x128xf32>
    %c0_7 = arith.constant 0 : index
    %c0_8 = arith.constant 0 : index
    %8 = vector.load %arg5[%c0_7, %c0_8] : memref<128x128xbf16, #tpu.memory_space<vmem>>, vector<128x128xbf16>
    %cst_9 = arith.constant dense<0.000000e+00> : vector<16x128xf32>
    %9 = tpu.matmul %5, %8, %cst_9 {dimension_numbers = #tpu.dot_dimension_numbers<[1], [0], [0], [1], [0, 0, 1, 1], [], []>} : vector<16x128xbf16>, vector<128x128xbf16>, vector<16x128xf32> -> vector<16x128xf32>
    %10 = arith.addf %7, %9 : vector<16x128xf32>
    %c0_10 = arith.constant 0 : index
    %c0_11 = arith.constant 0 : index
    %11 = vector.load %arg6[%c0_10, %c0_11] : memref<1x128xf32, #tpu.memory_space<vmem>>, vector<1x128xf32>
    %12 = vector.broadcast %11 : vector<1x128xf32> to vector<16x128xf32>
    %13 = arith.addf %10, %12 : vector<16x128xf32>
    %c0_12 = arith.constant 0 : index
    %c0_13 = arith.constant 0 : index
    %14 = vector.load %arg7[%c0_12, %c0_13] : memref<1x128xf32, #tpu.memory_space<vmem>>, vector<1x128xf32>
    %15 = vector.broadcast %14 : vector<1x128xf32> to vector<16x128xf32>
    %16 = arith.mulf %13, %15 : vector<16x128xf32>
    %c0_14 = arith.constant 0 : index
    %c0_15 = arith.constant 0 : index
    %17 = vector.load %arg8[%c0_14, %c0_15] : memref<1x128xf32, #tpu.memory_space<vmem>>, vector<1x128xf32>
    %18 = vector.broadcast %17 : vector<1x128xf32> to vector<16x128xf32>
    %19 = arith.addf %16, %18 : vector<16x128xf32>
    %cst_16 = arith.constant 0.000000e+00 : f32
    %20 = vector.broadcast %cst_16 : f32 to vector<16x128xf32>
    %21 = arith.cmpf ogt, %19, %20 : vector<16x128xf32>
    %cst_17 = arith.constant 2.000000e-01 : f32
    %22 = vector.broadcast %cst_17 : f32 to vector<16x128xf32>
    %23 = arith.mulf %22, %19 : vector<16x128xf32>
    %24 = arith.select %21, %19, %23 : vector<16x128xi1>, vector<16x128xf32>
    %25 = arith.truncf %24 : vector<16x128xf32> to vector<16x128xbf16>
    %c0_18 = arith.constant 0 : index
    %c0_19 = arith.constant 0 : index
    %26 = vector.load %arg9[%c0_18, %c0_19] : memref<128x128xbf16, #tpu.memory_space<vmem>>, vector<128x128xbf16>
    %cst_20 = arith.constant dense<0.000000e+00> : vector<16x128xf32>
    %27 = tpu.matmul %25, %26, %cst_20 {dimension_numbers = #tpu.dot_dimension_numbers<[1], [0], [0], [1], [0, 0, 1, 1], [], []>} : vector<16x128xbf16>, vector<128x128xbf16>, vector<16x128xf32> -> vector<16x128xf32>
    %c0_21 = arith.constant 0 : index
    %c0_22 = arith.constant 0 : index
    %28 = vector.load %arg10[%c0_21, %c0_22] : memref<1x128xf32, #tpu.memory_space<vmem>>, vector<1x128xf32>
    %29 = vector.broadcast %28 : vector<1x128xf32> to vector<16x128xf32>
    %30 = arith.addf %27, %29 : vector<16x128xf32>
    %cst_23 = arith.constant dense<0.000000e+00> : vector<128xf32>
    %31 = vector.multi_reduction <add>, %30, %cst_23 [0] : vector<16x128xf32> to vector<128xf32>
    %32 = vector.shape_cast %31 : vector<128xf32> to vector<1x128xf32>
    %33 = arith.mulf %30, %30 : vector<16x128xf32>
    %cst_24 = arith.constant dense<0.000000e+00> : vector<128xf32>
    %34 = vector.multi_reduction <add>, %33, %cst_24 [0] : vector<16x128xf32> to vector<128xf32>
    %35 = vector.shape_cast %34 : vector<128xf32> to vector<1x128xf32>
    %36 = tpu.concatenate %32, %35 in 0 : vector<1x128xf32>, vector<1x128xf32> -> vector<2x128xf32>
    %37 = vector.shape_cast %36 : vector<2x128xf32> to vector<1x1x2x128xf32>
    %c0_25 = arith.constant 0 : index
    %c0_26 = arith.constant 0 : index
    %c0_27 = arith.constant 0 : index
    %c0_28 = arith.constant 0 : index
    %38 = vector.load %arg13[%c0_25, %c0_26, %c0_27, %c0_28] : memref<1x1x2x128xf32, #tpu.memory_space<vmem>>, vector<1x1x2x128xf32>
    tpu.vector_store %arg13[%c0_25, %c0_26, %c0_27, %c0_28], %37 {strides = array<i32>} : memref<1x1x2x128xf32, #tpu.memory_space<vmem>>, vector<1x1x2x128xf32>,
    return
  }
  func.func @transform_0(%arg0: i32, %arg1: i32) -> (i32, i32, i32) {
    %c0_i32 = arith.constant 0 : i32
    %c0_i32_0 = arith.constant 0 : i32
    return %arg0, %arg1, %c0_i32 : i32, i32, i32
  }
  func.func @transform_1(%arg0: i32, %arg1: i32) -> (i32, i32, i32) {
    %c0_i32 = arith.constant 0 : i32
    %c0_i32_0 = arith.constant 0 : i32
    return %arg0, %arg1, %c0_i32 : i32, i32, i32
  }
  func.func @transform_2(%arg0: i32, %arg1: i32) -> (i32, i32) {
    %c0_i32 = arith.constant 0 : i32
    %c0_i32_0 = arith.constant 0 : i32
    %c0_i32_1 = arith.constant 0 : i32
    return %c0_i32, %c0_i32_0 : i32, i32
  }
  func.func @transform_3(%arg0: i32, %arg1: i32) -> (i32, i32) {
    %c0_i32 = arith.constant 0 : i32
    %c0_i32_0 = arith.constant 0 : i32
    %c0_i32_1 = arith.constant 0 : i32
    return %c0_i32, %c0_i32_0 : i32, i32
  }
  func.func @transform_4(%arg0: i32, %arg1: i32) -> (i32, i32) {
    %c0_i32 = arith.constant 0 : i32
    %c0_i32_0 = arith.constant 0 : i32
    %c0_i32_1 = arith.constant 0 : i32
    return %c0_i32, %c0_i32_0 : i32, i32
  }
  func.func @transform_5(%arg0: i32, %arg1: i32) -> (i32, i32) {
    %c0_i32 = arith.constant 0 : i32
    %c0_i32_0 = arith.constant 0 : i32
    %c0_i32_1 = arith.constant 0 : i32
    return %c0_i32, %c0_i32_0 : i32, i32
  }
  func.func @transform_6(%arg0: i32, %arg1: i32) -> (i32, i32) {
    %c0_i32 = arith.constant 0 : i32
    %c0_i32_0 = arith.constant 0 : i32
    %c0_i32_1 = arith.constant 0 : i32
    return %c0_i32, %c0_i32_0 : i32, i32
  }
  func.func @transform_7(%arg0: i32, %arg1: i32) -> (i32, i32) {
    %c0_i32 = arith.constant 0 : i32
    %c0_i32_0 = arith.constant 0 : i32
    %c0_i32_1 = arith.constant 0 : i32
    return %c0_i32, %c0_i32_0 : i32, i32
  }
  func.func @transform_8(%arg0: i32, %arg1: i32) -> (i32, i32) {
    %c0_i32 = arith.constant 0 : i32
    %c0_i32_0 = arith.constant 0 : i32
    %c0_i32_1 = arith.constant 0 : i32
    return %c0_i32, %c0_i32_0 : i32, i32
  }
  func.func @transform_9(%arg0: i32, %arg1: i32) -> (i32, i32) {
    %c0_i32 = arith.constant 0 : i32
    %c0_i32_0 = arith.constant 0 : i32
    %c0_i32_1 = arith.constant 0 : i32
    return %c0_i32, %c0_i32_0 : i32, i32
  }
  func.func @transform_10(%arg0: i32, %arg1: i32) -> (i32, i32) {
    %c0_i32 = arith.constant 0 : i32
    %c0_i32_0 = arith.constant 0 : i32
    %c0_i32_1 = arith.constant 0 : i32
    return %c0_i32, %c0_i32_0 : i32, i32
  }
  func.func @transform_11(%arg0: i32, %arg1: i32) -> (i32, i32, i32, i32) {
    %c0_i32 = arith.constant 0 : i32
    %c0_i32_0 = arith.constant 0 : i32
    %c0_i32_1 = arith.constant 0 : i32
    return %arg0, %arg1, %c0_i32, %c0_i32_0 : i32, i32, i32, i32
  }
}

module attributes {stable_mosaic.version = 11 : i64} {
  func.func @_point_kernel(%arg0: i32, %arg1: i32, %arg2: memref<1x16x128xf32, #tpu.memory_space<vmem>>, %arg3: memref<1x16x128xf32, #tpu.memory_space<vmem>>, %arg4: memref<128x128xbf16, #tpu.memory_space<vmem>>, %arg5: memref<128x128xbf16, #tpu.memory_space<vmem>>, %arg6: memref<1x128xf32, #tpu.memory_space<vmem>>, %arg7: memref<1x128xf32, #tpu.memory_space<vmem>>, %arg8: memref<1x128xf32, #tpu.memory_space<vmem>>, %arg9: memref<128x128xbf16, #tpu.memory_space<vmem>>, %arg10: memref<1x128xf32, #tpu.memory_space<vmem>>, %arg11: memref<1x128xf32, #tpu.memory_space<vmem>>, %arg12: memref<1x128xf32, #tpu.memory_space<vmem>>, %arg13: memref<1x16x128xf32, #tpu.memory_space<vmem>>) attributes {dimension_semantics = [#tpu.dimension_semantics<parallel>, #tpu.dimension_semantics<parallel>], iteration_bounds = array<i64: 2, 1>, scalar_prefetch = 0 : i64, scratch_operands = 0 : i64, tpu.core_type = #tpu.core_type<tc>, window_params = [{transform_indices = @transform_0, window_bounds = array<i64: 1, 16, 128>}, {transform_indices = @transform_1, window_bounds = array<i64: 1, 16, 128>}, {pipeline_mode = #tpu.pipeline_mode<synchronous>, transform_indices = @transform_2, window_bounds = array<i64: 128, 128>}, {pipeline_mode = #tpu.pipeline_mode<synchronous>, transform_indices = @transform_3, window_bounds = array<i64: 128, 128>}, {pipeline_mode = #tpu.pipeline_mode<synchronous>, transform_indices = @transform_4, window_bounds = array<i64: 1, 128>}, {pipeline_mode = #tpu.pipeline_mode<synchronous>, transform_indices = @transform_5, window_bounds = array<i64: 1, 128>}, {pipeline_mode = #tpu.pipeline_mode<synchronous>, transform_indices = @transform_6, window_bounds = array<i64: 1, 128>}, {pipeline_mode = #tpu.pipeline_mode<synchronous>, transform_indices = @transform_7, window_bounds = array<i64: 128, 128>}, {pipeline_mode = #tpu.pipeline_mode<synchronous>, transform_indices = @transform_8, window_bounds = array<i64: 1, 128>}, {pipeline_mode = #tpu.pipeline_mode<synchronous>, transform_indices = @transform_9, window_bounds = array<i64: 1, 128>}, {pipeline_mode = #tpu.pipeline_mode<synchronous>, transform_indices = @transform_10, window_bounds = array<i64: 1, 128>}, {transform_indices = @transform_11, window_bounds = array<i64: 1, 16, 128>}]} {
    %c0 = arith.constant 0 : index
    %c0_0 = arith.constant 0 : index
    %c0_1 = arith.constant 0 : index
    %0 = vector.load %arg2[%c0, %c0_0, %c0_1] : memref<1x16x128xf32, #tpu.memory_space<vmem>>, vector<1x16x128xf32>
    %1 = vector.shape_cast %0 : vector<1x16x128xf32> to vector<16x128xf32>
    %2 = arith.truncf %1 : vector<16x128xf32> to vector<16x128xbf16>
    %c0_2 = arith.constant 0 : index
    %c0_3 = arith.constant 0 : index
    %c0_4 = arith.constant 0 : index
    %3 = vector.load %arg3[%c0_2, %c0_3, %c0_4] : memref<1x16x128xf32, #tpu.memory_space<vmem>>, vector<1x16x128xf32>
    %4 = vector.shape_cast %3 : vector<1x16x128xf32> to vector<16x128xf32>
    %5 = arith.truncf %4 : vector<16x128xf32> to vector<16x128xbf16>
    %c0_5 = arith.constant 0 : index
    %c0_6 = arith.constant 0 : index
    %6 = vector.load %arg4[%c0_5, %c0_6] : memref<128x128xbf16, #tpu.memory_space<vmem>>, vector<128x128xbf16>
    %cst = arith.constant dense<0.000000e+00> : vector<16x128xf32>
    %7 = tpu.matmul %2, %6, %cst {dimension_numbers = #tpu.dot_dimension_numbers<[1], [0], [0], [1], [0, 0, 1, 1], [], []>} : vector<16x128xbf16>, vector<128x128xbf16>, vector<16x128xf32> -> vector<16x128xf32>
    %c0_7 = arith.constant 0 : index
    %c0_8 = arith.constant 0 : index
    %8 = vector.load %arg5[%c0_7, %c0_8] : memref<128x128xbf16, #tpu.memory_space<vmem>>, vector<128x128xbf16>
    %cst_9 = arith.constant dense<0.000000e+00> : vector<16x128xf32>
    %9 = tpu.matmul %5, %8, %cst_9 {dimension_numbers = #tpu.dot_dimension_numbers<[1], [0], [0], [1], [0, 0, 1, 1], [], []>} : vector<16x128xbf16>, vector<128x128xbf16>, vector<16x128xf32> -> vector<16x128xf32>
    %10 = arith.addf %7, %9 : vector<16x128xf32>
    %c0_10 = arith.constant 0 : index
    %c0_11 = arith.constant 0 : index
    %11 = vector.load %arg6[%c0_10, %c0_11] : memref<1x128xf32, #tpu.memory_space<vmem>>, vector<1x128xf32>
    %12 = vector.broadcast %11 : vector<1x128xf32> to vector<16x128xf32>
    %13 = arith.addf %10, %12 : vector<16x128xf32>
    %c0_12 = arith.constant 0 : index
    %c0_13 = arith.constant 0 : index
    %14 = vector.load %arg7[%c0_12, %c0_13] : memref<1x128xf32, #tpu.memory_space<vmem>>, vector<1x128xf32>
    %15 = vector.broadcast %14 : vector<1x128xf32> to vector<16x128xf32>
    %16 = arith.mulf %13, %15 : vector<16x128xf32>
    %c0_14 = arith.constant 0 : index
    %c0_15 = arith.constant 0 : index
    %17 = vector.load %arg8[%c0_14, %c0_15] : memref<1x128xf32, #tpu.memory_space<vmem>>, vector<1x128xf32>
    %18 = vector.broadcast %17 : vector<1x128xf32> to vector<16x128xf32>
    %19 = arith.addf %16, %18 : vector<16x128xf32>
    %cst_16 = arith.constant 0.000000e+00 : f32
    %20 = vector.broadcast %cst_16 : f32 to vector<16x128xf32>
    %21 = arith.cmpf ogt, %19, %20 : vector<16x128xf32>
    %cst_17 = arith.constant 2.000000e-01 : f32
    %22 = vector.broadcast %cst_17 : f32 to vector<16x128xf32>
    %23 = arith.mulf %22, %19 : vector<16x128xf32>
    %24 = arith.select %21, %19, %23 : vector<16x128xi1>, vector<16x128xf32>
    %25 = arith.truncf %24 : vector<16x128xf32> to vector<16x128xbf16>
    %c0_18 = arith.constant 0 : index
    %c0_19 = arith.constant 0 : index
    %26 = vector.load %arg9[%c0_18, %c0_19] : memref<128x128xbf16, #tpu.memory_space<vmem>>, vector<128x128xbf16>
    %cst_20 = arith.constant dense<0.000000e+00> : vector<16x128xf32>
    %27 = tpu.matmul %25, %26, %cst_20 {dimension_numbers = #tpu.dot_dimension_numbers<[1], [0], [0], [1], [0, 0, 1, 1], [], []>} : vector<16x128xbf16>, vector<128x128xbf16>, vector<16x128xf32> -> vector<16x128xf32>
    %c0_21 = arith.constant 0 : index
    %c0_22 = arith.constant 0 : index
    %28 = vector.load %arg10[%c0_21, %c0_22] : memref<1x128xf32, #tpu.memory_space<vmem>>, vector<1x128xf32>
    %29 = vector.broadcast %28 : vector<1x128xf32> to vector<16x128xf32>
    %30 = arith.addf %27, %29 : vector<16x128xf32>
    %c0_23 = arith.constant 0 : index
    %c0_24 = arith.constant 0 : index
    %31 = vector.load %arg11[%c0_23, %c0_24] : memref<1x128xf32, #tpu.memory_space<vmem>>, vector<1x128xf32>
    %32 = vector.broadcast %31 : vector<1x128xf32> to vector<16x128xf32>
    %33 = arith.mulf %30, %32 : vector<16x128xf32>
    %c0_25 = arith.constant 0 : index
    %c0_26 = arith.constant 0 : index
    %34 = vector.load %arg12[%c0_25, %c0_26] : memref<1x128xf32, #tpu.memory_space<vmem>>, vector<1x128xf32>
    %35 = vector.broadcast %34 : vector<1x128xf32> to vector<16x128xf32>
    %36 = arith.addf %33, %35 : vector<16x128xf32>
    %cst_27 = arith.constant 0.000000e+00 : f32
    %37 = vector.broadcast %cst_27 : f32 to vector<16x128xf32>
    %38 = arith.cmpf ogt, %36, %37 : vector<16x128xf32>
    %cst_28 = arith.constant 2.000000e-01 : f32
    %39 = vector.broadcast %cst_28 : f32 to vector<16x128xf32>
    %40 = arith.mulf %39, %36 : vector<16x128xf32>
    %41 = arith.select %38, %36, %40 : vector<16x128xi1>, vector<16x128xf32>
    %42 = vector.shape_cast %41 : vector<16x128xf32> to vector<1x16x128xf32>
    %c0_29 = arith.constant 0 : index
    %c0_30 = arith.constant 0 : index
    %c0_31 = arith.constant 0 : index
    %43 = vector.load %arg13[%c0_29, %c0_30, %c0_31] : memref<1x16x128xf32, #tpu.memory_space<vmem>>, vector<1x16x128xf32>
    tpu.vector_store %arg13[%c0_29, %c0_30, %c0_31], %42 {strides = array<i32>} : memref<1x16x128xf32, #tpu.memory_space<vmem>>, vector<1x16x128xf32>,
    return
  }
  func.func @transform_0(%arg0: i32, %arg1: i32) -> (i32, i32, i32) {
    %c0_i32 = arith.constant 0 : i32
    %c0_i32_0 = arith.constant 0 : i32
    return %arg0, %arg1, %c0_i32 : i32, i32, i32
  }
  func.func @transform_1(%arg0: i32, %arg1: i32) -> (i32, i32, i32) {
    %c0_i32 = arith.constant 0 : i32
    %c0_i32_0 = arith.constant 0 : i32
    return %arg0, %arg1, %c0_i32 : i32, i32, i32
  }
  func.func @transform_2(%arg0: i32, %arg1: i32) -> (i32, i32) {
    %c0_i32 = arith.constant 0 : i32
    %c0_i32_0 = arith.constant 0 : i32
    %c0_i32_1 = arith.constant 0 : i32
    return %c0_i32, %c0_i32_0 : i32, i32
  }
  func.func @transform_3(%arg0: i32, %arg1: i32) -> (i32, i32) {
    %c0_i32 = arith.constant 0 : i32
    %c0_i32_0 = arith.constant 0 : i32
    %c0_i32_1 = arith.constant 0 : i32
    return %c0_i32, %c0_i32_0 : i32, i32
  }
  func.func @transform_4(%arg0: i32, %arg1: i32) -> (i32, i32) {
    %c0_i32 = arith.constant 0 : i32
    %c0_i32_0 = arith.constant 0 : i32
    %c0_i32_1 = arith.constant 0 : i32
    return %c0_i32, %c0_i32_0 : i32, i32
  }
  func.func @transform_5(%arg0: i32, %arg1: i32) -> (i32, i32) {
    %c0_i32 = arith.constant 0 : i32
    %c0_i32_0 = arith.constant 0 : i32
    %c0_i32_1 = arith.constant 0 : i32
    return %c0_i32, %c0_i32_0 : i32, i32
  }
  func.func @transform_6(%arg0: i32, %arg1: i32) -> (i32, i32) {
    %c0_i32 = arith.constant 0 : i32
    %c0_i32_0 = arith.constant 0 : i32
    %c0_i32_1 = arith.constant 0 : i32
    return %c0_i32, %c0_i32_0 : i32, i32
  }
  func.func @transform_7(%arg0: i32, %arg1: i32) -> (i32, i32) {
    %c0_i32 = arith.constant 0 : i32
    %c0_i32_0 = arith.constant 0 : i32
    %c0_i32_1 = arith.constant 0 : i32
    return %c0_i32, %c0_i32_0 : i32, i32
  }
  func.func @transform_8(%arg0: i32, %arg1: i32) -> (i32, i32) {
    %c0_i32 = arith.constant 0 : i32
    %c0_i32_0 = arith.constant 0 : i32
    %c0_i32_1 = arith.constant 0 : i32
    return %c0_i32, %c0_i32_0 : i32, i32
  }
  func.func @transform_9(%arg0: i32, %arg1: i32) -> (i32, i32) {
    %c0_i32 = arith.constant 0 : i32
    %c0_i32_0 = arith.constant 0 : i32
    %c0_i32_1 = arith.constant 0 : i32
    return %c0_i32, %c0_i32_0 : i32, i32
  }
  func.func @transform_10(%arg0: i32, %arg1: i32) -> (i32, i32) {
    %c0_i32 = arith.constant 0 : i32
    %c0_i32_0 = arith.constant 0 : i32
    %c0_i32_1 = arith.constant 0 : i32
    return %c0_i32, %c0_i32_0 : i32, i32
  }
  func.func @transform_11(%arg0: i32, %arg1: i32) -> (i32, i32, i32) {
    %c0_i32 = arith.constant 0 : i32
    %c0_i32_0 = arith.constant 0 : i32
    return %arg0, %arg1, %c0_i32 : i32, i32, i32
  }
}

</mosaic_0001>

<bundles_post_ra>
// kernel: gcn_encoder_forward.11
= control target key start
LH: loop header
LB: loop body
LE: loop exit
PB: predicated region body
PF: predicated region fallthrough
CT: control target
= control target key end

     0   :  { %s657_s12 = smov 0   ;;  %s659_s13 = smov 0   ;;  %s740_s0 = inlined_call_operand.vmem [shape: f32[2,16,128], index: 0, kind: input, shape index: {}, may-alias: {0,1}]   ;;  %s741_s1 = inlined_call_operand.vmem [shape: f32[2,16,128], index: 1, kind: input, shape index: {}, may-alias: {0,1}]   ;;  %s742_s2 = inlined_call_operand.vmem [shape: f32[2,1,16], index: 2, kind: input, shape index: {}]   ;;  %s743_s3 = inlined_call_operand.vmem [shape: s32[2,16,4], index: 3, kind: output, shape index: {}]  }
   0x1   :  { %s661_s14 = smov 0  }
   0x2 LB: > { %s25_s15 = sadd.s32 1, %s631_s13  ;;  %p549_p0 = scmp.ge.s32.totalorder %s635_s14, 1  ;;  %s635_s14 = sphi %s661_s14, %s13_s14   ;;  %s631_s13 = sphi %s659_s13, %s745_s13   ;;  %s627_s12 = sphi %s657_s12, %s744_s12  }
   0x3   : > { %p27_p1 = scmp.ge.s32.totalorder %s25_s15, 2  ;;  %p176_p2 = scmp.lt.s32.totalorder %s635_s14, 3 }
   0x5   : > { %s747_s15 = smov (%p27_p1, %s25_s15), 0  ;;  %p177_p3 = pnand %p549_p0, %p176_p2 }
   0x6   : > { %p217_p4 = scmp.lt.s32.totalorder (!%p177_p3), %s627_s12, 1 }
   0x7   : > { %180 = sbr.rel (%p177_p3) target bundleno = 1371 (0x55b), region = 32 }
   0xc   : > { %s749_s12 = smov (!%p217_p4, %s627_s12), 1  ;;  %vm337_vm0 = vcmask 130048   ;;  %v334_v13 = vlaneseq }
   0xd   : > { %s675_s16 = sshll.u32 %s749_s12, 4  ;;  %s233_s25 = scalar_lea.vmem %s742_s2, %s749_s12 }
   0xe   : > { %s230_s19 = scalar_lea.vmem %s741_s1, %s675_s16  ;;  %s224_s22 = scalar_lea.vmem %s740_s0, %s675_s16  ;;  %v556_v8 = vld [vmem:[%s233_s25] ss:$0 sm:$0xff]  ;;  %v690_v14 = vand.u32 127, %v334_v13 }
   0xf   : > { %v247_v0 = vld [vmem:[%s230_s19 + $0x8] sm:$0xff]  ;;  %v246_v1 = vld [vmem:[%s230_s19] sm:$0xff]  ;;  %s242_s28 = scalar_lea.vmem %s743_s3, %s675_s16 }
  0x10   : > { %566 = vmatprep.subr.mxu0 %v247_v0  ;;  %v244_v2 = vld [vmem:[%s224_s22] sm:$0xff]  ;;  %v245_v3 = vld [vmem:[%s224_s22 + $0x8] sm:$0xff]  ;;  %v693_v15 = vcvt.s32.f32 %v690_v14  ;;  %vm356_vm7 = vcmp.eq.s32.totalorder %v690_v14, 0  ;;  %vm381_vm8 = vcmp.eq.s32.totalorder %v690_v14, 1  ;;  %vm406_vm13 = vcmp.eq.s32.totalorder %v690_v14, 2 }
  0x11   : > { %567 = vmatpush3.xpose.msra.mxu0 %v247_v0  ;;  %570 = vmatprep.mubr.f32.mxu0 %v244_v2 }
  0x12   : > { %568 = vmatprep.subr.mxu0 %v246_v1 }
  0x15   : > { %569 = vmatpush3.xpose.msra.mxu0 %v246_v1 }
  0x18   : > { %571 = vmatmul.mubr.f32.vlgmr.msra.gmra.mxu0 %v245_v3 }
  0xd8   : > { %v572_v4 = vpop.f32.mrf.mxu0 }
  0xd9   : > { %v324_v6 = vmul.f32 2.0, %v572_v4 }
  0xda   : > { %v314_v5 = vpop.f32.mrf.mxu0 }
  0xdb   : > { %v323_v7 = vmul.f32 2.0, %v314_v5  ;;  %v333_v10 = vsub.f32 %v324_v6, %v556_v8 }
  0xdd   : > { %v332_v9 = vsub.f32 %v323_v7, %v556_v8  ;;  %v341_v12 = vsel %vm337_vm0, %v333_v10, -inf }
  0xdf   : > { %v338_v11 = vsel %vm337_vm0, %v332_v9, -inf }
  0xe0   : > { %339 = vmax.xlane.f32.xlu0 %v338_v11 }
  0xe4   : > { %342 = vmax.xlane.f32.xlu0 %v341_v12 }
 0x169   : > { %v340_v16 = vpop.xlane.xlu0 %339 }
 0x16a   : > { %vm344_vm1 = vcmp.eq.f32.partialorder %v332_v9, %v340_v16 }
 0x16b   : > { %v346_v17 = vsel %vm344_vm1, %v693_v15, 16.0 }
 0x16c   : > { %v348_v18 = vsel %vm337_vm0, %v346_v17, inf }
 0x16d   : > { %349 = vmin.xlane.f32.xlu1 %v348_v18  ;;  %v343_v19 = vpop.xlane.xlu0 %342 }
 0x16e   : > { %vm345_vm2 = vcmp.eq.f32.partialorder %v333_v10, %v343_v19 }
 0x16f   : > { %v347_v20 = vsel %vm345_vm2, %v693_v15, 16.0 }
 0x170   : > { %v351_v21 = vsel %vm337_vm0, %v347_v20, inf }
 0x171   : > { %352 = vmin.xlane.f32.xlu1 %v351_v21 }
 0x1f6   : > { %v350_v22 = vpop.xlane.xlu1 %349 }
 0x1f7   : > { %v573_v23 = vtrunc.f32 %v350_v22 }
 0x1f9   : > { %v574_v24 = vcvt.f32.s32 %v573_v23 }
 0x1fa   : > { %v353_v25 = vpop.xlane.xlu1 %352 }
 0x1fb   : > { %vm359_vm3 = vcmp.eq.s32.totalorder %v690_v14, %v574_v24  ;;  %v575_v26 = vtrunc.f32 %v353_v25  ;;  %v357_v41 = vsel %vm356_vm7, %v574_v24, 0 }
 0x1fc   : > { %v361_v27 = vsel %vm359_vm3, -inf, %v332_v9  ;;  %vm431_vm3 = vcmp.eq.s32.totalorder %v690_v14, 3 }
 0x1fd   : > { %v576_v28 = vcvt.f32.s32 %v575_v26  ;;  %v363_v29 = vsel %vm337_vm0, %v361_v27, -inf }
 0x1fe   : > { %364 = vmax.xlane.f32.xlu0 %v363_v29 }
 0x1ff   : > { %vm360_vm4 = vcmp.eq.s32.totalorder %v690_v14, %v576_v28  ;;  %v358_v48 = vsel %vm356_vm7, %v576_v28, 0 }
 0x200   : > { %v362_v30 = vsel %vm360_vm4, -inf, %v333_v10  ;;  %vm434_vm4 = vcmask 31744  }
 0x201   : > { %v366_v31 = vsel %vm337_vm0, %v362_v30, -inf }
 0x202   : > { %367 = vmax.xlane.f32.xlu1 %v366_v31 }
 0x287   : > { %v365_v32 = vpop.xlane.xlu0 %364 }
 0x288   : > { %vm369_vm5 = vcmp.eq.f32.partialorder %v361_v27, %v365_v32 }
 0x289   : > { %v371_v33 = vsel %vm369_vm5, %v693_v15, 16.0 }
 0x28a   : > { %v373_v34 = vsel %vm337_vm0, %v371_v33, inf }
 0x28b   : > { %v368_v35 = vpop.xlane.xlu1 %367  ;;  %374 = vmin.xlane.f32.xlu0 %v373_v34 }
 0x28c   : > { %vm370_vm6 = vcmp.eq.f32.partialorder %v362_v30, %v368_v35 }
 0x28d   : > { %v372_v36 = vsel %vm370_vm6, %v693_v15, 16.0 }
 0x28e   : > { %v376_v37 = vsel %vm337_vm0, %v372_v36, inf }
 0x28f   : > { %377 = vmin.xlane.f32.xlu1 %v376_v37 }
 0x314   : > { %v375_v38 = vpop.xlane.xlu0 %374 }
 0x315   : > { %v577_v39 = vtrunc.f32 %v375_v38 }
 0x317   : > { %v578_v40 = vcvt.f32.s32 %v577_v39 }
 0x318   : > { %v378_v42 = vpop.xlane.xlu1 %377 }
 0x319   : > { %v382_v43 = vsel %vm381_vm8, %v578_v40, %v357_v41  ;;  %vm384_vm9 = vcmp.eq.s32.totalorder %v690_v14, %v578_v40  ;;  %v579_v44 = vtrunc.f32 %v378_v42 }
 0x31a   : > { %v386_v45 = vsel %vm384_vm9, -inf, %v361_v27 }
 0x31b   : > { %v580_v46 = vcvt.f32.s32 %v579_v44  ;;  %v388_v47 = vsel %vm337_vm0, %v386_v45, -inf }
 0x31c   : > { %389 = vmax.xlane.f32.xlu0 %v388_v47 }
 0x31d   : > { %v383_v49 = vsel %vm381_vm8, %v580_v46, %v358_v48  ;;  %vm385_vm10 = vcmp.eq.s32.totalorder %v690_v14, %v580_v46 }
 0x31e   : > { %v387_v50 = vsel %vm385_vm10, -inf, %v362_v30 }
 0x31f   : > { %v391_v51 = vsel %vm337_vm0, %v387_v50, -inf }
 0x320   : > { %392 = vmax.xlane.f32.xlu1 %v391_v51 }
 0x3a5   : > { %v390_v52 = vpop.xlane.xlu0 %389 }
 0x3a6   : > { %vm394_vm11 = vcmp.eq.f32.partialorder %v386_v45, %v390_v52 }
 0x3a7   : > { %v396_v53 = vsel %vm394_vm11, %v693_v15, 16.0 }
 0x3a8   : > { %v398_v54 = vsel %vm337_vm0, %v396_v53, inf }
 0x3a9   : > { %v393_v55 = vpop.xlane.xlu1 %392  ;;  %399 = vmin.xlane.f32.xlu0 %v398_v54 }
 0x3aa   : > { %vm395_vm12 = vcmp.eq.f32.partialorder %v387_v50, %v393_v55 }
 0x3ab   : > { %v397_v56 = vsel %vm395_vm12, %v693_v15, 16.0 }
 0x3ac   : > { %v401_v57 = vsel %vm337_vm0, %v397_v56, inf }
 0x3ad   : > { %402 = vmin.xlane.f32.xlu1 %v401_v57 }
 0x432   : > { %v400_v58 = vpop.xlane.xlu0 %399 }
 0x433   : > { %v581_v59 = vtrunc.f32 %v400_v58 }
 0x435   : > { %v582_v60 = vcvt.f32.s32 %v581_v59 }
 0x436   : > { %v403_v61 = vpop.xlane.xlu1 %402 }
 0x437   : > { %v407_v62 = vsel %vm406_vm13, %v582_v60, %v382_v43  ;;  %v583_v63 = vtrunc.f32 %v403_v61  ;;  %vm409_vm14 = vcmp.eq.s32.totalorder %v690_v14, %v582_v60 }
 0x438   : > { %v411_v0 = vsel %vm409_vm14, -inf, %v386_v45 }
 0x439   : > { %v584_v1 = vcvt.f32.s32 %v583_v63  ;;  %v413_v2 = vsel %vm337_vm0, %v411_v0, -inf }
 0x43a   : > { %414 = vmax.xlane.f32.xlu0 %v413_v2 }
 0x43b   : > { %v408_v3 = vsel %vm406_vm13, %v584_v1, %v383_v49  ;;  %vm410_vm15 = vcmp.eq.s32.totalorder %v690_v14, %v584_v1 }
 0x43c   : > { %v412_v4 = vsel %vm410_vm15, -inf, %v387_v50 }
 0x43d   : > { %v416_v5 = vsel %vm337_vm0, %v412_v4, -inf }
 0x43e   : > { %417 = vmax.xlane.f32.xlu1 %v416_v5 }
 0x4c3   : > { %v415_v6 = vpop.xlane.xlu0 %414 }
 0x4c4   : > { %vm419_vm1 = vcmp.eq.f32.partialorder %v411_v0, %v415_v6 }
 0x4c5   : > { %v421_v7 = vsel %vm419_vm1, %v693_v15, 16.0 }
 0x4c6   : > { %v423_v8 = vsel %vm337_vm0, %v421_v7, inf }
 0x4c7   : > { %v418_v9 = vpop.xlane.xlu1 %417  ;;  %424 = vmin.xlane.f32.xlu0 %v423_v8 }
 0x4c8   : > { %vm420_vm2 = vcmp.eq.f32.partialorder %v412_v4, %v418_v9 }
 0x4c9   : > { %v422_v10 = vsel %vm420_vm2, %v693_v15, 16.0 }
 0x4ca   : > { %v426_v11 = vsel %vm337_vm0, %v422_v10, inf }
 0x4cb   : > { %427 = vmin.xlane.f32.xlu1 %v426_v11 }
 0x550   : > { %v425_v12 = vpop.xlane.xlu0 %424 }
 0x551   : > { %v585_v13 = vtrunc.f32 %v425_v12 }
 0x553   : > { %v586_v16 = vcvt.f32.s32 %v585_v13 }
 0x554   : > { %v428_v17 = vpop.xlane.xlu1 %427 }
 0x555   : > { %v432_v18 = vsel %vm431_vm3, %v586_v16, %v407_v62  ;;  %v587_v19 = vtrunc.f32 %v428_v17 }
 0x556   : > { %435 = vst.msk [vmem:[%s242_s28] sm:$0xff] %vm434_vm4, %v432_v18 }
 0x557   : > { %v588_v20 = vcvt.f32.s32 %v587_v19 }
 0x559   : > { %v433_v21 = vsel %vm431_vm3, %v588_v20, %v408_v3 }
 0x55a   : > { %436 = vst.msk [vmem:[%s242_s28 + $0x8] sm:$0xff] %vm434_vm4, %v433_v21 }
 0x55b PF: > { %s13_s14 = sadd.s32 1, %s635_s14   ;;  %s744_s12 = smov %s631_s13 }
 0x55c   : > { %p10_p5 = scmp.ge.s32.totalorder %s13_s14, 4   ;;  %s745_s13 = smov %s747_s15 }
 0x55e   :  { %12 = sbr.rel (!%p10_p5) target bundleno = 2 (0x2), region = 68 }

// kernel: gcn_encoder_forward.12
= control target key start
LH: loop header
LB: loop body
LE: loop exit
PB: predicated region body
PF: predicated region fallthrough
CT: control target
= control target key end

     0   :  { %s1427_s21 = smov 0   ;;  %s1429_s6 = smov 0   ;;  %s1570_s0 = inlined_call_operand.vmem [shape: s32[2,16,4], index: 0, kind: input, shape index: {}]   ;;  %s1571_s1 = inlined_call_operand.vmem [shape: f32[2,16,128], index: 1, kind: input, shape index: {}, may-alias: {1,2}]   ;;  %s1572_s2 = inlined_call_operand.vmem [shape: f32[2,16,128], index: 2, kind: input, shape index: {}, may-alias: {1,2}]   ;;  %s1573_s3 = inlined_call_operand.vmem [shape: bf16[128,128], index: 3, kind: input, shape index: {}]   ;;  %s1574_s4 = inlined_call_operand.vmem [shape: bf16[128,128], index: 4, kind: input, shape index: {}]   ;;  %s1575_s5 = inlined_call_operand.vmem [shape: f32[1,128], index: 5, kind: input, shape index: {}]   ;;  %s1576_s6 = inlined_call_operand.vmem [shape: f32[1,128], index: 6, kind: input, shape index: {}, may-alias: {6,7,10,11}]   ;;  %s1577_s7 = inlined_call_operand.vmem [shape: f32[1,128], index: 7, kind: input, shape index: {}, may-alias: {6,7,10,11}]   ;;  %s1578_s8 = inlined_call_operand.vmem [shape: bf16[128,128], index: 8, kind: input, shape index: {}]   ;;  %s1579_s9 = inlined_call_operand.vmem [shape: f32[1,128], index: 9, kind: input, shape index: {}]   ;;  %s1580_s10 = inlined_call_operand.vmem [shape: f32[1,128], index: 10, kind: input, shape index: {}, may-alias: {6,7,10,11}]   ;;  %s1581_s11 = inlined_call_operand.vmem [shape: f32[1,128], index: 11, kind: input, shape index: {}, may-alias: {6,7,10,11}]   ;;  %s1582_s12 = inlined_call_operand.vmem [shape: f32[2,1,2,128], index: 12, kind: output, shape index: {}]  }
   0x1   :  { %s1431_s7 = smov 0  }
   0x2 LB: > { %s34_s8 = sadd.s32 1, %s1350_s6  ;;  %p1148_p0 = scmp.ge.s32.totalorder %s1354_s7, 1  ;;  %s1354_s7 = sphi %s1431_s7, %s22_s7   ;;  %s1350_s6 = sphi %s1429_s6, %s1584_s6   ;;  %s1346_s21 = sphi %s1427_s21, %s1583_s21  }
   0x3   : > { %p36_p1 = scmp.ge.s32.totalorder %s34_s8, 2  ;;  %p410_p2 = scmp.lt.s32.totalorder %s1354_s7, 3 }
   0x5   : > { %s1586_s8 = smov (%p36_p1, %s34_s8), 0  ;;  %p411_p3 = pnand %p1148_p0, %p410_p2 }
   0x6   : > { %p473_p4 = scmp.lt.s32.totalorder (!%p411_p3), %s1346_s21, 1 }
   0x7   : > { %414 = sbr.rel (%p411_p3) target bundleno = 477 (0x1dd), region = 68 }
   0xc   : > { %v1316_v0 = vld [vmem:[%s1573_s3 + $0x38] sm:$0xff]   ;;  %v1356_v1 = vmov 0.0   ;;  %v1317_v2 = vld [vmem:[%s1573_s3 + $0x30] sm:$0xff]   ;;  %vm1357_vm0 = vmmov 0   ;;  %s1588_s21 = smov (!%p473_p4, %s1346_s21), 1  ;;  %v1358_v3 = vmov 1   ;;  %v731_v31 = vlaneseq }
   0xd   : > { %1216 = vmatprep.subr.bf16.mxu0 %v1356_v1  ;;  %1236 = vmatprep.subr.bf16.mxu1 %v1356_v1  ;;  %v1318_v4 = vld [vmem:[%s1573_s3 + $0x28] sm:$0xff]   ;;  %v1359_v5 = vmov 0   ;;  %s1465_s25 = sshll.u32 %s1588_s21, 4  ;;  %v1319_v6 = vld [vmem:[%s1573_s3 + $0x20] sm:$0xff]   ;;  %v1324_v8 = vld [vmem:[%s1574_s4 + $0x38] sm:$0xff]   ;;  %v1360_v14 = vmov 2  }
   0xe   : > { %1217 = vmatpush3.bf16.msra.mxu0 %v1316_v0  ;;  %1232 = vmatprep.mubr.msk.bf16.mxu0 %vm1357_vm0, %v1356_v1  ;;  %s480_s28 = scalar_lea.vmem %s1570_s0, %s1465_s25  ;;  %v1325_v10 = vld [vmem:[%s1574_s4 + $0x30] sm:$0xff]   ;;  %v1320_v11 = vld [vmem:[%s1573_s3 + $0x18] sm:$0xff]   ;;  %v1326_v12 = vld [vmem:[%s1574_s4 + $0x28] sm:$0xff]   ;;  %v1361_v17 = vmov 3   ;;  %s495_s11 = scalar_lea.vmem %s1572_s2, %s1465_s25  ;;  %v732_v34 = vand.u32 127, %v731_v31  ;;  %vm746_vm5 = vcmask 130048  }
   0xf   : > { %1218 = vmatprep.subr.bf16.mxu0 %v1356_v1  ;;  %1252 = vmatprep.mubr.msk.bf16.mxu1 %vm1357_vm0, %v1356_v1  ;;  %v505_v7 = vld [vmem:[%s480_s28] sm:$0xff]  ;;  %v506_v9 = vld [vmem:[%s480_s28 + $0x8] sm:$0xff]  ;;  %v1321_v13 = vld [vmem:[%s1573_s3 + $0x10] sm:$0xff]   ;;  %s486_s28 = scalar_lea.vmem %s1571_s1, %s1465_s25  ;;  %s1155_s23 = sshll.u32 %s1588_s21, 1  ;;  %vm1034_vm10 = vcmask 1040384  }
  0x10   : > { %1311 = vset.pattern.permute.xlu1 %v1358_v3  ;;  %1310 = vset.pattern.permute.xlu0 %v1359_v5  ;;  %v1322_v15 = vld [vmem:[%s1573_s3 + $0x8] sm:$0xff]   ;;  %v1327_v16 = vld [vmem:[%s1574_s4 + $0x20] sm:$0xff]   ;;  %v1328_v21 = vld [vmem:[%s1574_s4 + $0x18] sm:$0xff]   ;;  %s503_s27 = scalar_lea.vmem %s1582_s12, %s1155_s23 }
  0x11   : > { %810 = vperm.xlu1 %1311, %v505_v7   ;;  %734 = vperm.xlu0 %1310, %v505_v7   ;;  %v1323_v18 = vld [vmem:[%s1573_s3] sm:$0xff]   ;;  %v508_v20 = vld [vmem:[%s486_s28 + $0x8] sm:$0xff]  ;;  %v1329_v23 = vld [vmem:[%s1574_s4 + $0x10] sm:$0xff]  }
  0x12   : > { %1219 = vmatpush3.bf16.msra.mxu0 %v1317_v2  ;;  %1237 = vmatpush3.bf16.msra.mxu1 %v1324_v8  ;;  %v507_v19 = vld [vmem:[%s486_s28] sm:$0xff]  ;;  %v1330_v24 = vld [vmem:[%s1574_s4 + $0x8] sm:$0xff]  }
  0x13   : > { %1220 = vmatprep.subr.bf16.mxu0 %v1356_v1  ;;  %1238 = vmatprep.subr.bf16.mxu1 %v1356_v1  ;;  %v509_v22 = vpack.c.bf16 %v508_v20, %v507_v19  ;;  %v1331_v25 = vld [vmem:[%s1574_s4] sm:$0xff]   ;;  %v511_v27 = vld [vmem:[%s495_s11 + $0x8] sm:$0xff] }
  0x14   : > { %v510_v26 = vld [vmem:[%s495_s11] sm:$0xff] }
  0x15   : > { %813 = vperm.xlu1 %1311, %v506_v9   ;;  %737 = vperm.xlu0 %1310, %v506_v9   ;;  %v512_v28 = vpack.c.bf16 %v511_v27, %v510_v26  ;;  %v1164_v60 = vld [vmem:[%s1575_s5] ss:$0 sm:$0xff] }
  0x16   : > { %1221 = vmatpush3.bf16.msra.mxu0 %v1318_v4  ;;  %1239 = vmatpush3.bf16.msra.mxu1 %v1325_v10 }
  0x17   : > { %1222 = vmatprep.subr.bf16.mxu0 %v1356_v1  ;;  %1240 = vmatprep.subr.bf16.mxu1 %v1356_v1 }
  0x19   : > { %1313 = vset.pattern.permute.xlu1 %v1360_v14  ;;  %1312 = vset.pattern.permute.xlu0 %v1360_v14 }
  0x1a   : > { %1223 = vmatpush3.bf16.msra.mxu0 %v1319_v6  ;;  %888 = vperm.xlu1 %1313, %v506_v9  }
  0x1b   : > { %1224 = vmatprep.subr.bf16.mxu0 %v1356_v1  ;;  %885 = vperm.xlu0 %1312, %v505_v7  }
  0x1c   : > { %1241 = vmatpush3.bf16.msra.mxu1 %v1326_v12 }
  0x1d   : > { %1242 = vmatprep.subr.bf16.mxu1 %v1356_v1 }
  0x1e   : > { %1225 = vmatpush3.bf16.msra.mxu0 %v1320_v11  ;;  %1314 = vset.pattern.permute.xlu1 %v1361_v17 }
  0x1f   : > { %1226 = vmatprep.subr.bf16.mxu0 %v1356_v1  ;;  %1315 = vset.pattern.permute.xlu0 %v1361_v17 }
  0x20   : > { %960 = vperm.xlu1 %1314, %v505_v7   ;;  %963 = vperm.xlu0 %1315, %v506_v9  }
  0x21   : > { %1243 = vmatpush3.bf16.msra.mxu1 %v1327_v16 }
  0x22   : > { %1227 = vmatpush3.bf16.msra.mxu0 %v1321_v13  ;;  %1244 = vmatprep.subr.bf16.mxu1 %v1356_v1 }
  0x23   : > { %1228 = vmatprep.subr.bf16.mxu0 %v1356_v1 }
  0x25   : > { %1245 = vmatpush3.bf16.msra.mxu1 %v1328_v21 }
  0x26   : > { %1229 = vmatpush3.bf16.msra.mxu0 %v1322_v15  ;;  %1246 = vmatprep.subr.bf16.mxu1 %v1356_v1 }
  0x27   : > { %1230 = vmatprep.subr.bf16.mxu0 %v1356_v1 }
  0x29   : > { %1247 = vmatpush3.bf16.msra.mxu1 %v1329_v23 }
  0x2a   : > { %1231 = vmatpush3.bf16.msra.mxu0 %v1323_v18  ;;  %1248 = vmatprep.subr.bf16.mxu1 %v1356_v1 }
  0x2b   : > { %1256 = vmatprep.subr.bf16.mxu0 %v1356_v1 }
  0x2d   : > { %1233 = vmatmul.mubr.bf16.vlgmr.msra.gmra.mxu0 %v509_v22  ;;  %1249 = vmatpush3.bf16.msra.mxu1 %v1330_v24 }
  0x2e   : > { %1258 = vmatprep.mubr.msk.bf16.mxu0 %vm1357_vm0, %v1356_v1  ;;  %1250 = vmatprep.subr.bf16.mxu1 %v1356_v1 }
  0x31   : > { %1251 = vmatpush3.bf16.msra.mxu1 %v1331_v25 }
  0x32   : > { %1262 = vmatprep.subr.bf16.mxu1 %v1356_v1 }
  0x34   : > { %1253 = vmatmul.mubr.bf16.vlgmr.msra.gmra.mxu1 %v512_v28 }
  0x35   : > { %1264 = vmatprep.mubr.msk.bf16.mxu1 %vm1357_vm0, %v1356_v1 }
  0x8c   : > { %v811_v29 = vpop.permute.xlu1 %810  ;;  %v735_v30 = vpop.permute.xlu0 %734 }
  0x8d   : > { %vm815_vm1 = vcmp.eq.s32.totalorder %v732_v34, %v811_v29  ;;  %vm739_vm3 = vcmp.eq.s32.totalorder %v732_v34, %v735_v30 }
  0x8e   : > { %v1176_v39 = vsel %vm815_vm1, 1.0, %v1356_v1  ;;  %v1173_v42 = vsel %vm739_vm3, 1.0, %v1356_v1 }
  0x90   : > { %v814_v32 = vpop.permute.xlu1 %813  ;;  %v738_v33 = vpop.permute.xlu0 %737 }
  0x91   : > { %vm816_vm2 = vcmp.eq.s32.totalorder %v732_v34, %v814_v32  ;;  %vm740_vm4 = vcmp.eq.s32.totalorder %v732_v34, %v738_v33 }
  0x92   : > { %v1177_v41 = vsel %vm816_vm2, 1.0, %v1356_v1  ;;  %v1174_v44 = vsel %vm740_vm4, 1.0, %v1356_v1 }
  0x93   : > { %v821_v48 = vpack.c.bf16 %v1177_v41, %v1176_v39  ;;  %v745_v49 = vpack.c.bf16 %v1174_v44, %v1173_v42 }
  0x95   : > { %v889_v35 = vpop.permute.xlu1 %888 }
  0x96   : > { %v886_v36 = vpop.permute.xlu0 %885  ;;  %vm891_vm8 = vcmp.eq.s32.totalorder %v732_v34, %v889_v35 }
  0x97   : > { %vm890_vm9 = vcmp.eq.s32.totalorder %v732_v34, %v886_v36  ;;  %v1180_v52 = vsel %vm891_vm8, 1.0, %v1356_v1 }
  0x98   : > { %v1179_v53 = vsel %vm890_vm9, 1.0, %v1356_v1 }
  0x99   : > { %v896_v55 = vpack.c.bf16 %v1180_v52, %v1179_v53 }
  0x9b   : > { %v961_v45 = vpop.permute.xlu1 %960  ;;  %v964_v46 = vpop.permute.xlu0 %963 }
  0x9c   : > { %vm965_vm6 = vcmp.eq.s32.totalorder %v732_v34, %v961_v45  ;;  %vm966_vm7 = vcmp.eq.s32.totalorder %v732_v34, %v964_v46 }
  0x9d   : > { %v1182_v50 = vsel %vm965_vm6, 1.0, %v1356_v1  ;;  %v1183_v51 = vsel %vm966_vm7, 1.0, %v1356_v1 }
  0x9e   : > { %v971_v54 = vpack.c.bf16 %v1183_v51, %v1182_v50 }
  0xed   : > { %v611_v37 = vpop.f32.mrf.mxu0 }
  0xef   : > { %v1234_v38 = vpop.f32.mrf.mxu0 }
  0xf1   : > { %v614_v40 = vpop.f32.mrf.mxu0 }
  0xf2   : > { %v618_v43 = vpack.c.bf16 %v614_v40, %v611_v37 }
  0xf3   : > { %v1235_v47 = vpop.f32.mrf.mxu0 }
  0xf4   : > { %1257 = vmatpush3.bf16.msra.mxu0 %v618_v43  ;;  %1263 = vmatpush3.bf16.msra.mxu1 %v618_v43  ;;  %v724_v56 = vpop.f32.mrf.mxu1 }
  0xf5   : > { %1268 = vmatprep.subr.bf16.mxu0 %v1356_v1  ;;  %1274 = vmatprep.subr.bf16.mxu1 %v1356_v1  ;;  %v725_v61 = vadd.f32 %v1164_v60, %v724_v56 }
  0xf6   : > { %v1254_v57 = vpop.f32.mrf.mxu1 }
  0xf7   : > { %1259 = vmatmul.mubr.msk.bf16.vlgmr.msra.gmra.mxu0 %vm746_vm5, %v745_v49  ;;  %1265 = vmatmul.mubr.msk.bf16.vlgmr.msra.gmra.mxu1 %vm746_vm5, %v821_v48 }
  0xf8   : > { %1269 = vmatpush3.bf16.msra.mxu0 %v618_v43  ;;  %1275 = vmatpush3.bf16.msra.mxu1 %v618_v43  ;;  %v727_v58 = vpop.f32.mrf.mxu1 }
  0xf9   : > { %1270 = vmatprep.mubr.msk.bf16.mxu0 %vm1357_vm0, %v1356_v1  ;;  %1276 = vmatprep.mubr.msk.bf16.mxu1 %vm1357_vm0, %v1356_v1  ;;  %v728_v4 = vadd.f32 %v1164_v60, %v727_v58 }
  0xfa   : > { %v1255_v59 = vpop.f32.mrf.mxu1 }
  0xff   : > { %1271 = vmatmul.mubr.msk.bf16.vlgmr.msra.gmra.mxu0 %vm746_vm5, %v896_v55  ;;  %1277 = vmatmul.mubr.msk.bf16.vlgmr.msra.gmra.mxu1 %vm746_vm5, %v971_v54 }
 0x1b7   : > { %v784_v62 = vpop.f32.mrf.mxu0  ;;  %v859_v63 = vpop.f32.mrf.mxu1 }
 0x1b8   : > { %v785_v0 = vadd.f32 %v784_v62, %v725_v61  ;;  %v860_v2 = vadd.f32 %v859_v63, %v725_v61 }
 0x1b9   : > { %v1260_v1 = vpop.f32.mrf.mxu0  ;;  %v1266_v3 = vpop.f32.mrf.mxu1 }
 0x1ba   : > { %v799_v9 = vmul.f32 %v785_v0, %v785_v0  ;;  %v874_v10 = vmul.f32 %v860_v2, %v860_v2 }
 0x1bb   : > { %v787_v5 = vpop.f32.mrf.mxu0  ;;  %v862_v6 = vpop.f32.mrf.mxu1 }
 0x1bc   : > { %v788_v7 = vadd.f32 %v787_v5, %v728_v4  ;;  %v863_v8 = vadd.f32 %v862_v6, %v728_v4 }
 0x1bd   : > { %v1261_v11 = vpop.f32.mrf.mxu0  ;;  %v1267_v12 = vpop.f32.mrf.mxu1 }
 0x1be   : > { %v791_v13 = vadd.f32 %v788_v7, %v785_v0  ;;  %v800_v14 = vmul.f32 %v788_v7, %v788_v7  ;;  %v866_v15 = vadd.f32 %v863_v8, %v860_v2  ;;  %v875_v16 = vmul.f32 %v863_v8, %v863_v8 }
 0x1bf   : > { %v934_v17 = vpop.f32.mrf.mxu0  ;;  %v1009_v18 = vpop.f32.mrf.mxu1 }
 0x1c0   : > { %v792_v19 = vrot.slane %v791_v13, 4  ;;  %v801_v20 = vadd.f32 %v800_v14, %v799_v9  ;;  %v867_v21 = vrot.slane %v866_v15, 4  ;;  %v876_v22 = vadd.f32 %v875_v16, %v874_v10 }
 0x1c1   : > { %v935_v23 = vadd.f32 %v934_v17, %v725_v61  ;;  %v1010_v24 = vadd.f32 %v1009_v18, %v725_v61  ;;  %v1272_v25 = vpop.f32.mrf.mxu0  ;;  %v1278_v26 = vpop.f32.mrf.mxu1 }
 0x1c2   : > { %v793_v27 = vadd.f32 %v792_v19, %v791_v13  ;;  %v802_v28 = vrot.slane %v801_v20, 4  ;;  %v868_v29 = vadd.f32 %v867_v21, %v866_v15  ;;  %v877_v30 = vrot.slane %v876_v22, 4 }
 0x1c3   : > { %v937_v31 = vpop.f32.mrf.mxu0  ;;  %v1012_v32 = vpop.f32.mrf.mxu1  ;;  %v949_v37 = vmul.f32 %v935_v23, %v935_v23  ;;  %v1024_v38 = vmul.f32 %v1010_v24, %v1010_v24 }
 0x1c4   : > { %v794_v33 = vrot.slane %v793_v27, 2  ;;  %v803_v34 = vadd.f32 %v802_v28, %v801_v20  ;;  %v869_v35 = vrot.slane %v868_v29, 2  ;;  %v878_v36 = vadd.f32 %v877_v30, %v876_v22 }
 0x1c5   : > { %v938_v39 = vadd.f32 %v937_v31, %v728_v4  ;;  %v1013_v40 = vadd.f32 %v1012_v32, %v728_v4  ;;  %v1273_v41 = vpop.f32.mrf.mxu0  ;;  %v1279_v42 = vpop.f32.mrf.mxu1 }
 0x1c6   : > { %v795_v43 = vadd.f32 %v794_v33, %v793_v27  ;;  %v804_v44 = vrot.slane %v803_v34, 2  ;;  %v870_v45 = vadd.f32 %v869_v35, %v868_v29  ;;  %v879_v46 = vrot.slane %v878_v36, 2 }
 0x1c7   : > { %v941_v47 = vadd.f32 %v938_v39, %v935_v23  ;;  %v950_v48 = vmul.f32 %v938_v39, %v938_v39  ;;  %v1016_v49 = vadd.f32 %v1013_v40, %v1010_v24  ;;  %v1025_v50 = vmul.f32 %v1013_v40, %v1013_v40 }
 0x1c8   : > { %v796_v51 = vrot.slane %v795_v43, 1  ;;  %v805_v52 = vadd.f32 %v804_v44, %v803_v34  ;;  %v871_v53 = vrot.slane %v870_v45, 1  ;;  %v880_v54 = vadd.f32 %v879_v46, %v878_v36 }
 0x1c9   : > { %v942_v55 = vrot.slane %v941_v47, 4  ;;  %v951_v56 = vadd.f32 %v950_v48, %v949_v37  ;;  %v1017_v57 = vrot.slane %v1016_v49, 4  ;;  %v1026_v58 = vadd.f32 %v1025_v50, %v1024_v38 }
 0x1ca   : > { %v797_v59 = vadd.f32 %v796_v51, %v795_v43  ;;  %v806_v60 = vrot.slane %v805_v52, 1  ;;  %v872_v61 = vadd.f32 %v871_v53, %v870_v45  ;;  %v881_v62 = vrot.slane %v880_v54, 1 }
 0x1cb   : > { %v943_v63 = vadd.f32 %v942_v55, %v941_v47  ;;  %v952_v0 = vrot.slane %v951_v56, 4  ;;  %v1018_v2 = vadd.f32 %v1017_v57, %v1016_v49  ;;  %v1027_v1 = vrot.slane %v1026_v58, 4 }
 0x1cc   : > { %v807_v3 = vadd.f32 %v806_v60, %v805_v52  ;;  %v873_v4 = vadd.f32 %v872_v61, %v797_v59  ;;  %v882_v5 = vadd.f32 %v881_v62, %v880_v54 }
 0x1cd   : > { %v944_v6 = vrot.slane %v943_v63, 2  ;;  %v953_v7 = vadd.f32 %v952_v0, %v951_v56  ;;  %v1019_v8 = vrot.slane %v1018_v2, 2  ;;  %v1028_v9 = vadd.f32 %v1027_v1, %v1026_v58 }
 0x1ce   : > { %v883_v10 = vadd.f32 %v882_v5, %v807_v3 }
 0x1cf   : > { %v945_v11 = vadd.f32 %v944_v6, %v943_v63  ;;  %v954_v12 = vrot.slane %v953_v7, 2  ;;  %v1020_v13 = vadd.f32 %v1019_v8, %v1018_v2  ;;  %v1029_v14 = vrot.slane %v1028_v9, 2 }
 0x1d1   : > { %v946_v15 = vrot.slane %v945_v11, 1  ;;  %v955_v16 = vadd.f32 %v954_v12, %v953_v7  ;;  %v1021_v17 = vrot.slane %v1020_v13, 1  ;;  %v1030_v18 = vadd.f32 %v1029_v14, %v1028_v9 }
 0x1d3   : > { %v947_v19 = vadd.f32 %v946_v15, %v945_v11  ;;  %v956_v20 = vrot.slane %v955_v16, 1  ;;  %v1031_v21 = vrot.slane %v1030_v18, 1  ;;  %v1022_v24 = vadd.f32 %v1021_v17, %v1020_v13 }
 0x1d5   : > { %v948_v22 = vadd.f32 %v947_v19, %v873_v4  ;;  %v957_v23 = vadd.f32 %v956_v20, %v955_v16  ;;  %v1032_v27 = vadd.f32 %v1031_v21, %v1030_v18 }
 0x1d7   : > { %v958_v25 = vadd.f32 %v957_v23, %v883_v10  ;;  %v1023_v26 = vadd.f32 %v1022_v24, %v948_v22 }
 0x1d9   : > { %v1033_v28 = vadd.f32 %v1032_v27, %v958_v25 }
 0x1db   : > { %v1035_v29 = vsel %vm1034_vm10, %v1023_v26, %v1033_v28 }
 0x1dc   : > { %1036 = vst [vmem:[%s503_s27] sm:$0x3] %v1035_v29 }
 0x1dd PF: > { %s22_s7 = sadd.s32 1, %s1354_s7   ;;  %s1583_s21 = smov %s1350_s6 }
 0x1de   : > { %p19_p5 = scmp.ge.s32.totalorder %s22_s7, 4   ;;  %s1584_s6 = smov %s1586_s8 }
 0x1e0   :  { %21 = sbr.rel (!%p19_p5) target bundleno = 2 (0x2), region = 104 }

// kernel: gcn_encoder_forward.13
= control target key start
LH: loop header
LB: loop body
LE: loop exit
PB: predicated region body
PF: predicated region fallthrough
CT: control target
= control target key end

     0   :  { %s1855_s21 = smov 0   ;;  %s1857_s22 = smov 0   ;;  %s2184_s0 = inlined_call_operand.vmem [shape: s32[2,16,4], index: 0, kind: input, shape index: {}]   ;;  %s2185_s1 = inlined_call_operand.vmem [shape: f32[2,16,128], index: 1, kind: input, shape index: {}, may-alias: {1,2}]   ;;  %s2186_s2 = inlined_call_operand.vmem [shape: f32[2,16,128], index: 2, kind: input, shape index: {}, may-alias: {1,2}]   ;;  %s2187_s3 = inlined_call_operand.vmem [shape: bf16[128,128], index: 3, kind: input, shape index: {}]   ;;  %s2188_s4 = inlined_call_operand.vmem [shape: bf16[128,128], index: 4, kind: input, shape index: {}]   ;;  %s2189_s5 = inlined_call_operand.vmem [shape: f32[1,128], index: 5, kind: input, shape index: {}]   ;;  %s2190_s6 = inlined_call_operand.vmem [shape: f32[1,128], index: 6, kind: input, shape index: {}]   ;;  %s2191_s7 = inlined_call_operand.vmem [shape: f32[1,128], index: 7, kind: input, shape index: {}]   ;;  %s2192_s8 = inlined_call_operand.vmem [shape: bf16[128,128], index: 8, kind: input, shape index: {}]   ;;  %s2193_s9 = inlined_call_operand.vmem [shape: f32[1,128], index: 9, kind: input, shape index: {}]   ;;  %s2194_s10 = inlined_call_operand.vmem [shape: f32[1,128], index: 10, kind: input, shape index: {}, may-alias: {10,11}]   ;;  %s2195_s11 = inlined_call_operand.vmem [shape: f32[1,128], index: 11, kind: input, shape index: {}, may-alias: {10,11}]   ;;  %s2196_s12 = inlined_call_operand.vmem [shape: f32[2,1,2,128], index: 12, kind: output, shape index: {}]  }
   0x1   :  { %s1859_s23 = smov 0  }
   0x2 LB: > { %s34_s10 = sadd.s32 1, %s1778_s22  ;;  %p1441_p0 = scmp.ge.s32.totalorder %s1782_s23, 1  ;;  %s1782_s23 = sphi %s1859_s23, %s22_s23   ;;  %s1778_s22 = sphi %s1857_s22, %s2198_s22   ;;  %s1774_s21 = sphi %s1855_s21, %s2197_s21  }
   0x3   : > { %p36_p1 = scmp.ge.s32.totalorder %s34_s10, 2  ;;  %p410_p2 = scmp.lt.s32.totalorder %s1782_s23, 3 }
   0x5   : > { %s2200_s10 = smov (%p36_p1, %s34_s10), 0  ;;  %p411_p3 = pnand %p1441_p0, %p410_p2 }
   0x6   : > { %p473_p4 = scmp.lt.s32.totalorder (!%p411_p3), %s1774_s21, 1 }
   0x7   : > { %414 = sbr.rel (%p411_p3) target bundleno = 893 (0x37d), region = 68 }
   0xc   : > { %v1736_v0 = vld [vmem:[%s2187_s3 + $0x38] sm:$0xff]   ;;  %v1784_v1 = vmov 0.0   ;;  %v1737_v2 = vld [vmem:[%s2187_s3 + $0x30] sm:$0xff]   ;;  %vm1785_vm0 = vmmov 0   ;;  %s2202_s21 = smov (!%p473_p4, %s1774_s21), 1  ;;  %v1786_v3 = vmov 1   ;;  %v747_v31 = vlaneseq }
   0xd   : > { %1556 = vmatprep.subr.bf16.mxu0 %v1784_v1  ;;  %1576 = vmatprep.subr.bf16.mxu1 %v1784_v1  ;;  %v1738_v4 = vld [vmem:[%s2187_s3 + $0x28] sm:$0xff]   ;;  %v1787_v5 = vmov 0   ;;  %s1893_s29 = sshll.u32 %s2202_s21, 4  ;;  %v1739_v6 = vld [vmem:[%s2187_s3 + $0x20] sm:$0xff]   ;;  %v1744_v8 = vld [vmem:[%s2188_s4 + $0x38] sm:$0xff]   ;;  %v1788_v27 = vmov 2  }
   0xe   : > { %1557 = vmatpush3.bf16.msra.mxu0 %v1736_v0  ;;  %1572 = vmatprep.mubr.msk.bf16.mxu0 %vm1785_vm0, %v1784_v1  ;;  %s480_s14 = scalar_lea.vmem %s2184_s0, %s1893_s29  ;;  %v1745_v10 = vld [vmem:[%s2188_s4 + $0x30] sm:$0xff]   ;;  %v1740_v11 = vld [vmem:[%s2187_s3 + $0x18] sm:$0xff]   ;;  %v1746_v12 = vld [vmem:[%s2188_s4 + $0x28] sm:$0xff]   ;;  %s486_s18 = scalar_lea.vmem %s2185_s1, %s1893_s29  ;;  %v1789_v28 = vmov 3   ;;  %v1970_v32 = vand.u32 127, %v747_v31  ;;  %vm762_vm5 = vcmask 130048  }
   0xf   : > { %1558 = vmatprep.subr.bf16.mxu0 %v1784_v1  ;;  %1592 = vmatprep.mubr.msk.bf16.mxu1 %vm1785_vm0, %v1784_v1  ;;  %v1902_v7 = vld [vmem:[%s480_s14] sm:$0xff]  ;;  %v506_v9 = vld [vmem:[%s480_s14 + $0x8] sm:$0xff]  ;;  %v1741_v13 = vld [vmem:[%s2187_s3 + $0x10] sm:$0xff]   ;;  %s495_s16 = scalar_lea.vmem %s2186_s2, %s1893_s29  ;;  %s1448_s26 = sshll.u32 %s2202_s21, 1 }
  0x10   : > { %1731 = vset.pattern.permute.xlu1 %v1786_v3  ;;  %1730 = vset.pattern.permute.xlu0 %v1787_v5  ;;  %v1747_v14 = vld [vmem:[%s2188_s4 + $0x20] sm:$0xff]   ;;  %v1742_v15 = vld [vmem:[%s2187_s3 + $0x8] sm:$0xff]   ;;  %v1748_v16 = vld [vmem:[%s2188_s4 + $0x18] sm:$0xff]   ;;  %s503_s30 = scalar_lea.vmem %s2196_s12, %s1448_s26 }
  0x11   : > { %947 = vperm.xlu1 %1731, %v1902_v7   ;;  %750 = vperm.xlu0 %1730, %v1902_v7   ;;  %v1743_v17 = vld [vmem:[%s2187_s3] sm:$0xff]   ;;  %v508_v19 = vld [vmem:[%s486_s18 + $0x8] sm:$0xff]  ;;  %v1749_v20 = vld [vmem:[%s2188_s4 + $0x10] sm:$0xff]  }
  0x12   : > { %1559 = vmatpush3.bf16.msra.mxu0 %v1737_v2  ;;  %1577 = vmatpush3.bf16.msra.mxu1 %v1744_v8  ;;  %v507_v18 = vld [vmem:[%s486_s18] sm:$0xff]  ;;  %v1750_v22 = vld [vmem:[%s2188_s4 + $0x8] sm:$0xff]   ;;  %v1987_v44 = vld [vmem:[%s2192_s8 + $0x38] sm:$0xff]  }
  0x13   : > { %1560 = vmatprep.subr.bf16.mxu0 %v1784_v1  ;;  %1578 = vmatprep.subr.bf16.mxu1 %v1784_v1  ;;  %v509_v21 = vpack.c.bf16 %v508_v19, %v507_v18  ;;  %v1751_v23 = vld [vmem:[%s2188_s4] sm:$0xff]   ;;  %v511_v25 = vld [vmem:[%s495_s16 + $0x8] sm:$0xff]  ;;  %v1998_v47 = vld [vmem:[%s2192_s8 + $0x30] sm:$0xff]  }
  0x14   : > { %v510_v24 = vld [vmem:[%s495_s16] sm:$0xff]  ;;  %v2011_v48 = vld [vmem:[%s2192_s8 + $0x28] sm:$0xff]   ;;  %v2031_v54 = vld [vmem:[%s2192_s8 + $0x18] sm:$0xff]  }
  0x15   : > { %950 = vperm.xlu1 %1731, %v506_v9   ;;  %753 = vperm.xlu0 %1730, %v506_v9   ;;  %v512_v26 = vpack.c.bf16 %v511_v25, %v510_v24  ;;  %v2020_v49 = vld [vmem:[%s2192_s8 + $0x20] sm:$0xff]   ;;  %v2040_v55 = vld [vmem:[%s2192_s8 + $0x10] sm:$0xff]   ;;  %v2049_v56 = vld [vmem:[%s2192_s8 + $0x8] sm:$0xff]  }
  0x16   : > { %1561 = vmatpush3.bf16.msra.mxu0 %v1738_v4  ;;  %1579 = vmatpush3.bf16.msra.mxu1 %v1745_v10  ;;  %v2058_v57 = vld [vmem:[%s2192_s8] sm:$0xff]  }
  0x17   : > { %1562 = vmatprep.subr.bf16.mxu0 %v1784_v1  ;;  %1580 = vmatprep.subr.bf16.mxu1 %v1784_v1  ;;  %v1457_v58 = vld [vmem:[%s2189_s5] ss:$0 sm:$0xff] }
  0x18   : > { %v2072_v61 = vld [vmem:[%s2190_s6] ss:$0 sm:$0xff] }
  0x19   : > { %1733 = vset.pattern.permute.xlu1 %v1788_v27  ;;  %1732 = vset.pattern.permute.xlu0 %v1788_v27 }
  0x1a   : > { %1563 = vmatpush3.bf16.msra.mxu0 %v1739_v6  ;;  %1581 = vmatpush3.bf16.msra.mxu1 %v1746_v12  ;;  %v2082_v6 = vld [vmem:[%s2191_s7] ss:$0 sm:$0xff] }
  0x1b   : > { %1564 = vmatprep.subr.bf16.mxu0 %v1784_v1  ;;  %1582 = vmatprep.subr.bf16.mxu1 %v1784_v1 }
  0x1c   : > { %1077 = vperm.xlu1 %1733, %v506_v9   ;;  %1074 = vperm.xlu0 %1732, %v1902_v7  }
  0x1e   : > { %1565 = vmatpush3.bf16.msra.mxu0 %v1740_v11  ;;  %1583 = vmatpush3.bf16.msra.mxu1 %v1747_v14 }
  0x1f   : > { %1566 = vmatprep.subr.bf16.mxu0 %v1784_v1  ;;  %1584 = vmatprep.subr.bf16.mxu1 %v1784_v1 }
  0x20   : > { %1734 = vset.pattern.permute.xlu1 %v1789_v28  ;;  %1735 = vset.pattern.permute.xlu0 %v1789_v28 }
  0x21   : > { %1201 = vperm.xlu1 %1734, %v1902_v7   ;;  %1204 = vperm.xlu0 %1735, %v506_v9  }
  0x22   : > { %1567 = vmatpush3.bf16.msra.mxu0 %v1741_v13  ;;  %1585 = vmatpush3.bf16.msra.mxu1 %v1748_v16 }
  0x23   : > { %1568 = vmatprep.subr.bf16.mxu0 %v1784_v1  ;;  %1586 = vmatprep.subr.bf16.mxu1 %v1784_v1 }
  0x26   : > { %1569 = vmatpush3.bf16.msra.mxu0 %v1742_v15  ;;  %1587 = vmatpush3.bf16.msra.mxu1 %v1749_v20 }
  0x27   : > { %1570 = vmatprep.subr.bf16.mxu0 %v1784_v1  ;;  %1588 = vmatprep.subr.bf16.mxu1 %v1784_v1 }
  0x2a   : > { %1571 = vmatpush3.bf16.msra.mxu0 %v1743_v17  ;;  %1589 = vmatpush3.bf16.msra.mxu1 %v1750_v22 }
  0x2b   : > { %1622 = vmatprep.subr.bf16.mxu0 %v1784_v1  ;;  %1590 = vmatprep.subr.bf16.mxu1 %v1784_v1 }
  0x2d   : > { %1573 = vmatmul.mubr.bf16.vlgmr.msra.gmra.mxu0 %v509_v21 }
  0x2e   : > { %1624 = vmatprep.mubr.msk.bf16.mxu0 %vm1785_vm0, %v1784_v1  ;;  %1591 = vmatpush3.bf16.msra.mxu1 %v1751_v23 }
  0x2f   : > { %1596 = vmatprep.subr.bf16.mxu1 %v1784_v1 }
  0x31   : > { %1593 = vmatmul.mubr.bf16.vlgmr.msra.gmra.mxu1 %v512_v26 }
  0x32   : > { %1598 = vmatprep.mubr.msk.bf16.mxu1 %vm1785_vm0, %v1784_v1 }
  0x8c   : > { %v948_v29 = vpop.permute.xlu1 %947  ;;  %v751_v30 = vpop.permute.xlu0 %750 }
  0x8d   : > { %vm952_vm1 = vcmp.eq.s32.totalorder %v1970_v32, %v948_v29  ;;  %vm755_vm2 = vcmp.eq.s32.totalorder %v1970_v32, %v751_v30 }
  0x8e   : > { %v1480_v37 = vsel %vm952_vm1, 1.0, %v1784_v1  ;;  %v1466_v39 = vsel %vm755_vm2, 1.0, %v1784_v1  ;;  %vm1327_vm2 = vcmask 1040384  }
  0x90   : > { %v951_v33 = vpop.permute.xlu1 %950  ;;  %v754_v34 = vpop.permute.xlu0 %753 }
  0x91   : > { %vm953_vm3 = vcmp.eq.s32.totalorder %v1970_v32, %v951_v33  ;;  %vm756_vm4 = vcmp.eq.s32.totalorder %v1970_v32, %v754_v34 }
  0x92   : > { %v1481_v41 = vsel %vm953_vm3, 1.0, %v1784_v1  ;;  %v1467_v42 = vsel %vm756_vm4, 1.0, %v1784_v1 }
  0x93   : > { %v958_v45 = vpack.c.bf16 %v1481_v41, %v1480_v37  ;;  %v761_v46 = vpack.c.bf16 %v1467_v42, %v1466_v39 }
  0x97   : > { %v1078_v12 = vpop.permute.xlu1 %1077  ;;  %v1075_v13 = vpop.permute.xlu0 %1074 }
  0x98   : > { %vm1080_vm12 = vcmp.eq.s32.totalorder %v1970_v32, %v1078_v12  ;;  %vm1079_vm13 = vcmp.eq.s32.totalorder %v1970_v32, %v1075_v13 }
  0x99   : > { %v1484_v37 = vsel %vm1080_vm12, 1.0, %v1784_v1 }
  0x9c   : > { %v1202_v26 = vpop.permute.xlu1 %1201  ;;  %v1205_v27 = vpop.permute.xlu0 %1204 }
  0x9d   : > { %vm1206_vm10 = vcmp.eq.s32.totalorder %v1970_v32, %v1202_v26  ;;  %vm1207_vm11 = vcmp.eq.s32.totalorder %v1970_v32, %v1205_v27  ;;  %v1483_v32 = vsel %vm1079_vm13, 1.0, %v1784_v1 }
  0x9e   : > { %v1085_v39 = vpack.c.bf16 %v1484_v37, %v1483_v32 }
  0xed   : > { %v627_v35 = vpop.f32.mrf.mxu0 }
  0xef   : > { %v1574_v36 = vpop.f32.mrf.mxu0 }
  0xf0   : > { %v1487_v36 = vsel %vm1207_vm11, 1.0, %v1784_v1 }
  0xf1   : > { %v630_v38 = vpop.f32.mrf.mxu0  ;;  %v740_v50 = vpop.f32.mrf.mxu1 }
  0xf2   : > { %v1978_v40 = vpack.c.bf16 %v630_v38, %v627_v35  ;;  %v2067_v59 = vadd.f32 %v1457_v58, %v740_v50  ;;  %v1486_v35 = vsel %vm1206_vm10, 1.0, %v1784_v1 }
  0xf3   : > { %v1575_v43 = vpop.f32.mrf.mxu0  ;;  %v1594_v51 = vpop.f32.mrf.mxu1  ;;  %v1212_v38 = vpack.c.bf16 %v1487_v36, %v1486_v35 }
  0xf4   : > { %1597 = vmatpush3.bf16.msra.mxu1 %v1978_v40  ;;  %1623 = vmatpush3.bf16.msra.mxu0 %v1978_v40 }
  0xf5   : > { %1602 = vmatprep.subr.bf16.mxu1 %v1784_v1  ;;  %1628 = vmatprep.subr.bf16.mxu0 %v1784_v1  ;;  %v743_v52 = vpop.f32.mrf.mxu1 }
  0xf6   : > { %v2076_v4 = vadd.f32 %v1457_v58, %v743_v52 }
  0xf7   : > { %1599 = vmatmul.mubr.msk.bf16.vlgmr.msra.gmra.mxu1 %vm762_vm5, %v761_v46  ;;  %1625 = vmatmul.mubr.msk.bf16.vlgmr.msra.gmra.mxu0 %vm762_vm5, %v958_v45  ;;  %v1595_v53 = vpop.f32.mrf.mxu1 }
  0xf8   : > { %1603 = vmatpush3.bf16.msra.mxu1 %v1987_v44  ;;  %1629 = vmatpush3.bf16.msra.mxu0 %v1987_v44 }
  0xf9   : > { %1604 = vmatprep.subr.bf16.mxu1 %v1784_v1  ;;  %1630 = vmatprep.subr.bf16.mxu0 %v1784_v1 }
  0xfa   : > { %1644 = vmatprep.mubr.msk.bf16.mxu0 %vm1785_vm0, %v1784_v1  ;;  %1618 = vmatprep.mubr.msk.bf16.mxu1 %vm1785_vm0, %v1784_v1 }
  0xfc   : > { %1605 = vmatpush3.bf16.msra.mxu1 %v1998_v47  ;;  %1631 = vmatpush3.bf16.msra.mxu0 %v1998_v47 }
  0xfd   : > { %1606 = vmatprep.subr.bf16.mxu1 %v1784_v1  ;;  %1632 = vmatprep.subr.bf16.mxu0 %v1784_v1 }
 0x100   : > { %1607 = vmatpush3.bf16.msra.mxu1 %v2011_v48  ;;  %1633 = vmatpush3.bf16.msra.mxu0 %v2011_v48 }
 0x101   : > { %1608 = vmatprep.subr.bf16.mxu1 %v1784_v1  ;;  %1634 = vmatprep.subr.bf16.mxu0 %v1784_v1 }
 0x104   : > { %1609 = vmatpush3.bf16.msra.mxu1 %v2020_v49  ;;  %1635 = vmatpush3.bf16.msra.mxu0 %v2020_v49 }
 0x105   : > { %1610 = vmatprep.subr.bf16.mxu1 %v1784_v1  ;;  %1636 = vmatprep.subr.bf16.mxu0 %v1784_v1 }
 0x108   : > { %1611 = vmatpush3.bf16.msra.mxu1 %v2031_v54  ;;  %1637 = vmatpush3.bf16.msra.mxu0 %v2031_v54 }
 0x109   : > { %1612 = vmatprep.subr.bf16.mxu1 %v1784_v1  ;;  %1638 = vmatprep.subr.bf16.mxu0 %v1784_v1 }
 0x10c   : > { %1613 = vmatpush3.bf16.msra.mxu1 %v2040_v55  ;;  %1639 = vmatpush3.bf16.msra.mxu0 %v2040_v55 }
 0x10d   : > { %1614 = vmatprep.subr.bf16.mxu1 %v1784_v1  ;;  %1640 = vmatprep.subr.bf16.mxu0 %v1784_v1 }
 0x110   : > { %1615 = vmatpush3.bf16.msra.mxu1 %v2049_v56  ;;  %1641 = vmatpush3.bf16.msra.mxu0 %v2049_v56 }
 0x111   : > { %1616 = vmatprep.subr.bf16.mxu1 %v1784_v1  ;;  %1642 = vmatprep.subr.bf16.mxu0 %v1784_v1 }
 0x114   : > { %1617 = vmatpush3.bf16.msra.mxu1 %v2058_v57  ;;  %1643 = vmatpush3.bf16.msra.mxu0 %v2058_v57 }
 0x115   : > { %1674 = vmatprep.subr.bf16.mxu0 %v1784_v1  ;;  %1648 = vmatprep.subr.bf16.mxu1 %v1784_v1 }
 0x1b7   : > { %v800_v60 = vpop.f32.mrf.mxu1  ;;  %v996_v62 = vpop.f32.mrf.mxu0 }
 0x1b8   : > { %v801_v63 = vadd.f32 %v800_v60, %v2067_v59  ;;  %v997_v0 = vadd.f32 %v996_v62, %v2067_v59 }
 0x1b9   : > { %v1600_v2 = vpop.f32.mrf.mxu1  ;;  %v1626_v3 = vpop.f32.mrf.mxu0 }
 0x1ba   : > { %v814_v5 = vmul.f32 %v2072_v61, %v801_v63  ;;  %v1003_v7 = vmul.f32 %v2072_v61, %v997_v0 }
 0x1bb   : > { %v803_v8 = vpop.f32.mrf.mxu1  ;;  %v999_v9 = vpop.f32.mrf.mxu0 }
 0x1bc   : > { %v804_v10 = vadd.f32 %v803_v8, %v2076_v4  ;;  %v1000_v11 = vadd.f32 %v999_v9, %v2076_v4  ;;  %v823_v14 = vadd.f32 %v2082_v6, %v814_v5  ;;  %v1005_v15 = vadd.f32 %v2082_v6, %v1003_v7 }
 0x1bd   : > { %v1601_v16 = vpop.f32.mrf.mxu1  ;;  %v1627_v17 = vpop.f32.mrf.mxu0 }
 0x1be   : > { %v815_v18 = vmul.f32 %v2072_v61, %v804_v10  ;;  %v1004_v19 = vmul.f32 %v2072_v61, %v1000_v11  ;;  %v827_v20 = vmul.f32 0.2, %v823_v14  ;;  %v1009_v21 = vmul.f32 0.2, %v1005_v15 }
 0x1bf   : > { %vm825_vm6 = vcmp.gt.f32.partialorder %v823_v14, 0.0  ;;  %vm1007_vm7 = vcmp.gt.f32.partialorder %v1005_v15, 0.0 }
 0x1c0   : > { %v824_v22 = vadd.f32 %v2082_v6, %v815_v18  ;;  %v1006_v23 = vadd.f32 %v2082_v6, %v1004_v19  ;;  %v829_v28 = vsel %vm825_vm6, %v823_v14, %v827_v20  ;;  %v1011_v30 = vsel %vm1007_vm7, %v1005_v15, %v1009_v21 }
 0x1c2   : > { %vm826_vm8 = vcmp.gt.f32.partialorder %v824_v22, 0.0  ;;  %v828_v24 = vmul.f32 0.2, %v824_v22  ;;  %vm1008_vm9 = vcmp.gt.f32.partialorder %v1006_v23, 0.0  ;;  %v1010_v25 = vmul.f32 0.2, %v1006_v23 }
 0x1c4   : > { %v830_v29 = vsel %vm826_vm8, %v824_v22, %v828_v24  ;;  %v1012_v31 = vsel %vm1008_vm9, %v1006_v23, %v1010_v25 }
 0x1c5   : > { %v831_v33 = vpack.c.bf16 %v830_v29, %v829_v28  ;;  %v1013_v34 = vpack.c.bf16 %v1012_v31, %v1011_v30 }
 0x1c7   : > { %1619 = vmatmul.mubr.bf16.vlgmr.msra.gmra.mxu1 %v831_v33  ;;  %1645 = vmatmul.mubr.bf16.vlgmr.msra.gmra.mxu0 %v1013_v34 }
 0x1c8   : > { %1649 = vmatpush3.bf16.msra.mxu1 %v1978_v40  ;;  %1675 = vmatpush3.bf16.msra.mxu0 %v1978_v40  ;;  %v2148_v40 = vld [vmem:[%s2193_s9] ss:$0 sm:$0xff] }
 0x1c9   : > { %1650 = vmatprep.mubr.msk.bf16.mxu1 %vm1785_vm0, %v1784_v1  ;;  %1676 = vmatprep.mubr.msk.bf16.mxu0 %vm1785_vm0, %v1784_v1 }
 0x1ca   : > { %1654 = vmatprep.subr.bf16.mxu1 %v1784_v1  ;;  %1680 = vmatprep.subr.bf16.mxu0 %v1784_v1 }
 0x1cf   : > { %1651 = vmatmul.mubr.msk.bf16.vlgmr.msra.gmra.mxu1 %vm762_vm5, %v1085_v39  ;;  %1677 = vmatmul.mubr.msk.bf16.vlgmr.msra.gmra.mxu0 %vm762_vm5, %v1212_v38 }
 0x1d0   : > { %1655 = vmatpush3.bf16.msra.mxu1 %v1987_v44  ;;  %1681 = vmatpush3.bf16.msra.mxu0 %v1987_v44 }
 0x1d1   : > { %1656 = vmatprep.subr.bf16.mxu1 %v1784_v1  ;;  %1682 = vmatprep.subr.bf16.mxu0 %v1784_v1 }
 0x1d2   : > { %1670 = vmatprep.mubr.msk.bf16.mxu1 %vm1785_vm0, %v1784_v1  ;;  %1696 = vmatprep.mubr.msk.bf16.mxu0 %vm1785_vm0, %v1784_v1 }
 0x1d4   : > { %1657 = vmatpush3.bf16.msra.mxu1 %v1998_v47  ;;  %1683 = vmatpush3.bf16.msra.mxu0 %v1998_v47 }
 0x1d5   : > { %1658 = vmatprep.subr.bf16.mxu1 %v1784_v1  ;;  %1684 = vmatprep.subr.bf16.mxu0 %v1784_v1 }
 0x1d8   : > { %1659 = vmatpush3.bf16.msra.mxu1 %v2011_v48  ;;  %1685 = vmatpush3.bf16.msra.mxu0 %v2011_v48 }
 0x1d9   : > { %1660 = vmatprep.subr.bf16.mxu1 %v1784_v1  ;;  %1686 = vmatprep.subr.bf16.mxu0 %v1784_v1 }
 0x1dc   : > { %1661 = vmatpush3.bf16.msra.mxu1 %v2020_v49  ;;  %1687 = vmatpush3.bf16.msra.mxu0 %v2020_v49 }
 0x1dd   : > { %1662 = vmatprep.subr.bf16.mxu1 %v1784_v1  ;;  %1688 = vmatprep.subr.bf16.mxu0 %v1784_v1 }
 0x1e0   : > { %1663 = vmatpush3.bf16.msra.mxu1 %v2031_v54  ;;  %1689 = vmatpush3.bf16.msra.mxu0 %v2031_v54 }
 0x1e1   : > { %1664 = vmatprep.subr.bf16.mxu1 %v1784_v1  ;;  %1690 = vmatprep.subr.bf16.mxu0 %v1784_v1 }
 0x1e4   : > { %1665 = vmatpush3.bf16.msra.mxu1 %v2040_v55  ;;  %1691 = vmatpush3.bf16.msra.mxu0 %v2040_v55 }
 0x1e5   : > { %1666 = vmatprep.subr.bf16.mxu1 %v1784_v1  ;;  %1692 = vmatprep.subr.bf16.mxu0 %v1784_v1 }
 0x1e8   : > { %1667 = vmatpush3.bf16.msra.mxu1 %v2049_v56  ;;  %1693 = vmatpush3.bf16.msra.mxu0 %v2049_v56 }
 0x1e9   : > { %1668 = vmatprep.subr.bf16.mxu1 %v1784_v1  ;;  %1694 = vmatprep.subr.bf16.mxu0 %v1784_v1 }
 0x1ec   : > { %1669 = vmatpush3.bf16.msra.mxu1 %v2058_v57  ;;  %1695 = vmatpush3.bf16.msra.mxu0 %v2058_v57 }
 0x287   : > { %v921_v41 = vpop.f32.mrf.mxu1  ;;  %v1048_v42 = vpop.f32.mrf.mxu0 }
 0x288   : > { %v922_v43 = vadd.f32 %v2148_v40, %v921_v41  ;;  %v1049_v44 = vadd.f32 %v2148_v40, %v1048_v42 }
 0x289   : > { %v1620_v45 = vpop.f32.mrf.mxu1  ;;  %v1646_v46 = vpop.f32.mrf.mxu0 }
 0x28a   : > { %v936_v50 = vmul.f32 %v922_v43, %v922_v43  ;;  %v1063_v51 = vmul.f32 %v1049_v44, %v1049_v44 }
 0x28b   : > { %v924_v47 = vpop.f32.mrf.mxu1  ;;  %v1051_v48 = vpop.f32.mrf.mxu0 }
 0x28c   : > { %v925_v1 = vadd.f32 %v2148_v40, %v924_v47  ;;  %v1052_v49 = vadd.f32 %v2148_v40, %v1051_v48 }
 0x28d   : > { %v1621_v52 = vpop.f32.mrf.mxu1  ;;  %v1647_v53 = vpop.f32.mrf.mxu0 }
 0x28e   : > { %v928_v54 = vadd.f32 %v925_v1, %v922_v43  ;;  %v937_v55 = vmul.f32 %v925_v1, %v925_v1  ;;  %v1055_v56 = vadd.f32 %v1052_v49, %v1049_v44  ;;  %v1064_v57 = vmul.f32 %v1052_v49, %v1052_v49 }
 0x28f   : > { %v1123_v58 = vpop.f32.mrf.mxu1  ;;  %v1250_v60 = vpop.f32.mrf.mxu0 }
 0x290   : > { %v929_v62 = vrot.slane %v928_v54, 4  ;;  %v938_v63 = vadd.f32 %v937_v55, %v936_v50  ;;  %v1056_v0 = vrot.slane %v1055_v56, 4  ;;  %v1065_v2 = vadd.f32 %v1064_v57, %v1063_v51 }
 0x291   : > { %v1124_v3 = vadd.f32 %v1123_v58, %v2067_v59  ;;  %v1251_v5 = vadd.f32 %v1250_v60, %v2067_v59  ;;  %v1652_v7 = vpop.f32.mrf.mxu1  ;;  %v1678_v8 = vpop.f32.mrf.mxu0 }
 0x292   : > { %v930_v9 = vadd.f32 %v929_v62, %v928_v54  ;;  %v939_v10 = vrot.slane %v938_v63, 4  ;;  %v1057_v11 = vadd.f32 %v1056_v0, %v1055_v56  ;;  %v1066_v12 = vrot.slane %v1065_v2, 4 }
 0x293   : > { %v1130_v13 = vmul.f32 %v2072_v61, %v1124_v3  ;;  %v1257_v14 = vmul.f32 %v2072_v61, %v1251_v5  ;;  %v1126_v15 = vpop.f32.mrf.mxu1  ;;  %v1253_v16 = vpop.f32.mrf.mxu0 }
 0x294   : > { %v931_v17 = vrot.slane %v930_v9, 2  ;;  %v940_v18 = vadd.f32 %v939_v10, %v938_v63  ;;  %v1058_v19 = vrot.slane %v1057_v11, 2  ;;  %v1067_v20 = vadd.f32 %v1066_v12, %v1065_v2 }
 0x295   : > { %v1132_v21 = vadd.f32 %v2082_v6, %v1130_v13  ;;  %v1127_v59 = vadd.f32 %v1126_v15, %v2076_v4  ;;  %v1254_v22 = vadd.f32 %v1253_v16, %v2076_v4  ;;  %v1653_v23 = vpop.f32.mrf.mxu1  ;;  %v1679_v24 = vpop.f32.mrf.mxu0  ;;  %v1259_v29 = vadd.f32 %v2082_v6, %v1257_v14 }
 0x296   : > { %v932_v25 = vadd.f32 %v931_v17, %v930_v9  ;;  %v941_v26 = vrot.slane %v940_v18, 2  ;;  %v1059_v27 = vadd.f32 %v1058_v19, %v1057_v11  ;;  %v1068_v28 = vrot.slane %v1067_v20, 2 }
 0x297   : > { %vm1134_vm14 = vcmp.gt.f32.partialorder %v1132_v21, 0.0  ;;  %v1131_v35 = vmul.f32 %v2072_v61, %v1127_v59  ;;  %v1258_v36 = vmul.f32 %v2072_v61, %v1254_v22  ;;  %v1136_v39 = vmul.f32 0.2, %v1132_v21 }
 0x298   : > { %v933_v30 = vrot.slane %v932_v25, 1  ;;  %v942_v31 = vadd.f32 %v941_v26, %v940_v18  ;;  %v1060_v33 = vrot.slane %v1059_v27, 1  ;;  %v1069_v34 = vadd.f32 %v1068_v28, %v1067_v20 }
 0x299   : > { %v1263_v41 = vmul.f32 0.2, %v1259_v29  ;;  %v1133_v42 = vadd.f32 %v2082_v6, %v1131_v35  ;;  %v1260_v43 = vadd.f32 %v2082_v6, %v1258_v36  ;;  %vm1261_vm15 = vcmp.gt.f32.partialorder %v1259_v29, 0.0 }
 0x29a   : > { %v934_v37 = vadd.f32 %v933_v30, %v932_v25  ;;  %v943_v32 = vrot.slane %v942_v31, 1  ;;  %v1061_v4 = vadd.f32 %v1060_v33, %v1059_v27  ;;  %v1070_v38 = vrot.slane %v1069_v34, 1 }
 0x29b   : > { %vm1135_vm0 = vcmp.gt.f32.partialorder %v1133_v42, 0.0  ;;  %v1137_v47 = vmul.f32 0.2, %v1133_v42  ;;  %vm1262_vm1 = vcmp.gt.f32.partialorder %v1260_v43, 0.0  ;;  %v1264_v48 = vmul.f32 0.2, %v1260_v43 }
 0x29c   : > { %v944_v44 = vadd.f32 %v943_v32, %v942_v31  ;;  %v1062_v45 = vadd.f32 %v1061_v4, %v934_v37  ;;  %v1071_v46 = vadd.f32 %v1070_v38, %v1069_v34  ;;  %v1138_v61 = vsel %vm1134_vm14, %v1132_v21, %v1136_v39 }
 0x29d   : > { %v1139_v49 = vsel %vm1135_vm0, %v1133_v42, %v1137_v47  ;;  %v1265_v50 = vsel %vm1261_vm15, %v1259_v29, %v1263_v41  ;;  %v1266_v51 = vsel %vm1262_vm1, %v1260_v43, %v1264_v48 }
 0x29e   : > { %v1072_v1 = vadd.f32 %v1071_v46, %v944_v44  ;;  %v1140_v52 = vpack.c.bf16 %v1139_v49, %v1138_v61  ;;  %v1267_v53 = vpack.c.bf16 %v1266_v51, %v1265_v50 }
 0x2a0   : > { %1671 = vmatmul.mubr.bf16.vlgmr.msra.gmra.mxu1 %v1140_v52  ;;  %1697 = vmatmul.mubr.bf16.vlgmr.msra.gmra.mxu0 %v1267_v53 }
 0x360   : > { %v1175_v54 = vpop.f32.mrf.mxu1  ;;  %v1302_v6 = vpop.f32.mrf.mxu0 }
 0x361   : > { %v1176_v55 = vadd.f32 %v2148_v40, %v1175_v54  ;;  %v1303_v56 = vadd.f32 %v2148_v40, %v1302_v6 }
 0x362   : > { %v1672_v57 = vpop.f32.mrf.mxu1  ;;  %v1698_v58 = vpop.f32.mrf.mxu0 }
 0x363   : > { %v1190_v2 = vmul.f32 %v1176_v55, %v1176_v55  ;;  %v1317_v3 = vmul.f32 %v1303_v56, %v1303_v56 }
 0x364   : > { %v1178_v60 = vpop.f32.mrf.mxu1  ;;  %v1305_v62 = vpop.f32.mrf.mxu0 }
 0x365   : > { %v1179_v63 = vadd.f32 %v2148_v40, %v1178_v60  ;;  %v1306_v0 = vadd.f32 %v2148_v40, %v1305_v62 }
 0x366   : > { %v1673_v5 = vpop.f32.mrf.mxu1  ;;  %v1699_v7 = vpop.f32.mrf.mxu0 }
 0x367   : > { %v1182_v8 = vadd.f32 %v1179_v63, %v1176_v55  ;;  %v1191_v9 = vmul.f32 %v1179_v63, %v1179_v63  ;;  %v1309_v10 = vadd.f32 %v1306_v0, %v1303_v56  ;;  %v1318_v11 = vmul.f32 %v1306_v0, %v1306_v0 }
 0x369   : > { %v1183_v12 = vrot.slane %v1182_v8, 4  ;;  %v1192_v13 = vadd.f32 %v1191_v9, %v1190_v2  ;;  %v1310_v14 = vrot.slane %v1309_v10, 4  ;;  %v1319_v15 = vadd.f32 %v1318_v11, %v1317_v3 }
 0x36b   : > { %v1184_v16 = vadd.f32 %v1183_v12, %v1182_v8  ;;  %v1193_v17 = vrot.slane %v1192_v13, 4  ;;  %v1311_v18 = vadd.f32 %v1310_v14, %v1309_v10  ;;  %v1320_v19 = vrot.slane %v1319_v15, 4 }
 0x36d   : > { %v1185_v20 = vrot.slane %v1184_v16, 2  ;;  %v1194_v21 = vadd.f32 %v1193_v17, %v1192_v13  ;;  %v1312_v40 = vrot.slane %v1311_v18, 2  ;;  %v1321_v59 = vadd.f32 %v1320_v19, %v1319_v15 }
 0x36f   : > { %v1186_v22 = vadd.f32 %v1185_v20, %v1184_v16  ;;  %v1195_v23 = vrot.slane %v1194_v21, 2  ;;  %v1313_v24 = vadd.f32 %v1312_v40, %v1311_v18  ;;  %v1322_v25 = vrot.slane %v1321_v59, 2 }
 0x371   : > { %v1187_v26 = vrot.slane %v1186_v22, 1  ;;  %v1196_v27 = vadd.f32 %v1195_v23, %v1194_v21  ;;  %v1323_v28 = vadd.f32 %v1322_v25, %v1321_v59  ;;  %v1314_v31 = vrot.slane %v1313_v24, 1 }
 0x373   : > { %v1188_v29 = vadd.f32 %v1187_v26, %v1186_v22  ;;  %v1197_v30 = vrot.slane %v1196_v27, 1  ;;  %v1324_v33 = vrot.slane %v1323_v28, 1  ;;  %v1315_v37 = vadd.f32 %v1314_v31, %v1313_v24 }
 0x375   : > { %v1189_v34 = vadd.f32 %v1188_v29, %v1062_v45  ;;  %v1198_v35 = vadd.f32 %v1197_v30, %v1196_v27  ;;  %v1325_v32 = vadd.f32 %v1324_v33, %v1323_v28 }
 0x377   : > { %v1199_v36 = vadd.f32 %v1198_v35, %v1072_v1  ;;  %v1316_v4 = vadd.f32 %v1315_v37, %v1189_v34 }
 0x379   : > { %v1326_v38 = vadd.f32 %v1325_v32, %v1199_v36 }
 0x37b   : > { %v1328_v39 = vsel %vm1327_vm2, %v1316_v4, %v1326_v38 }
 0x37c   : > { %1329 = vst [vmem:[%s503_s30] sm:$0x3] %v1328_v39 }
 0x37d PF: > { %s22_s23 = sadd.s32 1, %s1782_s23   ;;  %s2197_s21 = smov %s1778_s22 }
 0x37e   : > { %p19_p5 = scmp.ge.s32.totalorder %s22_s23, 4   ;;  %s2198_s22 = smov %s2200_s10 }
 0x380   :  { %21 = sbr.rel (!%p19_p5) target bundleno = 2 (0x2), region = 104 }

// kernel: gcn_encoder_forward.14
= control target key start
LH: loop header
LB: loop body
LE: loop exit
PB: predicated region body
PF: predicated region fallthrough
CT: control target
= control target key end

     0   :  { %s1861_s21 = smov 0   ;;  %s1863_s22 = smov 0   ;;  %s2230_s0 = inlined_call_operand.vmem [shape: s32[2,16,4], index: 0, kind: input, shape index: {}]   ;;  %s2231_s1 = inlined_call_operand.vmem [shape: f32[2,16,128], index: 1, kind: input, shape index: {}, may-alias: {1,2}]   ;;  %s2232_s2 = inlined_call_operand.vmem [shape: f32[2,16,128], index: 2, kind: input, shape index: {}, may-alias: {1,2}]   ;;  %s2233_s3 = inlined_call_operand.vmem [shape: bf16[128,128], index: 3, kind: input, shape index: {}]   ;;  %s2234_s4 = inlined_call_operand.vmem [shape: bf16[128,128], index: 4, kind: input, shape index: {}]   ;;  %s2235_s5 = inlined_call_operand.vmem [shape: f32[1,128], index: 5, kind: input, shape index: {}]   ;;  %s2236_s6 = inlined_call_operand.vmem [shape: f32[1,128], index: 6, kind: input, shape index: {}]   ;;  %s2237_s7 = inlined_call_operand.vmem [shape: f32[1,128], index: 7, kind: input, shape index: {}]   ;;  %s2238_s8 = inlined_call_operand.vmem [shape: bf16[128,128], index: 8, kind: input, shape index: {}]   ;;  %s2239_s9 = inlined_call_operand.vmem [shape: f32[1,128], index: 9, kind: input, shape index: {}]   ;;  %s2240_s10 = inlined_call_operand.vmem [shape: f32[1,128], index: 10, kind: input, shape index: {}]   ;;  %s2241_s11 = inlined_call_operand.vmem [shape: f32[1,128], index: 11, kind: input, shape index: {}]   ;;  %s2242_s12 = inlined_call_operand.vmem [shape: f32[2,16,128], index: 12, kind: output, shape index: {}]  }
   0x1   :  { %s1865_s23 = smov 0  }
   0x2 LB: > { %s34_s24 = sadd.s32 1, %s1784_s22  ;;  %p1443_p0 = scmp.ge.s32.totalorder %s1788_s23, 1  ;;  %s1788_s23 = sphi %s1865_s23, %s22_s23   ;;  %s1784_s22 = sphi %s1863_s22, %s2244_s22   ;;  %s1780_s21 = sphi %s1861_s21, %s2243_s21  }
   0x3   : > { %p36_p1 = scmp.ge.s32.totalorder %s34_s24, 2  ;;  %p410_p2 = scmp.lt.s32.totalorder %s1788_s23, 3 }
   0x5   : > { %s2246_s24 = smov (%p36_p1, %s34_s24), 0  ;;  %p411_p3 = pnand %p1443_p0, %p410_p2 }
   0x6   : > { %p475_p4 = scmp.lt.s32.totalorder (!%p411_p3), %s1780_s21, 1 }
   0x7   : > { %414 = sbr.rel (%p411_p3) target bundleno = 883 (0x373), region = 68 }
   0xc   : > { %v1742_v0 = vld [vmem:[%s2233_s3 + $0x38] sm:$0xff]   ;;  %v1790_v1 = vmov 0.0   ;;  %v1743_v2 = vld [vmem:[%s2233_s3 + $0x30] sm:$0xff]   ;;  %vm1791_vm0 = vmmov 0   ;;  %s2248_s21 = smov (!%p475_p4, %s1780_s21), 1  ;;  %v1792_v3 = vmov 1   ;;  %v752_v31 = vlaneseq }
   0xd   : > { %1562 = vmatprep.subr.bf16.mxu0 %v1790_v1  ;;  %1582 = vmatprep.subr.bf16.mxu1 %v1790_v1  ;;  %v1744_v4 = vld [vmem:[%s2233_s3 + $0x28] sm:$0xff]   ;;  %s1895_s13 = sshll.u32 %s2248_s21, 4  ;;  %v1793_v5 = vmov 0   ;;  %v1745_v6 = vld [vmem:[%s2233_s3 + $0x20] sm:$0xff]   ;;  %v1750_v9 = vld [vmem:[%s2234_s4 + $0x38] sm:$0xff]   ;;  %v1794_v27 = vmov 2  }
   0xe   : > { %1563 = vmatpush3.bf16.msra.mxu0 %v1742_v0  ;;  %1578 = vmatprep.mubr.msk.bf16.mxu0 %vm1791_vm0, %v1790_v1  ;;  %s482_s16 = scalar_lea.vmem %s2230_s0, %s1895_s13  ;;  %v1751_v10 = vld [vmem:[%s2234_s4 + $0x30] sm:$0xff]   ;;  %v1746_v11 = vld [vmem:[%s2233_s3 + $0x18] sm:$0xff]   ;;  %v1752_v12 = vld [vmem:[%s2234_s4 + $0x28] sm:$0xff]   ;;  %s488_s21 = scalar_lea.vmem %s2231_s1, %s1895_s13  ;;  %v1795_v28 = vmov 3   ;;  %v1979_v32 = vand.u32 127, %v752_v31  ;;  %vm767_vm5 = vcmask 130048  }
   0xf   : > { %1564 = vmatprep.subr.bf16.mxu0 %v1790_v1  ;;  %1598 = vmatprep.mubr.msk.bf16.mxu1 %vm1791_vm0, %v1790_v1  ;;  %v1905_v7 = vld [vmem:[%s482_s16] sm:$0xff]  ;;  %v1909_v8 = vld [vmem:[%s482_s16 + $0x8] sm:$0xff]  ;;  %v1747_v13 = vld [vmem:[%s2233_s3 + $0x10] sm:$0xff]   ;;  %s497_s20 = scalar_lea.vmem %s2232_s2, %s1895_s13  ;;  %s507_s26 = scalar_lea.vmem %s2242_s12, %s1895_s13 }
  0x10   : > { %1737 = vset.pattern.permute.xlu1 %v1792_v3  ;;  %1736 = vset.pattern.permute.xlu0 %v1793_v5  ;;  %v1753_v14 = vld [vmem:[%s2234_s4 + $0x20] sm:$0xff]   ;;  %v1748_v15 = vld [vmem:[%s2233_s3 + $0x8] sm:$0xff]   ;;  %v1754_v16 = vld [vmem:[%s2234_s4 + $0x18] sm:$0xff]  }
  0x11   : > { %958 = vperm.xlu1 %1737, %v1905_v7   ;;  %755 = vperm.xlu0 %1736, %v1905_v7   ;;  %v1749_v17 = vld [vmem:[%s2233_s3] sm:$0xff]   ;;  %v513_v19 = vld [vmem:[%s488_s21 + $0x8] sm:$0xff]  ;;  %v1755_v20 = vld [vmem:[%s2234_s4 + $0x10] sm:$0xff]  }
  0x12   : > { %1565 = vmatpush3.bf16.msra.mxu0 %v1743_v2  ;;  %1583 = vmatpush3.bf16.msra.mxu1 %v1750_v9  ;;  %v512_v18 = vld [vmem:[%s488_s21] sm:$0xff]  ;;  %v1756_v22 = vld [vmem:[%s2234_s4 + $0x8] sm:$0xff]   ;;  %v1996_v44 = vld [vmem:[%s2238_s8 + $0x38] sm:$0xff]  }
  0x13   : > { %1566 = vmatprep.subr.bf16.mxu0 %v1790_v1  ;;  %1584 = vmatprep.subr.bf16.mxu1 %v1790_v1  ;;  %v514_v21 = vpack.c.bf16 %v513_v19, %v512_v18  ;;  %v1757_v23 = vld [vmem:[%s2234_s4] sm:$0xff]   ;;  %v516_v25 = vld [vmem:[%s497_s20 + $0x8] sm:$0xff]  ;;  %v2007_v47 = vld [vmem:[%s2238_s8 + $0x30] sm:$0xff]  }
  0x14   : > { %v515_v24 = vld [vmem:[%s497_s20] sm:$0xff]  ;;  %v2020_v48 = vld [vmem:[%s2238_s8 + $0x28] sm:$0xff]   ;;  %v2040_v54 = vld [vmem:[%s2238_s8 + $0x18] sm:$0xff]  }
  0x15   : > { %961 = vperm.xlu1 %1737, %v1909_v8   ;;  %758 = vperm.xlu0 %1736, %v1909_v8   ;;  %v517_v26 = vpack.c.bf16 %v516_v25, %v515_v24  ;;  %v2029_v49 = vld [vmem:[%s2238_s8 + $0x20] sm:$0xff]   ;;  %v2049_v55 = vld [vmem:[%s2238_s8 + $0x10] sm:$0xff]   ;;  %v2058_v56 = vld [vmem:[%s2238_s8 + $0x8] sm:$0xff]  }
  0x16   : > { %1567 = vmatpush3.bf16.msra.mxu0 %v1744_v4  ;;  %1585 = vmatpush3.bf16.msra.mxu1 %v1751_v10  ;;  %v2067_v57 = vld [vmem:[%s2238_s8] sm:$0xff]  }
  0x17   : > { %1568 = vmatprep.subr.bf16.mxu0 %v1790_v1  ;;  %1586 = vmatprep.subr.bf16.mxu1 %v1790_v1  ;;  %v1460_v58 = vld [vmem:[%s2235_s5] ss:$0 sm:$0xff] }
  0x18   : > { %v2081_v61 = vld [vmem:[%s2236_s6] ss:$0 sm:$0xff] }
  0x19   : > { %1739 = vset.pattern.permute.xlu1 %v1794_v27  ;;  %1738 = vset.pattern.permute.xlu0 %v1794_v27 }
  0x1a   : > { %1569 = vmatpush3.bf16.msra.mxu0 %v1745_v6  ;;  %1587 = vmatpush3.bf16.msra.mxu1 %v1752_v12  ;;  %v2091_v6 = vld [vmem:[%s2237_s7] ss:$0 sm:$0xff] }
  0x1b   : > { %1570 = vmatprep.subr.bf16.mxu0 %v1790_v1  ;;  %1588 = vmatprep.subr.bf16.mxu1 %v1790_v1 }
  0x1c   : > { %1082 = vperm.xlu1 %1739, %v1909_v8   ;;  %1079 = vperm.xlu0 %1738, %v1905_v7  }
  0x1e   : > { %1571 = vmatpush3.bf16.msra.mxu0 %v1746_v11  ;;  %1589 = vmatpush3.bf16.msra.mxu1 %v1753_v14 }
  0x1f   : > { %1572 = vmatprep.subr.bf16.mxu0 %v1790_v1  ;;  %1590 = vmatprep.subr.bf16.mxu1 %v1790_v1 }
  0x20   : > { %1740 = vset.pattern.permute.xlu1 %v1795_v28  ;;  %1741 = vset.pattern.permute.xlu0 %v1795_v28 }
  0x21   : > { %1200 = vperm.xlu1 %1740, %v1905_v7   ;;  %1203 = vperm.xlu0 %1741, %v1909_v8  }
  0x22   : > { %1573 = vmatpush3.bf16.msra.mxu0 %v1747_v13  ;;  %1591 = vmatpush3.bf16.msra.mxu1 %v1754_v16 }
  0x23   : > { %1574 = vmatprep.subr.bf16.mxu0 %v1790_v1  ;;  %1592 = vmatprep.subr.bf16.mxu1 %v1790_v1 }
  0x26   : > { %1575 = vmatpush3.bf16.msra.mxu0 %v1748_v15  ;;  %1593 = vmatpush3.bf16.msra.mxu1 %v1755_v20 }
  0x27   : > { %1576 = vmatprep.subr.bf16.mxu0 %v1790_v1  ;;  %1594 = vmatprep.subr.bf16.mxu1 %v1790_v1 }
  0x2a   : > { %1577 = vmatpush3.bf16.msra.mxu0 %v1749_v17  ;;  %1595 = vmatpush3.bf16.msra.mxu1 %v1756_v22 }
  0x2b   : > { %1628 = vmatprep.subr.bf16.mxu0 %v1790_v1  ;;  %1596 = vmatprep.subr.bf16.mxu1 %v1790_v1 }
  0x2d   : > { %1579 = vmatmul.mubr.bf16.vlgmr.msra.gmra.mxu0 %v514_v21 }
  0x2e   : > { %1630 = vmatprep.mubr.msk.bf16.mxu0 %vm1791_vm0, %v1790_v1  ;;  %1597 = vmatpush3.bf16.msra.mxu1 %v1757_v23 }
  0x2f   : > { %1602 = vmatprep.subr.bf16.mxu1 %v1790_v1 }
  0x31   : > { %1599 = vmatmul.mubr.bf16.vlgmr.msra.gmra.mxu1 %v517_v26 }
  0x32   : > { %1604 = vmatprep.mubr.msk.bf16.mxu1 %vm1791_vm0, %v1790_v1 }
  0x8c   : > { %v959_v29 = vpop.permute.xlu1 %958  ;;  %v756_v30 = vpop.permute.xlu0 %755 }
  0x8d   : > { %vm963_vm1 = vcmp.eq.s32.totalorder %v1979_v32, %v959_v29  ;;  %vm760_vm2 = vcmp.eq.s32.totalorder %v1979_v32, %v756_v30 }
  0x8e   : > { %v1485_v37 = vsel %vm963_vm1, 1.0, %v1790_v1  ;;  %v1469_v39 = vsel %vm760_vm2, 1.0, %v1790_v1 }
  0x90   : > { %v962_v33 = vpop.permute.xlu1 %961  ;;  %v759_v34 = vpop.permute.xlu0 %758 }
  0x91   : > { %vm964_vm3 = vcmp.eq.s32.totalorder %v1979_v32, %v962_v33  ;;  %vm761_vm4 = vcmp.eq.s32.totalorder %v1979_v32, %v759_v34 }
  0x92   : > { %v1486_v41 = vsel %vm964_vm3, 1.0, %v1790_v1  ;;  %v1470_v42 = vsel %vm761_vm4, 1.0, %v1790_v1 }
  0x93   : > { %v969_v45 = vpack.c.bf16 %v1486_v41, %v1485_v37  ;;  %v766_v46 = vpack.c.bf16 %v1470_v42, %v1469_v39  ;;  %v2162_v42 = vld [vmem:[%s2240_s10] ss:$0 sm:$0xff] }
  0x97   : > { %v1083_v12 = vpop.permute.xlu1 %1082  ;;  %v1080_v13 = vpop.permute.xlu0 %1079 }
  0x98   : > { %vm1085_vm12 = vcmp.eq.s32.totalorder %v1979_v32, %v1083_v12  ;;  %vm1084_vm13 = vcmp.eq.s32.totalorder %v1979_v32, %v1080_v13 }
  0x99   : > { %v1489_v37 = vsel %vm1085_vm12, 1.0, %v1790_v1 }
  0x9c   : > { %v1201_v26 = vpop.permute.xlu1 %1200  ;;  %v1204_v27 = vpop.permute.xlu0 %1203 }
  0x9d   : > { %vm1205_vm10 = vcmp.eq.s32.totalorder %v1979_v32, %v1201_v26  ;;  %vm1206_vm11 = vcmp.eq.s32.totalorder %v1979_v32, %v1204_v27  ;;  %v1488_v32 = vsel %vm1084_vm13, 1.0, %v1790_v1 }
  0x9e   : > { %v1090_v39 = vpack.c.bf16 %v1489_v37, %v1488_v32 }
  0xed   : > { %v632_v35 = vpop.f32.mrf.mxu0 }
  0xef   : > { %v1580_v36 = vpop.f32.mrf.mxu0 }
  0xf0   : > { %v1492_v36 = vsel %vm1206_vm11, 1.0, %v1790_v1 }
  0xf1   : > { %v635_v38 = vpop.f32.mrf.mxu0  ;;  %v745_v50 = vpop.f32.mrf.mxu1 }
  0xf2   : > { %v1987_v40 = vpack.c.bf16 %v635_v38, %v632_v35  ;;  %v2076_v59 = vadd.f32 %v1460_v58, %v745_v50  ;;  %v1491_v35 = vsel %vm1205_vm10, 1.0, %v1790_v1 }
  0xf3   : > { %v1581_v43 = vpop.f32.mrf.mxu0  ;;  %v1600_v51 = vpop.f32.mrf.mxu1  ;;  %v1211_v38 = vpack.c.bf16 %v1492_v36, %v1491_v35 }
  0xf4   : > { %1603 = vmatpush3.bf16.msra.mxu1 %v1987_v40  ;;  %1629 = vmatpush3.bf16.msra.mxu0 %v1987_v40 }
  0xf5   : > { %1608 = vmatprep.subr.bf16.mxu1 %v1790_v1  ;;  %1634 = vmatprep.subr.bf16.mxu0 %v1790_v1  ;;  %v748_v52 = vpop.f32.mrf.mxu1 }
  0xf6   : > { %v2085_v4 = vadd.f32 %v1460_v58, %v748_v52 }
  0xf7   : > { %1605 = vmatmul.mubr.msk.bf16.vlgmr.msra.gmra.mxu1 %vm767_vm5, %v766_v46  ;;  %1631 = vmatmul.mubr.msk.bf16.vlgmr.msra.gmra.mxu0 %vm767_vm5, %v969_v45  ;;  %v1601_v53 = vpop.f32.mrf.mxu1  ;;  %v2169_v45 = vld [vmem:[%s2241_s11] ss:$0 sm:$0xff] }
  0xf8   : > { %1609 = vmatpush3.bf16.msra.mxu1 %v1996_v44  ;;  %1635 = vmatpush3.bf16.msra.mxu0 %v1996_v44 }
  0xf9   : > { %1610 = vmatprep.subr.bf16.mxu1 %v1790_v1  ;;  %1636 = vmatprep.subr.bf16.mxu0 %v1790_v1 }
  0xfa   : > { %1650 = vmatprep.mubr.msk.bf16.mxu0 %vm1791_vm0, %v1790_v1  ;;  %1624 = vmatprep.mubr.msk.bf16.mxu1 %vm1791_vm0, %v1790_v1 }
  0xfc   : > { %1611 = vmatpush3.bf16.msra.mxu1 %v2007_v47  ;;  %1637 = vmatpush3.bf16.msra.mxu0 %v2007_v47 }
  0xfd   : > { %1612 = vmatprep.subr.bf16.mxu1 %v1790_v1  ;;  %1638 = vmatprep.subr.bf16.mxu0 %v1790_v1 }
 0x100   : > { %1613 = vmatpush3.bf16.msra.mxu1 %v2020_v48  ;;  %1639 = vmatpush3.bf16.msra.mxu0 %v2020_v48 }
 0x101   : > { %1614 = vmatprep.subr.bf16.mxu1 %v1790_v1  ;;  %1640 = vmatprep.subr.bf16.mxu0 %v1790_v1 }
 0x104   : > { %1615 = vmatpush3.bf16.msra.mxu1 %v2029_v49  ;;  %1641 = vmatpush3.bf16.msra.mxu0 %v2029_v49 }
 0x105   : > { %1616 = vmatprep.subr.bf16.mxu1 %v1790_v1  ;;  %1642 = vmatprep.subr.bf16.mxu0 %v1790_v1 }
 0x108   : > { %1617 = vmatpush3.bf16.msra.mxu1 %v2040_v54  ;;  %1643 = vmatpush3.bf16.msra.mxu0 %v2040_v54 }
 0x109   : > { %1618 = vmatprep.subr.bf16.mxu1 %v1790_v1  ;;  %1644 = vmatprep.subr.bf16.mxu0 %v1790_v1 }
 0x10c   : > { %1619 = vmatpush3.bf16.msra.mxu1 %v2049_v55  ;;  %1645 = vmatpush3.bf16.msra.mxu0 %v2049_v55 }
 0x10d   : > { %1620 = vmatprep.subr.bf16.mxu1 %v1790_v1  ;;  %1646 = vmatprep.subr.bf16.mxu0 %v1790_v1 }
 0x110   : > { %1621 = vmatpush3.bf16.msra.mxu1 %v2058_v56  ;;  %1647 = vmatpush3.bf16.msra.mxu0 %v2058_v56 }
 0x111   : > { %1622 = vmatprep.subr.bf16.mxu1 %v1790_v1  ;;  %1648 = vmatprep.subr.bf16.mxu0 %v1790_v1 }
 0x114   : > { %1623 = vmatpush3.bf16.msra.mxu1 %v2067_v57  ;;  %1649 = vmatpush3.bf16.msra.mxu0 %v2067_v57 }
 0x115   : > { %1680 = vmatprep.subr.bf16.mxu0 %v1790_v1  ;;  %1654 = vmatprep.subr.bf16.mxu1 %v1790_v1 }
 0x1b7   : > { %v805_v60 = vpop.f32.mrf.mxu1  ;;  %v1007_v62 = vpop.f32.mrf.mxu0 }
 0x1b8   : > { %v806_v63 = vadd.f32 %v805_v60, %v2076_v59  ;;  %v1008_v0 = vadd.f32 %v1007_v62, %v2076_v59 }
 0x1b9   : > { %v1606_v2 = vpop.f32.mrf.mxu1  ;;  %v1632_v3 = vpop.f32.mrf.mxu0 }
 0x1ba   : > { %v819_v5 = vmul.f32 %v2081_v61, %v806_v63  ;;  %v1014_v7 = vmul.f32 %v2081_v61, %v1008_v0 }
 0x1bb   : > { %v808_v8 = vpop.f32.mrf.mxu1  ;;  %v1010_v9 = vpop.f32.mrf.mxu0 }
 0x1bc   : > { %v809_v10 = vadd.f32 %v808_v8, %v2085_v4  ;;  %v1011_v11 = vadd.f32 %v1010_v9, %v2085_v4  ;;  %v828_v14 = vadd.f32 %v2091_v6, %v819_v5  ;;  %v1016_v15 = vadd.f32 %v2091_v6, %v1014_v7 }
 0x1bd   : > { %v1607_v16 = vpop.f32.mrf.mxu1  ;;  %v1633_v17 = vpop.f32.mrf.mxu0 }
 0x1be   : > { %v820_v18 = vmul.f32 %v2081_v61, %v809_v10  ;;  %v1015_v19 = vmul.f32 %v2081_v61, %v1011_v11  ;;  %v832_v20 = vmul.f32 0.2, %v828_v14  ;;  %v1020_v21 = vmul.f32 0.2, %v1016_v15 }
 0x1bf   : > { %vm830_vm6 = vcmp.gt.f32.partialorder %v828_v14, 0.0  ;;  %vm1018_vm7 = vcmp.gt.f32.partialorder %v1016_v15, 0.0 }
 0x1c0   : > { %v829_v22 = vadd.f32 %v2091_v6, %v820_v18  ;;  %v1017_v23 = vadd.f32 %v2091_v6, %v1015_v19  ;;  %v834_v28 = vsel %vm830_vm6, %v828_v14, %v832_v20  ;;  %v1022_v30 = vsel %vm1018_vm7, %v1016_v15, %v1020_v21 }
 0x1c2   : > { %vm831_vm8 = vcmp.gt.f32.partialorder %v829_v22, 0.0  ;;  %v833_v24 = vmul.f32 0.2, %v829_v22  ;;  %vm1019_vm9 = vcmp.gt.f32.partialorder %v1017_v23, 0.0  ;;  %v1021_v25 = vmul.f32 0.2, %v1017_v23 }
 0x1c4   : > { %v835_v29 = vsel %vm831_vm8, %v829_v22, %v833_v24  ;;  %v1023_v31 = vsel %vm1019_vm9, %v1017_v23, %v1021_v25 }
 0x1c5   : > { %v836_v33 = vpack.c.bf16 %v835_v29, %v834_v28  ;;  %v1024_v34 = vpack.c.bf16 %v1023_v31, %v1022_v30 }
 0x1c7   : > { %1625 = vmatmul.mubr.bf16.vlgmr.msra.gmra.mxu1 %v836_v33  ;;  %1651 = vmatmul.mubr.bf16.vlgmr.msra.gmra.mxu0 %v1024_v34 }
 0x1c8   : > { %1655 = vmatpush3.bf16.msra.mxu1 %v1987_v40  ;;  %1681 = vmatpush3.bf16.msra.mxu0 %v1987_v40  ;;  %v2157_v40 = vld [vmem:[%s2239_s9] ss:$0 sm:$0xff] }
 0x1c9   : > { %1656 = vmatprep.mubr.msk.bf16.mxu1 %vm1791_vm0, %v1790_v1  ;;  %1682 = vmatprep.mubr.msk.bf16.mxu0 %vm1791_vm0, %v1790_v1 }
 0x1ca   : > { %1660 = vmatprep.subr.bf16.mxu1 %v1790_v1  ;;  %1686 = vmatprep.subr.bf16.mxu0 %v1790_v1 }
 0x1cf   : > { %1657 = vmatmul.mubr.msk.bf16.vlgmr.msra.gmra.mxu1 %vm767_vm5, %v1090_v39  ;;  %1683 = vmatmul.mubr.msk.bf16.vlgmr.msra.gmra.mxu0 %vm767_vm5, %v1211_v38 }
 0x1d0   : > { %1661 = vmatpush3.bf16.msra.mxu1 %v1996_v44  ;;  %1687 = vmatpush3.bf16.msra.mxu0 %v1996_v44 }
 0x1d1   : > { %1662 = vmatprep.subr.bf16.mxu1 %v1790_v1  ;;  %1688 = vmatprep.subr.bf16.mxu0 %v1790_v1 }
 0x1d2   : > { %1676 = vmatprep.mubr.msk.bf16.mxu1 %vm1791_vm0, %v1790_v1  ;;  %1702 = vmatprep.mubr.msk.bf16.mxu0 %vm1791_vm0, %v1790_v1 }
 0x1d4   : > { %1663 = vmatpush3.bf16.msra.mxu1 %v2007_v47  ;;  %1689 = vmatpush3.bf16.msra.mxu0 %v2007_v47 }
 0x1d5   : > { %1664 = vmatprep.subr.bf16.mxu1 %v1790_v1  ;;  %1690 = vmatprep.subr.bf16.mxu0 %v1790_v1 }
 0x1d8   : > { %1665 = vmatpush3.bf16.msra.mxu1 %v2020_v48  ;;  %1691 = vmatpush3.bf16.msra.mxu0 %v2020_v48 }
 0x1d9   : > { %1666 = vmatprep.subr.bf16.mxu1 %v1790_v1  ;;  %1692 = vmatprep.subr.bf16.mxu0 %v1790_v1 }
 0x1dc   : > { %1667 = vmatpush3.bf16.msra.mxu1 %v2029_v49  ;;  %1693 = vmatpush3.bf16.msra.mxu0 %v2029_v49 }
 0x1dd   : > { %1668 = vmatprep.subr.bf16.mxu1 %v1790_v1  ;;  %1694 = vmatprep.subr.bf16.mxu0 %v1790_v1 }
 0x1e0   : > { %1669 = vmatpush3.bf16.msra.mxu1 %v2040_v54  ;;  %1695 = vmatpush3.bf16.msra.mxu0 %v2040_v54 }
 0x1e1   : > { %1670 = vmatprep.subr.bf16.mxu1 %v1790_v1  ;;  %1696 = vmatprep.subr.bf16.mxu0 %v1790_v1 }
 0x1e4   : > { %1671 = vmatpush3.bf16.msra.mxu1 %v2049_v55  ;;  %1697 = vmatpush3.bf16.msra.mxu0 %v2049_v55 }
 0x1e5   : > { %1672 = vmatprep.subr.bf16.mxu1 %v1790_v1  ;;  %1698 = vmatprep.subr.bf16.mxu0 %v1790_v1 }
 0x1e8   : > { %1673 = vmatpush3.bf16.msra.mxu1 %v2058_v56  ;;  %1699 = vmatpush3.bf16.msra.mxu0 %v2058_v56 }
 0x1e9   : > { %1674 = vmatprep.subr.bf16.mxu1 %v1790_v1  ;;  %1700 = vmatprep.subr.bf16.mxu0 %v1790_v1 }
 0x1ec   : > { %1675 = vmatpush3.bf16.msra.mxu1 %v2067_v57  ;;  %1701 = vmatpush3.bf16.msra.mxu0 %v2067_v57 }
 0x287   : > { %v926_v41 = vpop.f32.mrf.mxu1  ;;  %v1059_v43 = vpop.f32.mrf.mxu0 }
 0x288   : > { %v927_v44 = vadd.f32 %v2157_v40, %v926_v41  ;;  %v1060_v1 = vadd.f32 %v2157_v40, %v1059_v43 }
 0x289   : > { %v1626_v46 = vpop.f32.mrf.mxu1  ;;  %v1652_v47 = vpop.f32.mrf.mxu0 }
 0x28a   : > { %v940_v48 = vmul.f32 %v2162_v42, %v927_v44  ;;  %v1066_v49 = vmul.f32 %v2162_v42, %v1060_v1 }
 0x28b   : > { %v929_v50 = vpop.f32.mrf.mxu1  ;;  %v1062_v51 = vpop.f32.mrf.mxu0 }
 0x28c   : > { %v949_v52 = vadd.f32 %v2169_v45, %v940_v48  ;;  %v1068_v53 = vadd.f32 %v2169_v45, %v1066_v49  ;;  %v930_v54 = vadd.f32 %v2157_v40, %v929_v50  ;;  %v1063_v55 = vadd.f32 %v2157_v40, %v1062_v51 }
 0x28d   : > { %v1627_v56 = vpop.f32.mrf.mxu1  ;;  %v1653_v57 = vpop.f32.mrf.mxu0 }
 0x28e   : > { %vm951_vm14 = vcmp.gt.f32.partialorder %v949_v52, 0.0  ;;  %v953_v58 = vmul.f32 0.2, %v949_v52  ;;  %vm1070_vm15 = vcmp.gt.f32.partialorder %v1068_v53, 0.0  ;;  %v1072_v60 = vmul.f32 0.2, %v1068_v53 }
 0x28f   : > { %v941_v62 = vmul.f32 %v2162_v42, %v930_v54  ;;  %v1067_v63 = vmul.f32 %v2162_v42, %v1063_v55  ;;  %v1128_v0 = vpop.f32.mrf.mxu1  ;;  %v1249_v2 = vpop.f32.mrf.mxu0 }
 0x290   : > { %v2179_v3 = vsel %vm951_vm14, %v949_v52, %v953_v58  ;;  %v2181_v5 = vsel %vm1070_vm15, %v1068_v53, %v1072_v60  ;;  %v1129_v7 = vadd.f32 %v1128_v0, %v2076_v59  ;;  %v1250_v8 = vadd.f32 %v1249_v2, %v2076_v59 }
 0x291   : > { %v1076_v9 = vmax.f32 %v2179_v3, %v2181_v5  ;;  %v950_v10 = vadd.f32 %v2169_v45, %v941_v62  ;;  %v1069_v11 = vadd.f32 %v2169_v45, %v1067_v63  ;;  %v1658_v12 = vpop.f32.mrf.mxu1  ;;  %v1684_v13 = vpop.f32.mrf.mxu0 }
 0x292   : > { %v1135_v14 = vmul.f32 %v2081_v61, %v1129_v7  ;;  %v1256_v15 = vmul.f32 %v2081_v61, %v1250_v8 }
 0x293   : > { %vm952_vm0 = vcmp.gt.f32.partialorder %v950_v10, 0.0  ;;  %v954_v16 = vmul.f32 0.2, %v950_v10  ;;  %vm1071_vm1 = vcmp.gt.f32.partialorder %v1069_v11, 0.0  ;;  %v1073_v17 = vmul.f32 0.2, %v1069_v11  ;;  %v1131_v18 = vpop.f32.mrf.mxu1  ;;  %v1252_v19 = vpop.f32.mrf.mxu0 }
 0x294   : > { %v1132_v59 = vadd.f32 %v1131_v18, %v2085_v4  ;;  %v1253_v20 = vadd.f32 %v1252_v19, %v2085_v4  ;;  %v1137_v23 = vadd.f32 %v2091_v6, %v1135_v14  ;;  %v1258_v24 = vadd.f32 %v2091_v6, %v1256_v15 }
 0x295   : > { %v2193_v21 = vsel %vm952_vm0, %v950_v10, %v954_v16  ;;  %v1075_v22 = vsel %vm1071_vm1, %v1069_v11, %v1073_v17  ;;  %v1659_v25 = vpop.f32.mrf.mxu1  ;;  %v1685_v26 = vpop.f32.mrf.mxu0 }
 0x296   : > { %v1077_v27 = vmax.f32 %v2193_v21, %v1075_v22  ;;  %v1136_v28 = vmul.f32 %v2081_v61, %v1132_v59  ;;  %v1257_v29 = vmul.f32 %v2081_v61, %v1253_v20  ;;  %v1141_v30 = vmul.f32 0.2, %v1137_v23 }
 0x297   : > { %v1262_v31 = vmul.f32 0.2, %v1258_v24  ;;  %vm1139_vm2 = vcmp.gt.f32.partialorder %v1137_v23, 0.0  ;;  %vm1260_vm3 = vcmp.gt.f32.partialorder %v1258_v24, 0.0 }
 0x298   : > { %v1138_v33 = vadd.f32 %v2091_v6, %v1136_v28  ;;  %v1259_v4 = vadd.f32 %v2091_v6, %v1257_v29  ;;  %v1143_v36 = vsel %vm1139_vm2, %v1137_v23, %v1141_v30 }
 0x299   : > { %v1264_v32 = vsel %vm1260_vm3, %v1258_v24, %v1262_v31 }
 0x29a   : > { %vm1140_vm4 = vcmp.gt.f32.partialorder %v1138_v33, 0.0  ;;  %v1142_v34 = vmul.f32 0.2, %v1138_v33  ;;  %vm1261_vm5 = vcmp.gt.f32.partialorder %v1259_v4, 0.0  ;;  %v1263_v35 = vmul.f32 0.2, %v1259_v4 }
 0x29c   : > { %v1144_v37 = vsel %vm1140_vm4, %v1138_v33, %v1142_v34  ;;  %v1265_v38 = vsel %vm1261_vm5, %v1259_v4, %v1263_v35 }
 0x29d   : > { %v1145_v39 = vpack.c.bf16 %v1144_v37, %v1143_v36  ;;  %v1266_v41 = vpack.c.bf16 %v1265_v38, %v1264_v32 }
 0x29f   : > { %1677 = vmatmul.mubr.bf16.vlgmr.msra.gmra.mxu1 %v1145_v39  ;;  %1703 = vmatmul.mubr.bf16.vlgmr.msra.gmra.mxu0 %v1266_v41 }
 0x35f   : > { %v1180_v61 = vpop.f32.mrf.mxu1  ;;  %v1301_v43 = vpop.f32.mrf.mxu0 }
 0x360   : > { %v1181_v44 = vadd.f32 %v2157_v40, %v1180_v61  ;;  %v1302_v6 = vadd.f32 %v2157_v40, %v1301_v43 }
 0x361   : > { %v1678_v1 = vpop.f32.mrf.mxu1  ;;  %v1704_v46 = vpop.f32.mrf.mxu0 }
 0x362   : > { %v1187_v47 = vmul.f32 %v2162_v42, %v1181_v44  ;;  %v1308_v48 = vmul.f32 %v2162_v42, %v1302_v6 }
 0x363   : > { %v1183_v49 = vpop.f32.mrf.mxu1  ;;  %v1304_v50 = vpop.f32.mrf.mxu0 }
 0x364   : > { %v1189_v51 = vadd.f32 %v2169_v45, %v1187_v47  ;;  %v1310_v52 = vadd.f32 %v2169_v45, %v1308_v48  ;;  %v1184_v53 = vadd.f32 %v2157_v40, %v1183_v49  ;;  %v1305_v54 = vadd.f32 %v2157_v40, %v1304_v50 }
 0x365   : > { %v1679_v55 = vpop.f32.mrf.mxu1  ;;  %v1705_v56 = vpop.f32.mrf.mxu0 }
 0x366   : > { %vm1191_vm6 = vcmp.gt.f32.partialorder %v1189_v51, 0.0  ;;  %v1193_v57 = vmul.f32 0.2, %v1189_v51  ;;  %v1314_v58 = vmul.f32 0.2, %v1310_v52  ;;  %vm1312_vm7 = vcmp.gt.f32.partialorder %v1310_v52, 0.0 }
 0x367   : > { %v1188_v60 = vmul.f32 %v2162_v42, %v1184_v53  ;;  %v1309_v62 = vmul.f32 %v2162_v42, %v1305_v54 }
 0x368   : > { %v1195_v63 = vsel %vm1191_vm6, %v1189_v51, %v1193_v57  ;;  %v1316_v40 = vsel %vm1312_vm7, %v1310_v52, %v1314_v58 }
 0x369   : > { %v1197_v0 = vmax.f32 %v1076_v9, %v1195_v63  ;;  %v1190_v2 = vadd.f32 %v2169_v45, %v1188_v60  ;;  %v1311_v7 = vadd.f32 %v2169_v45, %v1309_v62 }
 0x36b   : > { %v1318_v8 = vmax.f32 %v1197_v0, %v1316_v40  ;;  %vm1192_vm8 = vcmp.gt.f32.partialorder %v1190_v2, 0.0  ;;  %v1194_v10 = vmul.f32 0.2, %v1190_v2  ;;  %vm1313_vm9 = vcmp.gt.f32.partialorder %v1311_v7, 0.0 }
 0x36c   : > { %v1315_v11 = vmul.f32 0.2, %v1311_v7 }
 0x36d   : > { %1320 = vst [vmem:[%s507_s26] sm:$0xff] %v1318_v8  ;;  %v1196_v42 = vsel %vm1192_vm8, %v1190_v2, %v1194_v10 }
 0x36e   : > { %v1198_v12 = vmax.f32 %v1077_v27, %v1196_v42  ;;  %v1317_v13 = vsel %vm1313_vm9, %v1311_v7, %v1315_v11 }
 0x370   : > { %v1319_v3 = vmax.f32 %v1198_v12, %v1317_v13 }
 0x372   : > { %1321 = vst [vmem:[%s507_s26 + $0x8] sm:$0xff] %v1319_v3 }
 0x373 PF: > { %s22_s23 = sadd.s32 1, %s1788_s23   ;;  %s2243_s21 = smov %s1784_s22 }
 0x374   : > { %p19_p5 = scmp.ge.s32.totalorder %s22_s23, 4   ;;  %s2244_s22 = smov %s2246_s24 }
 0x376   :  { %21 = sbr.rel (!%p19_p5) target bundleno = 2 (0x2), region = 104 }

// kernel: gcn_encoder_forward.19
= control target key start
LH: loop header
LB: loop body
LE: loop exit
PB: predicated region body
PF: predicated region fallthrough
CT: control target
= control target key end

     0   :  { %s1014_s17 = smov 0   ;;  %s1016_s5 = smov 0   ;;  %s1109_s0 = inlined_call_operand.vmem [shape: f32[2,16,128], index: 0, kind: input, shape index: {}]   ;;  %s1110_s1 = inlined_call_operand.vmem [shape: f32[2,16,128], index: 1, kind: input, shape index: {}]   ;;  %s1111_s2 = inlined_call_operand.vmem [shape: bf16[128,128], index: 2, kind: input, shape index: {}]   ;;  %s1112_s3 = inlined_call_operand.vmem [shape: bf16[128,128], index: 3, kind: input, shape index: {}]   ;;  %s1113_s4 = inlined_call_operand.vmem [shape: f32[1,128], index: 4, kind: input, shape index: {}]   ;;  %s1114_s5 = inlined_call_operand.vmem [shape: f32[1,128], index: 5, kind: input, shape index: {}, may-alias: {5,6,9,10}]   ;;  %s1115_s6 = inlined_call_operand.vmem [shape: f32[1,128], index: 6, kind: input, shape index: {}, may-alias: {5,6,9,10}]   ;;  %s1116_s7 = inlined_call_operand.vmem [shape: bf16[128,128], index: 7, kind: input, shape index: {}]   ;;  %s1117_s8 = inlined_call_operand.vmem [shape: f32[1,128], index: 8, kind: input, shape index: {}]   ;;  %s1118_s9 = inlined_call_operand.vmem [shape: f32[1,128], index: 9, kind: input, shape index: {}, may-alias: {5,6,9,10}]   ;;  %s1119_s10 = inlined_call_operand.vmem [shape: f32[1,128], index: 10, kind: input, shape index: {}, may-alias: {5,6,9,10}]   ;;  %s1120_s11 = inlined_call_operand.vmem [shape: f32[2,1,2,128], index: 11, kind: output, shape index: {}]  }
   0x1   :  { %s1018_s6 = smov 0  }
   0x2 LB: > { %s33_s7 = sadd.s32 1, %s946_s5  ;;  %p801_p0 = scmp.ge.s32.totalorder %s950_s6, 1  ;;  %s950_s6 = sphi %s1018_s6, %s21_s6   ;;  %s946_s5 = sphi %s1016_s5, %s1122_s5   ;;  %s942_s17 = sphi %s1014_s17, %s1121_s17  }
   0x3   : > { %p35_p1 = scmp.ge.s32.totalorder %s33_s7, 2  ;;  %p375_p2 = scmp.lt.s32.totalorder %s950_s6, 3 }
   0x5   : > { %s1124_s7 = smov (%p35_p1, %s33_s7), 0  ;;  %p376_p3 = pnand %p801_p0, %p375_p2 }
   0x6   : > { %p431_p4 = scmp.lt.s32.totalorder (!%p376_p3), %s942_s17, 1 }
   0x7   : > { %379 = sbr.rel (%p376_p3) target bundleno = 265 (0x109), region = 64 }
   0xc   : > { %v912_v0 = vld [vmem:[%s1112_s3 + $0x38] sm:$0xff]   ;;  %v952_v1 = vmov 0.0   ;;  %v914_v3 = vld [vmem:[%s1112_s3 + $0x30] sm:$0xff]   ;;  %vm953_vm0 = vmmov 0   ;;  %v916_v5 = vld [vmem:[%s1112_s3 + $0x28] sm:$0xff]   ;;  %s1126_s17 = smov (!%p431_p4, %s942_s17), 1 }
   0xd   : > { %846 = vmatprep.subr.bf16.mxu0 %v952_v1  ;;  %866 = vmatprep.subr.bf16.mxu1 %v952_v1  ;;  %v913_v2 = vld [vmem:[%s1111_s2 + $0x38] sm:$0xff]   ;;  %v915_v4 = vld [vmem:[%s1111_s2 + $0x30] sm:$0xff]   ;;  %v917_v6 = vld [vmem:[%s1111_s2 + $0x28] sm:$0xff]   ;;  %s826_s18 = sshll.u32 %s1126_s17, 4  ;;  %s806_s16 = sshll.u32 %s1126_s17, 1  ;;  %vm699_vm1 = vcmask 1040384  }
   0xe   : > { %847 = vmatpush3.bf16.msra.mxu0 %v912_v0  ;;  %862 = vmatprep.mubr.msk.bf16.mxu0 %vm953_vm0, %v952_v1  ;;  %v918_v7 = vld [vmem:[%s1112_s3 + $0x20] sm:$0xff]   ;;  %v920_v9 = vld [vmem:[%s1112_s3 + $0x18] sm:$0xff]   ;;  %v922_v11 = vld [vmem:[%s1112_s3 + $0x10] sm:$0xff]   ;;  %s448_s25 = scalar_lea.vmem %s1110_s1, %s826_s18  ;;  %s438_s28 = scalar_lea.vmem %s1109_s0, %s826_s18 }
   0xf   : > { %867 = vmatpush3.bf16.msra.mxu1 %v913_v2  ;;  %848 = vmatprep.subr.bf16.mxu0 %v952_v1  ;;  %v919_v8 = vld [vmem:[%s1111_s2 + $0x20] sm:$0xff]   ;;  %v921_v10 = vld [vmem:[%s1111_s2 + $0x18] sm:$0xff]   ;;  %v923_v12 = vld [vmem:[%s1111_s2 + $0x10] sm:$0xff]   ;;  %s456_s10 = scalar_lea.vmem %s1120_s11, %s806_s16 }
  0x10   : > { %868 = vmatprep.subr.bf16.mxu1 %v952_v1  ;;  %882 = vmatprep.mubr.msk.bf16.mxu1 %vm953_vm0, %v952_v1  ;;  %v924_v13 = vld [vmem:[%s1112_s3 + $0x8] sm:$0xff]   ;;  %v926_v15 = vld [vmem:[%s1112_s3] sm:$0xff]  }
  0x11   : > { %v925_v14 = vld [vmem:[%s1111_s2 + $0x8] sm:$0xff]   ;;  %v461_v16 = vld [vmem:[%s448_s25] sm:$0xff] }
  0x12   : > { %849 = vmatpush3.bf16.msra.mxu0 %v914_v3  ;;  %v462_v17 = vld [vmem:[%s448_s25 + $0x8] sm:$0xff]  ;;  %v927_v18 = vld [vmem:[%s1111_s2] sm:$0xff]  }
  0x13   : > { %869 = vmatpush3.bf16.msra.mxu1 %v915_v4  ;;  %850 = vmatprep.subr.bf16.mxu0 %v952_v1  ;;  %v458_v19 = vld [vmem:[%s438_s28] sm:$0xff]  ;;  %v459_v20 = vld [vmem:[%s438_s28 + $0x8] sm:$0xff]  ;;  %v463_v21 = vpack.c.bf16 %v462_v17, %v461_v16 }
  0x14   : > { %870 = vmatprep.subr.bf16.mxu1 %v952_v1  ;;  %v460_v22 = vpack.c.bf16 %v459_v20, %v458_v19  ;;  %v823_v27 = vld [vmem:[%s1113_s4] ss:$0 sm:$0xff] }
  0x16   : > { %851 = vmatpush3.bf16.msra.mxu0 %v916_v5 }
  0x17   : > { %871 = vmatpush3.bf16.msra.mxu1 %v917_v6  ;;  %852 = vmatprep.subr.bf16.mxu0 %v952_v1 }
  0x18   : > { %872 = vmatprep.subr.bf16.mxu1 %v952_v1 }
  0x1a   : > { %853 = vmatpush3.bf16.msra.mxu0 %v918_v7 }
  0x1b   : > { %873 = vmatpush3.bf16.msra.mxu1 %v919_v8  ;;  %854 = vmatprep.subr.bf16.mxu0 %v952_v1 }
  0x1c   : > { %874 = vmatprep.subr.bf16.mxu1 %v952_v1 }
  0x1e   : > { %855 = vmatpush3.bf16.msra.mxu0 %v920_v9 }
  0x1f   : > { %875 = vmatpush3.bf16.msra.mxu1 %v921_v10  ;;  %856 = vmatprep.subr.bf16.mxu0 %v952_v1 }
  0x20   : > { %876 = vmatprep.subr.bf16.mxu1 %v952_v1 }
  0x22   : > { %857 = vmatpush3.bf16.msra.mxu0 %v922_v11 }
  0x23   : > { %877 = vmatpush3.bf16.msra.mxu1 %v923_v12  ;;  %858 = vmatprep.subr.bf16.mxu0 %v952_v1 }
  0x24   : > { %878 = vmatprep.subr.bf16.mxu1 %v952_v1 }
  0x26   : > { %859 = vmatpush3.bf16.msra.mxu0 %v924_v13 }
  0x27   : > { %879 = vmatpush3.bf16.msra.mxu1 %v925_v14  ;;  %860 = vmatprep.subr.bf16.mxu0 %v952_v1 }
  0x28   : > { %880 = vmatprep.subr.bf16.mxu1 %v952_v1 }
  0x2a   : > { %861 = vmatpush3.bf16.msra.mxu0 %v926_v15 }
  0x2b   : > { %881 = vmatpush3.bf16.msra.mxu1 %v927_v18 }
  0x2d   : > { %863 = vmatmul.mubr.bf16.vlgmr.msra.gmra.mxu0 %v463_v21 }
  0x2e   : > { %883 = vmatmul.mubr.bf16.vlgmr.msra.gmra.mxu1 %v460_v22 }
  0xed   : > { %v578_v23 = vpop.f32.mrf.mxu0 }
  0xee   : > { %v667_v24 = vpop.f32.mrf.mxu1 }
  0xef   : > { %v668_v25 = vadd.f32 %v667_v24, %v578_v23  ;;  %v864_v26 = vpop.f32.mrf.mxu0 }
  0xf0   : > { %v884_v28 = vpop.f32.mrf.mxu1 }
  0xf1   : > { %v581_v29 = vpop.f32.mrf.mxu0  ;;  %v681_v31 = vadd.f32 %v823_v27, %v668_v25 }
  0xf2   : > { %v670_v30 = vpop.f32.mrf.mxu1 }
  0xf3   : > { %v671_v32 = vadd.f32 %v670_v30, %v581_v29  ;;  %v865_v33 = vpop.f32.mrf.mxu0  ;;  %v690_v36 = vmul.f32 %v681_v31, %v681_v31 }
  0xf4   : > { %v885_v34 = vpop.f32.mrf.mxu1 }
  0xf5   : > { %v682_v35 = vadd.f32 %v823_v27, %v671_v32 }
  0xf7   : > { %v683_v37 = vadd.f32 %v682_v35, %v681_v31  ;;  %v691_v38 = vmul.f32 %v682_v35, %v682_v35 }
  0xf9   : > { %v684_v39 = vrot.slane %v683_v37, 4  ;;  %v692_v40 = vadd.f32 %v691_v38, %v690_v36 }
  0xfb   : > { %v685_v41 = vadd.f32 %v684_v39, %v683_v37  ;;  %v693_v42 = vrot.slane %v692_v40, 4 }
  0xfd   : > { %v686_v43 = vrot.slane %v685_v41, 2  ;;  %v694_v44 = vadd.f32 %v693_v42, %v692_v40 }
  0xff   : > { %v687_v45 = vadd.f32 %v686_v43, %v685_v41  ;;  %v695_v46 = vrot.slane %v694_v44, 2 }
 0x101   : > { %v688_v47 = vrot.slane %v687_v45, 1  ;;  %v696_v48 = vadd.f32 %v695_v46, %v694_v44 }
 0x103   : > { %v697_v49 = vrot.slane %v696_v48, 1  ;;  %v689_v50 = vadd.f32 %v688_v47, %v687_v45 }
 0x105   : > { %v698_v51 = vadd.f32 %v697_v49, %v696_v48 }
 0x107   : > { %v700_v52 = vsel %vm699_vm1, %v689_v50, %v698_v51 }
 0x108   : > { %701 = vst [vmem:[%s456_s10] sm:$0x3] %v700_v52 }
 0x109 PF: > { %s21_s6 = sadd.s32 1, %s950_s6   ;;  %s1121_s17 = smov %s946_s5 }
 0x10a   : > { %p18_p5 = scmp.ge.s32.totalorder %s21_s6, 4   ;;  %s1122_s5 = smov %s1124_s7 }
 0x10c   :  { %20 = sbr.rel (!%p18_p5) target bundleno = 2 (0x2), region = 97 }

// kernel: gcn_encoder_forward.20
= control target key start
LH: loop header
LB: loop body
LE: loop exit
PB: predicated region body
PF: predicated region fallthrough
CT: control target
= control target key end

     0   :  { %s1199_s17 = smov 0   ;;  %s1201_s18 = smov 0   ;;  %s1357_s0 = inlined_call_operand.vmem [shape: f32[2,16,128], index: 0, kind: input, shape index: {}]   ;;  %s1358_s1 = inlined_call_operand.vmem [shape: f32[2,16,128], index: 1, kind: input, shape index: {}]   ;;  %s1359_s2 = inlined_call_operand.vmem [shape: bf16[128,128], index: 2, kind: input, shape index: {}]   ;;  %s1360_s3 = inlined_call_operand.vmem [shape: bf16[128,128], index: 3, kind: input, shape index: {}]   ;;  %s1361_s4 = inlined_call_operand.vmem [shape: f32[1,128], index: 4, kind: input, shape index: {}]   ;;  %s1362_s5 = inlined_call_operand.vmem [shape: f32[1,128], index: 5, kind: input, shape index: {}]   ;;  %s1363_s6 = inlined_call_operand.vmem [shape: f32[1,128], index: 6, kind: input, shape index: {}]   ;;  %s1364_s7 = inlined_call_operand.vmem [shape: bf16[128,128], index: 7, kind: input, shape index: {}]   ;;  %s1365_s8 = inlined_call_operand.vmem [shape: f32[1,128], index: 8, kind: input, shape index: {}]   ;;  %s1366_s9 = inlined_call_operand.vmem [shape: f32[1,128], index: 9, kind: input, shape index: {}, may-alias: {9,10}]   ;;  %s1367_s10 = inlined_call_operand.vmem [shape: f32[1,128], index: 10, kind: input, shape index: {}, may-alias: {9,10}]   ;;  %s1368_s11 = inlined_call_operand.vmem [shape: f32[2,1,2,128], index: 11, kind: output, shape index: {}]  }
   0x1   :  { %s1203_s19 = smov 0  }
   0x2 LB: > { %s33_s9 = sadd.s32 1, %s1131_s18  ;;  %p938_p0 = scmp.ge.s32.totalorder %s1135_s19, 1  ;;  %s1135_s19 = sphi %s1203_s19, %s21_s19   ;;  %s1131_s18 = sphi %s1201_s18, %s1370_s18   ;;  %s1127_s17 = sphi %s1199_s17, %s1369_s17  }
   0x3   : > { %p35_p1 = scmp.ge.s32.totalorder %s33_s9, 2  ;;  %p375_p2 = scmp.lt.s32.totalorder %s1135_s19, 3 }
   0x5   : > { %s1372_s9 = smov (%p35_p1, %s33_s9), 0  ;;  %p376_p3 = pnand %p938_p0, %p375_p2 }
   0x6   : > { %p431_p4 = scmp.lt.s32.totalorder (!%p376_p3), %s1127_s17, 1 }
   0x7   : > { %379 = sbr.rel (%p376_p3) target bundleno = 473 (0x1d9), region = 64 }
   0xc   : > { %v1089_v0 = vld [vmem:[%s1360_s3 + $0x38] sm:$0xff]   ;;  %v1137_v1 = vmov 0.0   ;;  %v1091_v3 = vld [vmem:[%s1360_s3 + $0x30] sm:$0xff]   ;;  %vm1138_vm0 = vmmov 0   ;;  %v1093_v5 = vld [vmem:[%s1360_s3 + $0x28] sm:$0xff]   ;;  %s1374_s17 = smov (!%p431_p4, %s1127_s17), 1 }
   0xd   : > { %1003 = vmatprep.subr.bf16.mxu0 %v1137_v1  ;;  %1023 = vmatprep.subr.bf16.mxu1 %v1137_v1  ;;  %v1090_v2 = vld [vmem:[%s1359_s2 + $0x38] sm:$0xff]   ;;  %v1092_v4 = vld [vmem:[%s1359_s2 + $0x30] sm:$0xff]   ;;  %v1094_v6 = vld [vmem:[%s1359_s2 + $0x28] sm:$0xff]   ;;  %s974_s28 = sshll.u32 %s1374_s17, 4  ;;  %s943_s12 = sshll.u32 %s1374_s17, 1  ;;  %vm836_vm3 = vcmask 1040384  }
   0xe   : > { %1004 = vmatpush3.bf16.msra.mxu0 %v1089_v0  ;;  %1019 = vmatprep.mubr.msk.bf16.mxu0 %vm1138_vm0, %v1137_v1  ;;  %v1095_v7 = vld [vmem:[%s1360_s3 + $0x20] sm:$0xff]   ;;  %v1097_v9 = vld [vmem:[%s1360_s3 + $0x18] sm:$0xff]   ;;  %v1099_v11 = vld [vmem:[%s1360_s3 + $0x10] sm:$0xff]   ;;  %s448_s14 = scalar_lea.vmem %s1358_s1, %s974_s28  ;;  %s438_s10 = scalar_lea.vmem %s1357_s0, %s974_s28 }
   0xf   : > { %1024 = vmatpush3.bf16.msra.mxu1 %v1090_v2  ;;  %1005 = vmatprep.subr.bf16.mxu0 %v1137_v1  ;;  %v1096_v8 = vld [vmem:[%s1359_s2 + $0x20] sm:$0xff]   ;;  %v1098_v10 = vld [vmem:[%s1359_s2 + $0x18] sm:$0xff]   ;;  %v1100_v12 = vld [vmem:[%s1359_s2 + $0x10] sm:$0xff]   ;;  %s456_s15 = scalar_lea.vmem %s1368_s11, %s943_s12 }
  0x10   : > { %1025 = vmatprep.subr.bf16.mxu1 %v1137_v1  ;;  %1039 = vmatprep.mubr.msk.bf16.mxu1 %vm1138_vm0, %v1137_v1  ;;  %v1101_v13 = vld [vmem:[%s1360_s3 + $0x8] sm:$0xff]   ;;  %v1103_v15 = vld [vmem:[%s1360_s3] sm:$0xff]   ;;  %v1105_v23 = vld [vmem:[%s1364_s7 + $0x38] sm:$0xff]  }
  0x11   : > { %v1102_v14 = vld [vmem:[%s1359_s2 + $0x8] sm:$0xff]   ;;  %v461_v16 = vld [vmem:[%s448_s14] sm:$0xff]  ;;  %v1106_v24 = vld [vmem:[%s1364_s7 + $0x30] sm:$0xff]  }
  0x12   : > { %1006 = vmatpush3.bf16.msra.mxu0 %v1091_v3  ;;  %v462_v17 = vld [vmem:[%s448_s14 + $0x8] sm:$0xff]  ;;  %v1104_v18 = vld [vmem:[%s1359_s2] sm:$0xff]   ;;  %v1109_v27 = vld [vmem:[%s1364_s7 + $0x18] sm:$0xff]  }
  0x13   : > { %1026 = vmatpush3.bf16.msra.mxu1 %v1092_v4  ;;  %1007 = vmatprep.subr.bf16.mxu0 %v1137_v1  ;;  %v458_v19 = vld [vmem:[%s438_s10] sm:$0xff]  ;;  %v459_v20 = vld [vmem:[%s438_s10 + $0x8] sm:$0xff]  ;;  %v463_v21 = vpack.c.bf16 %v462_v17, %v461_v16  ;;  %v1110_v28 = vld [vmem:[%s1364_s7 + $0x10] sm:$0xff]  }
  0x14   : > { %1027 = vmatprep.subr.bf16.mxu1 %v1137_v1  ;;  %v460_v22 = vpack.c.bf16 %v459_v20, %v458_v19  ;;  %v1107_v25 = vld [vmem:[%s1364_s7 + $0x28] sm:$0xff]   ;;  %v1108_v26 = vld [vmem:[%s1364_s7 + $0x20] sm:$0xff]  }
  0x15   : > { %v1111_v29 = vld [vmem:[%s1364_s7 + $0x8] sm:$0xff]   ;;  %v1112_v30 = vld [vmem:[%s1364_s7] sm:$0xff]  }
  0x16   : > { %1008 = vmatpush3.bf16.msra.mxu0 %v1093_v5  ;;  %v960_v33 = vld [vmem:[%s1361_s4] ss:$0 sm:$0xff] }
  0x17   : > { %1028 = vmatpush3.bf16.msra.mxu1 %v1094_v6  ;;  %1009 = vmatprep.subr.bf16.mxu0 %v1137_v1  ;;  %v961_v36 = vld [vmem:[%s1362_s5] ss:$0 sm:$0xff] }
  0x18   : > { %1029 = vmatprep.subr.bf16.mxu1 %v1137_v1  ;;  %v962_v40 = vld [vmem:[%s1363_s6] ss:$0 sm:$0xff] }
  0x19   : > { %v963_v55 = vld [vmem:[%s1365_s8] ss:$0 sm:$0xff] }
  0x1a   : > { %1010 = vmatpush3.bf16.msra.mxu0 %v1095_v7 }
  0x1b   : > { %1030 = vmatpush3.bf16.msra.mxu1 %v1096_v8  ;;  %1011 = vmatprep.subr.bf16.mxu0 %v1137_v1 }
  0x1c   : > { %1031 = vmatprep.subr.bf16.mxu1 %v1137_v1 }
  0x1e   : > { %1012 = vmatpush3.bf16.msra.mxu0 %v1097_v9 }
  0x1f   : > { %1032 = vmatpush3.bf16.msra.mxu1 %v1098_v10  ;;  %1013 = vmatprep.subr.bf16.mxu0 %v1137_v1 }
  0x20   : > { %1033 = vmatprep.subr.bf16.mxu1 %v1137_v1 }
  0x22   : > { %1014 = vmatpush3.bf16.msra.mxu0 %v1099_v11 }
  0x23   : > { %1034 = vmatpush3.bf16.msra.mxu1 %v1100_v12  ;;  %1015 = vmatprep.subr.bf16.mxu0 %v1137_v1 }
  0x24   : > { %1035 = vmatprep.subr.bf16.mxu1 %v1137_v1 }
  0x26   : > { %1016 = vmatpush3.bf16.msra.mxu0 %v1101_v13 }
  0x27   : > { %1036 = vmatpush3.bf16.msra.mxu1 %v1102_v14  ;;  %1017 = vmatprep.subr.bf16.mxu0 %v1137_v1 }
  0x28   : > { %1037 = vmatprep.subr.bf16.mxu1 %v1137_v1 }
  0x2a   : > { %1018 = vmatpush3.bf16.msra.mxu0 %v1103_v15 }
  0x2b   : > { %1038 = vmatpush3.bf16.msra.mxu1 %v1104_v18  ;;  %1043 = vmatprep.subr.bf16.mxu0 %v1137_v1 }
  0x2d   : > { %1020 = vmatmul.mubr.bf16.vlgmr.msra.gmra.mxu0 %v463_v21 }
  0x2e   : > { %1040 = vmatmul.mubr.bf16.vlgmr.msra.gmra.mxu1 %v460_v22  ;;  %1044 = vmatpush3.bf16.msra.mxu0 %v1105_v23 }
  0x2f   : > { %1045 = vmatprep.subr.bf16.mxu0 %v1137_v1  ;;  %1059 = vmatprep.mubr.msk.bf16.mxu0 %vm1138_vm0, %v1137_v1 }
  0x32   : > { %1046 = vmatpush3.bf16.msra.mxu0 %v1106_v24 }
  0x33   : > { %1047 = vmatprep.subr.bf16.mxu0 %v1137_v1 }
  0x36   : > { %1048 = vmatpush3.bf16.msra.mxu0 %v1107_v25 }
  0x37   : > { %1049 = vmatprep.subr.bf16.mxu0 %v1137_v1 }
  0x3a   : > { %1050 = vmatpush3.bf16.msra.mxu0 %v1108_v26 }
  0x3b   : > { %1051 = vmatprep.subr.bf16.mxu0 %v1137_v1 }
  0x3e   : > { %1052 = vmatpush3.bf16.msra.mxu0 %v1109_v27 }
  0x3f   : > { %1053 = vmatprep.subr.bf16.mxu0 %v1137_v1 }
  0x42   : > { %1054 = vmatpush3.bf16.msra.mxu0 %v1110_v28 }
  0x43   : > { %1055 = vmatprep.subr.bf16.mxu0 %v1137_v1 }
  0x46   : > { %1056 = vmatpush3.bf16.msra.mxu0 %v1111_v29 }
  0x47   : > { %1057 = vmatprep.subr.bf16.mxu0 %v1137_v1 }
  0x4a   : > { %1058 = vmatpush3.bf16.msra.mxu0 %v1112_v30 }
  0xed   : > { %v578_v31 = vpop.f32.mrf.mxu0 }
  0xee   : > { %v667_v32 = vpop.f32.mrf.mxu1 }
  0xef   : > { %v668_v34 = vadd.f32 %v667_v32, %v578_v31  ;;  %v1021_v35 = vpop.f32.mrf.mxu0 }
  0xf0   : > { %v1041_v37 = vpop.f32.mrf.mxu1 }
  0xf1   : > { %v681_v38 = vadd.f32 %v960_v33, %v668_v34  ;;  %v581_v39 = vpop.f32.mrf.mxu0 }
  0xf2   : > { %v670_v41 = vpop.f32.mrf.mxu1 }
  0xf3   : > { %v690_v42 = vmul.f32 %v961_v36, %v681_v38  ;;  %v671_v43 = vadd.f32 %v670_v41, %v581_v39  ;;  %v1022_v44 = vpop.f32.mrf.mxu0 }
  0xf4   : > { %v1042_v45 = vpop.f32.mrf.mxu1 }
  0xf5   : > { %v699_v46 = vadd.f32 %v962_v40, %v690_v42  ;;  %v682_v47 = vadd.f32 %v960_v33, %v671_v43 }
  0xf7   : > { %v691_v48 = vmul.f32 %v961_v36, %v682_v47  ;;  %v703_v49 = vmul.f32 0.2, %v699_v46  ;;  %vm701_vm1 = vcmp.gt.f32.partialorder %v699_v46, 0.0 }
  0xf9   : > { %v700_v50 = vadd.f32 %v962_v40, %v691_v48  ;;  %v705_v52 = vsel %vm701_vm1, %v699_v46, %v703_v49 }
  0xfb   : > { %v704_v51 = vmul.f32 0.2, %v700_v50  ;;  %vm702_vm2 = vcmp.gt.f32.partialorder %v700_v50, 0.0 }
  0xfd   : > { %v706_v53 = vsel %vm702_vm2, %v700_v50, %v704_v51 }
  0xfe   : > { %v707_v54 = vpack.c.bf16 %v706_v53, %v705_v52 }
 0x100   : > { %1060 = vmatmul.mubr.bf16.vlgmr.msra.gmra.mxu0 %v707_v54 }
 0x1c0   : > { %v813_v56 = vpop.f32.mrf.mxu0 }
 0x1c1   : > { %v814_v58 = vadd.f32 %v963_v55, %v813_v56 }
 0x1c2   : > { %v1061_v57 = vpop.f32.mrf.mxu0 }
 0x1c3   : > { %v827_v62 = vmul.f32 %v814_v58, %v814_v58 }
 0x1c4   : > { %v816_v59 = vpop.f32.mrf.mxu0 }
 0x1c5   : > { %v817_v60 = vadd.f32 %v963_v55, %v816_v59 }
 0x1c6   : > { %v1062_v61 = vpop.f32.mrf.mxu0 }
 0x1c7   : > { %v820_v63 = vadd.f32 %v817_v60, %v814_v58  ;;  %v828_v0 = vmul.f32 %v817_v60, %v817_v60 }
 0x1c9   : > { %v821_v1 = vrot.slane %v820_v63, 4  ;;  %v829_v2 = vadd.f32 %v828_v0, %v827_v62 }
 0x1cb   : > { %v822_v3 = vadd.f32 %v821_v1, %v820_v63  ;;  %v830_v4 = vrot.slane %v829_v2, 4 }
 0x1cd   : > { %v823_v5 = vrot.slane %v822_v3, 2  ;;  %v831_v6 = vadd.f32 %v830_v4, %v829_v2 }
 0x1cf   : > { %v824_v7 = vadd.f32 %v823_v5, %v822_v3  ;;  %v832_v8 = vrot.slane %v831_v6, 2 }
 0x1d1   : > { %v825_v9 = vrot.slane %v824_v7, 1  ;;  %v833_v10 = vadd.f32 %v832_v8, %v831_v6 }
 0x1d3   : > { %v834_v11 = vrot.slane %v833_v10, 1  ;;  %v826_v12 = vadd.f32 %v825_v9, %v824_v7 }
 0x1d5   : > { %v835_v13 = vadd.f32 %v834_v11, %v833_v10 }
 0x1d7   : > { %v837_v14 = vsel %vm836_vm3, %v826_v12, %v835_v13 }
 0x1d8   : > { %838 = vst [vmem:[%s456_s15] sm:$0x3] %v837_v14 }
 0x1d9 PF: > { %s21_s19 = sadd.s32 1, %s1135_s19   ;;  %s1369_s17 = smov %s1131_s18 }
 0x1da   : > { %p18_p5 = scmp.ge.s32.totalorder %s21_s19, 4   ;;  %s1370_s18 = smov %s1372_s9 }
 0x1dc   :  { %20 = sbr.rel (!%p18_p5) target bundleno = 2 (0x2), region = 97 }

// kernel: gcn_encoder_forward.21
= control target key start
LH: loop header
LB: loop body
LE: loop exit
PB: predicated region body
PF: predicated region fallthrough
CT: control target
= control target key end

     0   :  { %s1225_s17 = smov 0   ;;  %s1227_s18 = smov 0   ;;  %s1390_s0 = inlined_call_operand.vmem [shape: f32[2,16,128], index: 0, kind: input, shape index: {}]   ;;  %s1391_s1 = inlined_call_operand.vmem [shape: f32[2,16,128], index: 1, kind: input, shape index: {}]   ;;  %s1392_s2 = inlined_call_operand.vmem [shape: bf16[128,128], index: 2, kind: input, shape index: {}]   ;;  %s1393_s3 = inlined_call_operand.vmem [shape: bf16[128,128], index: 3, kind: input, shape index: {}]   ;;  %s1394_s4 = inlined_call_operand.vmem [shape: f32[1,128], index: 4, kind: input, shape index: {}]   ;;  %s1395_s5 = inlined_call_operand.vmem [shape: f32[1,128], index: 5, kind: input, shape index: {}]   ;;  %s1396_s6 = inlined_call_operand.vmem [shape: f32[1,128], index: 6, kind: input, shape index: {}]   ;;  %s1397_s7 = inlined_call_operand.vmem [shape: bf16[128,128], index: 7, kind: input, shape index: {}]   ;;  %s1398_s8 = inlined_call_operand.vmem [shape: f32[1,128], index: 8, kind: input, shape index: {}]   ;;  %s1399_s9 = inlined_call_operand.vmem [shape: f32[1,128], index: 9, kind: input, shape index: {}]   ;;  %s1400_s10 = inlined_call_operand.vmem [shape: f32[1,128], index: 10, kind: input, shape index: {}]   ;;  %s1401_s11 = inlined_call_operand.vmem [shape: f32[2,16,128], index: 11, kind: output, shape index: {}]  }
   0x1   :  { %s1229_s19 = smov 0  }
   0x2 LB: > { %s33_s20 = sadd.s32 1, %s1157_s18  ;;  %p960_p0 = scmp.ge.s32.totalorder %s1161_s19, 1  ;;  %s1161_s19 = sphi %s1229_s19, %s21_s19   ;;  %s1157_s18 = sphi %s1227_s18, %s1403_s18   ;;  %s1153_s17 = sphi %s1225_s17, %s1402_s17  }
   0x3   : > { %p35_p1 = scmp.ge.s32.totalorder %s33_s20, 2  ;;  %p375_p2 = scmp.lt.s32.totalorder %s1161_s19, 3 }
   0x5   : > { %s1405_s20 = smov (%p35_p1, %s33_s20), 0  ;;  %p376_p3 = pnand %p960_p0, %p375_p2 }
   0x6   : > { %p433_p4 = scmp.lt.s32.totalorder (!%p376_p3), %s1153_s17, 1 }
   0x7   : > { %379 = sbr.rel (%p376_p3) target bundleno = 463 (0x1cf), region = 64 }
   0xc   : > { %v1115_v0 = vld [vmem:[%s1393_s3 + $0x38] sm:$0xff]   ;;  %v1163_v1 = vmov 0.0   ;;  %v1117_v3 = vld [vmem:[%s1393_s3 + $0x30] sm:$0xff]   ;;  %vm1164_vm0 = vmmov 0   ;;  %v1119_v5 = vld [vmem:[%s1393_s3 + $0x28] sm:$0xff]   ;;  %s1407_s17 = smov (!%p433_p4, %s1153_s17), 1 }
   0xd   : > { %1029 = vmatprep.subr.bf16.mxu0 %v1163_v1  ;;  %1049 = vmatprep.subr.bf16.mxu1 %v1163_v1  ;;  %v1116_v2 = vld [vmem:[%s1392_s2 + $0x38] sm:$0xff]   ;;  %v1118_v4 = vld [vmem:[%s1392_s2 + $0x30] sm:$0xff]   ;;  %v1120_v6 = vld [vmem:[%s1392_s2 + $0x28] sm:$0xff]   ;;  %s1302_s13 = sshll.u32 %s1407_s17, 4 }
   0xe   : > { %1030 = vmatpush3.bf16.msra.mxu0 %v1115_v0  ;;  %1045 = vmatprep.mubr.msk.bf16.mxu0 %vm1164_vm0, %v1163_v1  ;;  %v1121_v7 = vld [vmem:[%s1393_s3 + $0x20] sm:$0xff]   ;;  %v1123_v9 = vld [vmem:[%s1393_s3 + $0x18] sm:$0xff]   ;;  %v1125_v11 = vld [vmem:[%s1393_s3 + $0x10] sm:$0xff]   ;;  %s450_s22 = scalar_lea.vmem %s1391_s1, %s1302_s13  ;;  %s440_s17 = scalar_lea.vmem %s1390_s0, %s1302_s13 }
   0xf   : > { %1050 = vmatpush3.bf16.msra.mxu1 %v1116_v2  ;;  %1031 = vmatprep.subr.bf16.mxu0 %v1163_v1  ;;  %v1122_v8 = vld [vmem:[%s1392_s2 + $0x20] sm:$0xff]   ;;  %v1124_v10 = vld [vmem:[%s1392_s2 + $0x18] sm:$0xff]   ;;  %v1126_v12 = vld [vmem:[%s1392_s2 + $0x10] sm:$0xff]   ;;  %s460_s29 = scalar_lea.vmem %s1401_s11, %s1302_s13 }
  0x10   : > { %1051 = vmatprep.subr.bf16.mxu1 %v1163_v1  ;;  %1065 = vmatprep.mubr.msk.bf16.mxu1 %vm1164_vm0, %v1163_v1  ;;  %v1127_v13 = vld [vmem:[%s1393_s3 + $0x8] sm:$0xff]   ;;  %v1129_v15 = vld [vmem:[%s1393_s3] sm:$0xff]   ;;  %v1131_v23 = vld [vmem:[%s1397_s7 + $0x38] sm:$0xff]  }
  0x11   : > { %v1128_v14 = vld [vmem:[%s1392_s2 + $0x8] sm:$0xff]   ;;  %v466_v16 = vld [vmem:[%s450_s22] sm:$0xff]  ;;  %v1132_v24 = vld [vmem:[%s1397_s7 + $0x30] sm:$0xff]  }
  0x12   : > { %1032 = vmatpush3.bf16.msra.mxu0 %v1117_v3  ;;  %v467_v17 = vld [vmem:[%s450_s22 + $0x8] sm:$0xff]  ;;  %v1130_v18 = vld [vmem:[%s1392_s2] sm:$0xff]   ;;  %v1135_v27 = vld [vmem:[%s1397_s7 + $0x18] sm:$0xff]  }
  0x13   : > { %1052 = vmatpush3.bf16.msra.mxu1 %v1118_v4  ;;  %1033 = vmatprep.subr.bf16.mxu0 %v1163_v1  ;;  %v463_v19 = vld [vmem:[%s440_s17] sm:$0xff]  ;;  %v464_v20 = vld [vmem:[%s440_s17 + $0x8] sm:$0xff]  ;;  %v468_v21 = vpack.c.bf16 %v467_v17, %v466_v16  ;;  %v1136_v28 = vld [vmem:[%s1397_s7 + $0x10] sm:$0xff]  }
  0x14   : > { %1053 = vmatprep.subr.bf16.mxu1 %v1163_v1  ;;  %v465_v22 = vpack.c.bf16 %v464_v20, %v463_v19  ;;  %v1133_v25 = vld [vmem:[%s1397_s7 + $0x28] sm:$0xff]   ;;  %v1134_v26 = vld [vmem:[%s1397_s7 + $0x20] sm:$0xff]  }
  0x15   : > { %v1137_v29 = vld [vmem:[%s1397_s7 + $0x8] sm:$0xff]   ;;  %v1138_v30 = vld [vmem:[%s1397_s7] sm:$0xff]  }
  0x16   : > { %1034 = vmatpush3.bf16.msra.mxu0 %v1119_v5  ;;  %v983_v33 = vld [vmem:[%s1394_s4] ss:$0 sm:$0xff] }
  0x17   : > { %1054 = vmatpush3.bf16.msra.mxu1 %v1120_v6  ;;  %1035 = vmatprep.subr.bf16.mxu0 %v1163_v1  ;;  %v984_v36 = vld [vmem:[%s1395_s5] ss:$0 sm:$0xff] }
  0x18   : > { %1055 = vmatprep.subr.bf16.mxu1 %v1163_v1  ;;  %v985_v40 = vld [vmem:[%s1396_s6] ss:$0 sm:$0xff] }
  0x19   : > { %v986_v55 = vld [vmem:[%s1398_s8] ss:$0 sm:$0xff] }
  0x1a   : > { %1036 = vmatpush3.bf16.msra.mxu0 %v1121_v7  ;;  %v995_v57 = vld [vmem:[%s1399_s9] ss:$0 sm:$0xff] }
  0x1b   : > { %1056 = vmatpush3.bf16.msra.mxu1 %v1122_v8  ;;  %1037 = vmatprep.subr.bf16.mxu0 %v1163_v1  ;;  %v996_v59 = vld [vmem:[%s1400_s10] ss:$0 sm:$0xff] }
  0x1c   : > { %1057 = vmatprep.subr.bf16.mxu1 %v1163_v1 }
  0x1e   : > { %1038 = vmatpush3.bf16.msra.mxu0 %v1123_v9 }
  0x1f   : > { %1058 = vmatpush3.bf16.msra.mxu1 %v1124_v10  ;;  %1039 = vmatprep.subr.bf16.mxu0 %v1163_v1 }
  0x20   : > { %1059 = vmatprep.subr.bf16.mxu1 %v1163_v1 }
  0x22   : > { %1040 = vmatpush3.bf16.msra.mxu0 %v1125_v11 }
  0x23   : > { %1060 = vmatpush3.bf16.msra.mxu1 %v1126_v12  ;;  %1041 = vmatprep.subr.bf16.mxu0 %v1163_v1 }
  0x24   : > { %1061 = vmatprep.subr.bf16.mxu1 %v1163_v1 }
  0x26   : > { %1042 = vmatpush3.bf16.msra.mxu0 %v1127_v13 }
  0x27   : > { %1062 = vmatpush3.bf16.msra.mxu1 %v1128_v14  ;;  %1043 = vmatprep.subr.bf16.mxu0 %v1163_v1 }
  0x28   : > { %1063 = vmatprep.subr.bf16.mxu1 %v1163_v1 }
  0x2a   : > { %1044 = vmatpush3.bf16.msra.mxu0 %v1129_v15 }
  0x2b   : > { %1064 = vmatpush3.bf16.msra.mxu1 %v1130_v18  ;;  %1069 = vmatprep.subr.bf16.mxu0 %v1163_v1 }
  0x2d   : > { %1046 = vmatmul.mubr.bf16.vlgmr.msra.gmra.mxu0 %v468_v21 }
  0x2e   : > { %1066 = vmatmul.mubr.bf16.vlgmr.msra.gmra.mxu1 %v465_v22  ;;  %1070 = vmatpush3.bf16.msra.mxu0 %v1131_v23 }
  0x2f   : > { %1071 = vmatprep.subr.bf16.mxu0 %v1163_v1  ;;  %1085 = vmatprep.mubr.msk.bf16.mxu0 %vm1164_vm0, %v1163_v1 }
  0x32   : > { %1072 = vmatpush3.bf16.msra.mxu0 %v1132_v24 }
  0x33   : > { %1073 = vmatprep.subr.bf16.mxu0 %v1163_v1 }
  0x36   : > { %1074 = vmatpush3.bf16.msra.mxu0 %v1133_v25 }
  0x37   : > { %1075 = vmatprep.subr.bf16.mxu0 %v1163_v1 }
  0x3a   : > { %1076 = vmatpush3.bf16.msra.mxu0 %v1134_v26 }
  0x3b   : > { %1077 = vmatprep.subr.bf16.mxu0 %v1163_v1 }
  0x3e   : > { %1078 = vmatpush3.bf16.msra.mxu0 %v1135_v27 }
  0x3f   : > { %1079 = vmatprep.subr.bf16.mxu0 %v1163_v1 }
  0x42   : > { %1080 = vmatpush3.bf16.msra.mxu0 %v1136_v28 }
  0x43   : > { %1081 = vmatprep.subr.bf16.mxu0 %v1163_v1 }
  0x46   : > { %1082 = vmatpush3.bf16.msra.mxu0 %v1137_v29 }
  0x47   : > { %1083 = vmatprep.subr.bf16.mxu0 %v1163_v1 }
  0x4a   : > { %1084 = vmatpush3.bf16.msra.mxu0 %v1138_v30 }
  0xed   : > { %v583_v31 = vpop.f32.mrf.mxu0 }
  0xee   : > { %v672_v32 = vpop.f32.mrf.mxu1 }
  0xef   : > { %v673_v34 = vadd.f32 %v672_v32, %v583_v31  ;;  %v1047_v35 = vpop.f32.mrf.mxu0 }
  0xf0   : > { %v1067_v37 = vpop.f32.mrf.mxu1 }
  0xf1   : > { %v686_v38 = vadd.f32 %v983_v33, %v673_v34  ;;  %v586_v39 = vpop.f32.mrf.mxu0 }
  0xf2   : > { %v675_v41 = vpop.f32.mrf.mxu1 }
  0xf3   : > { %v695_v42 = vmul.f32 %v984_v36, %v686_v38  ;;  %v676_v43 = vadd.f32 %v675_v41, %v586_v39  ;;  %v1048_v44 = vpop.f32.mrf.mxu0 }
  0xf4   : > { %v1068_v45 = vpop.f32.mrf.mxu1 }
  0xf5   : > { %v704_v46 = vadd.f32 %v985_v40, %v695_v42  ;;  %v687_v47 = vadd.f32 %v983_v33, %v676_v43 }
  0xf7   : > { %v696_v48 = vmul.f32 %v984_v36, %v687_v47  ;;  %v708_v49 = vmul.f32 0.2, %v704_v46  ;;  %vm706_vm1 = vcmp.gt.f32.partialorder %v704_v46, 0.0 }
  0xf9   : > { %v705_v50 = vadd.f32 %v985_v40, %v696_v48  ;;  %v710_v52 = vsel %vm706_vm1, %v704_v46, %v708_v49 }
  0xfb   : > { %v709_v51 = vmul.f32 0.2, %v705_v50  ;;  %vm707_vm2 = vcmp.gt.f32.partialorder %v705_v50, 0.0 }
  0xfd   : > { %v711_v53 = vsel %vm707_vm2, %v705_v50, %v709_v51 }
  0xfe   : > { %v712_v54 = vpack.c.bf16 %v711_v53, %v710_v52 }
 0x100   : > { %1086 = vmatmul.mubr.bf16.vlgmr.msra.gmra.mxu0 %v712_v54 }
 0x1c0   : > { %v818_v56 = vpop.f32.mrf.mxu0 }
 0x1c1   : > { %v819_v58 = vadd.f32 %v986_v55, %v818_v56 }
 0x1c2   : > { %v1087_v60 = vpop.f32.mrf.mxu0 }
 0x1c3   : > { %v832_v61 = vmul.f32 %v995_v57, %v819_v58 }
 0x1c4   : > { %v821_v62 = vpop.f32.mrf.mxu0 }
 0x1c5   : > { %v841_v63 = vadd.f32 %v996_v59, %v832_v61  ;;  %v822_v0 = vadd.f32 %v986_v55, %v821_v62 }
 0x1c6   : > { %v1088_v1 = vpop.f32.mrf.mxu0 }
 0x1c7   : > { %vm843_vm3 = vcmp.gt.f32.partialorder %v841_v63, 0.0  ;;  %v845_v2 = vmul.f32 0.2, %v841_v63  ;;  %v833_v3 = vmul.f32 %v995_v57, %v822_v0 }
 0x1c9   : > { %v847_v4 = vsel %vm843_vm3, %v841_v63, %v845_v2  ;;  %v842_v5 = vadd.f32 %v996_v59, %v833_v3 }
 0x1ca   : > { %849 = vst [vmem:[%s460_s29] sm:$0xff] %v847_v4 }
 0x1cb   : > { %vm844_vm4 = vcmp.gt.f32.partialorder %v842_v5, 0.0  ;;  %v846_v6 = vmul.f32 0.2, %v842_v5 }
 0x1cd   : > { %v848_v7 = vsel %vm844_vm4, %v842_v5, %v846_v6 }
 0x1ce   : > { %850 = vst [vmem:[%s460_s29 + $0x8] sm:$0xff] %v848_v7 }
 0x1cf PF: > { %s21_s19 = sadd.s32 1, %s1161_s19   ;;  %s1402_s17 = smov %s1157_s18 }
 0x1d0   : > { %p18_p5 = scmp.ge.s32.totalorder %s21_s19, 4   ;;  %s1403_s18 = smov %s1405_s20 }
 0x1d2   :  { %20 = sbr.rel (!%p18_p5) target bundleno = 2 (0x2), region = 97 }

</bundles_post_ra>
